<compile_context>
chip_gen: v7x
topology: tpu7x:2x2x1
jax: 0.10.0
libtpu: 0.0.40
codegen_flags: <defaults>
</compile_context>

<pallas_src>
import math
from functools import partial

import numpy as np
import jax
import jax.numpy as jnp
from jax.experimental import pallas as pl
from jax.experimental.pallas import tpu as pltpu


def _round_up(x, m):
    return (x + m - 1) // m * m


# ----------------------------------------------------------------------------
# Fused kernel: conv3x3+ReLU -> conv3x3 -> (+x) -> conv3x3, one batch element
# ----------------------------------------------------------------------------
def _fused_kernel(x_ref, w1_ref, b1_ref, w2_ref, b2_ref, w3_ref, b3_ref,
                  o_ref, pad_ref, *, H, W, Cin, Cout, S0, NPAD):
    """
    x_ref  : (1, H, W, Cin)   f32  input image
    w*_ref : (9*Cin, C)       bf16 conv weights, row order (kh, kw, cin)
    b*_ref : (1, C)           f32  biases
    o_ref  : (1, H, W, Cout)  f32  output
    pad_ref: (NPAD, Cin)      bf16 scratch.  Rows [S0, S0+H*W) hold the
             current stage's activation flattened row-major (i*W + j); rows
             outside are zero and act as the top/bottom halo.  Width padding
             is NOT stored: taps are contiguous row-shifted slices and the
             left/right wrap-around is killed by a column mask.
    """
    HW = H * W

    # Zero only the halo rows; the interior is fully overwritten each stage.
    pad_ref[0:S0, :] = jnp.zeros((S0, Cin), jnp.bfloat16)
    pad_ref[S0 + HW:NPAD, :] = jnp.zeros((NPAD - S0 - HW, Cin), jnp.bfloat16)

    def conv3x3(w_ref, b_ref, cout, relu):
        # Column index j of every flattened output row p = i*W + j, used to
        # zero the wrapped kw=0 (j==0) / kw=2 (j==W-1) contributions.
        p = jax.lax.broadcasted_iota(jnp.int32, (HW, cout), 0)
        if W & (W - 1) == 0:
            col = jnp.bitwise_and(p, W - 1)          # cheap: W is a power of 2
        else:
            col = jax.lax.rem(p, W)

        def tap(kh, kw):
            # Contiguous row-shifted slice of the flat activation (no copy,
            # no strided window, no reshape) feeding one accumulating dot.
            start = S0 + (kh - 1) * W + (kw - 1)
            lhs = pad_ref[start:start + HW, :]                 # (HW, Cin) bf16
            t = kh * 3 + kw
            rhs = w_ref[t * Cin:(t + 1) * Cin, :]              # (Cin, cout) bf16
            return jnp.dot(lhs, rhs, preferred_element_type=jnp.float32)

        left = tap(0, 0) + tap(1, 0) + tap(2, 0)      # valid only where j > 0
        mid = tap(0, 1) + tap(1, 1) + tap(2, 1)       # always valid
        right = tap(0, 2) + tap(1, 2) + tap(2, 2)     # valid only where j < W-1

        acc = (jnp.where(col > 0, left, 0.0)
               + mid
               + jnp.where(col < W - 1, right, 0.0)
               + b_ref[...])                          # (1, cout) broadcast, f32
        if relu:
            acc = jnp.maximum(acc, 0.0)
        return acc                                    # (HW, cout) f32

    # stage 1: pre[0] + ReLU
    pad_ref[S0:S0 + HW, :] = x_ref[0].reshape(HW, Cin).astype(jnp.bfloat16)
    h = conv3x3(w1_ref, b1_ref, Cin, relu=True)

    # stage 2: pre[2], then residual add (x re-read from the f32 input block)
    pad_ref[S0:S0 + HW, :] = h.astype(jnp.bfloat16)
    h = conv3x3(w2_ref, b2_ref, Cin, relu=False) + x_ref[0].reshape(HW, Cin)

    # stage 3: ext
    pad_ref[S0:S0 + HW, :] = h.astype(jnp.bfloat16)
    y = conv3x3(w3_ref, b3_ref, Cout, relu=False)
    o_ref[0] = y.reshape(H, W, Cout).astype(o_ref.dtype)


# ----------------------------------------------------------------------------
# Wrapper
# ----------------------------------------------------------------------------
def _flatten_w(w):
    # (KH, KW, Cin, Cout) -> (KH*KW*Cin, Cout); row order (kh, kw, cin)
    # matches the per-tap weight slices taken inside the kernel.
    kh, kw, cin, cout = w.shape
    return w.reshape(kh * kw * cin, cout).astype(jnp.bfloat16)


def inverse_transform_forward(params, x):
    """x: (N, H, W, Cin) f32, NHWC."""
    N, H, W, Cin = x.shape
    Cout = params["ext"]["w"].shape[-1]
    # The module's pre-convs are Cin -> Cin (required by the residual add).
    assert params["pre0"]["w"].shape[-1] == Cin
    assert params["pre1"]["w"].shape[-1] == Cin

    w1 = _flatten_w(params["pre0"]["w"])
    w2 = _flatten_w(params["pre1"]["w"])
    w3 = _flatten_w(params["ext"]["w"])
    b1 = params["pre0"]["b"].reshape(1, Cin).astype(jnp.float32)
    b2 = params["pre1"]["b"].reshape(1, Cin).astype(jnp.float32)
    b3 = params["ext"]["b"].reshape(1, Cout).astype(jnp.float32)

    # Halo geometry: >= W+1 zero rows before/after the flattened interior,
    # rounded to the bf16 sublane tile (16 rows) so the big interior stores
    # and the halo zeroing stay tile-aligned.
    S0 = _round_up(W + 1, 16)
    NPAD = _round_up(S0 + H * W + W + 1, 16)

    kern = partial(_fused_kernel, H=H, W=W, Cin=Cin, Cout=Cout,
                   S0=S0, NPAD=NPAD)

    def rep(shape):  # weight/bias block replicated across the batch grid
        return pl.BlockSpec(shape, lambda n: (0, 0))

    flops = 2 * N * H * W * 9 * Cin * (Cin + Cin + Cout)
    bytes_accessed = (N * H * W * Cin * 4 + N * H * W * Cout * 4
                      + (w1.size + w2.size + w3.size) * 2
                      + (b1.size + b2.size + b3.size) * 4)

    out = pl.pallas_call(
        kern,
        out_shape=jax.ShapeDtypeStruct((N, H, W, Cout), x.dtype),
        grid=(N,),
        in_specs=[
            pl.BlockSpec((1, H, W, Cin), lambda n: (n, 0, 0, 0)),
            rep(w1.shape), rep(b1.shape),
            rep(w2.shape), rep(b2.shape),
            rep(w3.shape), rep(b3.shape),
        ],
        out_specs=pl.BlockSpec((1, H, W, Cout), lambda n: (n, 0, 0, 0)),
        scratch_shapes=[pltpu.VMEM((NPAD, Cin), jnp.bfloat16)],
        compiler_params=pltpu.CompilerParams(
            dimension_semantics=("parallel",),
            vmem_limit_bytes=32 * 1024 * 1024,
        ),
        cost_estimate=pl.CostEstimate(
            flops=flops, transcendentals=0, bytes_accessed=bytes_accessed),
    )(x, w1, b1, w2, b2, w3, b3)
    return out


# ----------------------------------------------------------------------------
# Pure-JAX reference (for a loose bf16-tolerance correctness check)
# ----------------------------------------------------------------------------
def reference_forward(params, x):
    def conv(p, v):
        return jax.lax.conv_general_dilated(
            v, p["w"], window_strides=(1, 1), padding="SAME",
            dimension_numbers=("NHWC", "HWIO", "NHWC")) + p["b"]
    h = jax.nn.relu(conv(params["pre0"], x))
    h = conv(params["pre1"], h)
    h = h + x
    return conv(params["ext"], h)


# ----------------------------------------------------------------------------
# Parameter init (mirrors PyTorch: xavier_normal_ weights, default Conv2d bias)
# ----------------------------------------------------------------------------
def init_conv(key, cin, cout, k=3):
    kw_, kb_ = jax.random.split(key)
    fan_in, fan_out = cin * k * k, cout * k * k
    std = math.sqrt(2.0 / (fan_in + fan_out))            # xavier_normal_
    w = std * jax.random.normal(kw_, (k, k, cin, cout), jnp.float32)
    bound = 1.0 / math.sqrt(fan_in)                      # PyTorch bias default
    b = jax.random.uniform(kb_, (cout,), jnp.float32, -bound, bound)
    return {"w": w, "b": b}


def init_model(key, in_channel, out_channel):
    k0, k1, k2 = jax.random.split(key, 3)
    return {
        "pre0": init_conv(k0, in_channel, in_channel),   # pre[0]
        "pre1": init_conv(k1, in_channel, in_channel),   # pre[2]
        "ext":  init_conv(k2, in_channel, out_channel),  # ext
    }


# ----------------------------------------------------------------------------
if __name__ == "__main__":
    # channels = 128 -> channel dim exactly fills the 128-lane vreg: lane-dense
    # loads/stores for every activation, weight and output tile.
    in_channel = 128
    out_channel = 128
    N, H, W = 2, 16, 16

    key = jax.random.PRNGKey(0)
    pkey, xkey = jax.random.split(key)
    params = init_model(pkey, in_channel, out_channel)

    # NHWC input (the PyTorch reference would be NCHW (2, 128, 16, 16))
    x = jax.random.normal(xkey, (N, H, W, in_channel), jnp.float32)

    out = jax.jit(inverse_transform_forward)(params, x)
    jax.block_until_ready(out)
    assert out.shape == (N, H, W, out_channel)
    assert out.dtype == jnp.float32

    # Loose tolerance: activations/weights go through bf16 on the MXU path.
    ref = reference_forward(params, x)
    np.testing.assert_allclose(np.asarray(out), np.asarray(ref),
                               atol=0.1, rtol=0.1)
    print("KERNEL_OK")
</pallas_src>

<mosaic_0001>
module attributes {stable_mosaic.version = 11 : i64} {
  func.func @_fused_kernel(%arg0: i32, %arg1: memref<1x16x16x128xf32, #tpu.memory_space<vmem>>, %arg2: memref<1152x128xbf16, #tpu.memory_space<vmem>>, %arg3: memref<1x128xf32, #tpu.memory_space<vmem>>, %arg4: memref<1152x128xbf16, #tpu.memory_space<vmem>>, %arg5: memref<1x128xf32, #tpu.memory_space<vmem>>, %arg6: memref<1152x128xbf16, #tpu.memory_space<vmem>>, %arg7: memref<1x128xf32, #tpu.memory_space<vmem>>, %arg8: memref<1x16x16x128xf32, #tpu.memory_space<vmem>>, %arg9: memref<320x128xbf16, #tpu.memory_space<vmem>>) attributes {dimension_semantics = [#tpu.dimension_semantics<parallel>], iteration_bounds = array<i64: 2>, scalar_prefetch = 0 : i64, scratch_operands = 1 : i64, tpu.core_type = #tpu.core_type<tc>, window_params = [{transform_indices = @transform_0, window_bounds = array<i64: 1, 16, 16, 128>}, {pipeline_mode = #tpu.pipeline_mode<synchronous>, transform_indices = @transform_1, window_bounds = array<i64: 1152, 128>}, {pipeline_mode = #tpu.pipeline_mode<synchronous>, transform_indices = @transform_2, window_bounds = array<i64: 1, 128>}, {pipeline_mode = #tpu.pipeline_mode<synchronous>, transform_indices = @transform_3, window_bounds = array<i64: 1152, 128>}, {pipeline_mode = #tpu.pipeline_mode<synchronous>, transform_indices = @transform_4, window_bounds = array<i64: 1, 128>}, {pipeline_mode = #tpu.pipeline_mode<synchronous>, transform_indices = @transform_5, window_bounds = array<i64: 1152, 128>}, {pipeline_mode = #tpu.pipeline_mode<synchronous>, transform_indices = @transform_6, window_bounds = array<i64: 1, 128>}, {transform_indices = @transform_7, window_bounds = array<i64: 1, 16, 16, 128>}]} {
    %cst = arith.constant 0.000000e+00 : bf16
    %0 = vector.broadcast %cst : bf16 to vector<32x128xbf16>
    %c0 = arith.constant 0 : index
    %c0_0 = arith.constant 0 : index
    %1 = vector.load %arg9[%c0, %c0_0] : memref<320x128xbf16, #tpu.memory_space<vmem>>, vector<32x128xbf16>
    tpu.vector_store %arg9[%c0, %c0_0], %0 {strides = array<i32>} : memref<320x128xbf16, #tpu.memory_space<vmem>>, vector<32x128xbf16>,
    %cst_1 = arith.constant 0.000000e+00 : bf16
    %2 = vector.broadcast %cst_1 : bf16 to vector<32x128xbf16>
    %c288 = arith.constant 288 : index
    %c0_2 = arith.constant 0 : index
    %3 = vector.load %arg9[%c288, %c0_2] : memref<320x128xbf16, #tpu.memory_space<vmem>>, vector<32x128xbf16>
    tpu.vector_store %arg9[%c288, %c0_2], %2 {strides = array<i32>} : memref<320x128xbf16, #tpu.memory_space<vmem>>, vector<32x128xbf16>,
    %c0_3 = arith.constant 0 : index
    %c0_4 = arith.constant 0 : index
    %c0_5 = arith.constant 0 : index
    %c0_6 = arith.constant 0 : index
    %4 = vector.load %arg1[%c0_3, %c0_4, %c0_5, %c0_6] : memref<1x16x16x128xf32, #tpu.memory_space<vmem>>, vector<1x16x16x128xf32>
    %5 = vector.shape_cast %4 : vector<1x16x16x128xf32> to vector<16x16x128xf32>
    %6 = vector.shape_cast %5 : vector<16x16x128xf32> to vector<256x128xf32>
    %7 = arith.truncf %6 : vector<256x128xf32> to vector<256x128xbf16>
    %c32 = arith.constant 32 : index
    %c0_7 = arith.constant 0 : index
    %8 = vector.load %arg9[%c32, %c0_7] : memref<320x128xbf16, #tpu.memory_space<vmem>>, vector<256x128xbf16>
    tpu.vector_store %arg9[%c32, %c0_7], %7 {strides = array<i32>} : memref<320x128xbf16, #tpu.memory_space<vmem>>, vector<256x128xbf16>,
    %9 = tpu.iota {dimensions = array<i32: 0>} : vector<256x128xi32>
    %c15_i32 = arith.constant 15 : i32
    %10 = vector.broadcast %c15_i32 : i32 to vector<256x128xi32>
    %11 = arith.andi %9, %10 : vector<256x128xi32>
    %c15 = arith.constant 15 : index
    %c0_8 = arith.constant 0 : index
    %12 = vector.load %arg9[%c15, %c0_8] : memref<320x128xbf16, #tpu.memory_space<vmem>>, vector<256x128xbf16>
    %c0_9 = arith.constant 0 : index
    %c0_10 = arith.constant 0 : index
    %13 = vector.load %arg2[%c0_9, %c0_10] : memref<1152x128xbf16, #tpu.memory_space<vmem>>, vector<128x128xbf16>
    %cst_11 = arith.constant dense<0.000000e+00> : vector<256x128xf32>
    %14 = tpu.matmul %12, %13, %cst_11 {dimension_numbers = #tpu.dot_dimension_numbers<[1], [0], [0], [1], [0, 0, 1, 1], [], []>} : vector<256x128xbf16>, vector<128x128xbf16>, vector<256x128xf32> -> vector<256x128xf32>
    %c31 = arith.constant 31 : index
    %c0_12 = arith.constant 0 : index
    %15 = vector.load %arg9[%c31, %c0_12] : memref<320x128xbf16, #tpu.memory_space<vmem>>, vector<256x128xbf16>
    %c384 = arith.constant 384 : index
    %c0_13 = arith.constant 0 : index
    %16 = vector.load %arg2[%c384, %c0_13] : memref<1152x128xbf16, #tpu.memory_space<vmem>>, vector<128x128xbf16>
    %cst_14 = arith.constant dense<0.000000e+00> : vector<256x128xf32>
    %17 = tpu.matmul %15, %16, %cst_14 {dimension_numbers = #tpu.dot_dimension_numbers<[1], [0], [0], [1], [0, 0, 1, 1], [], []>} : vector<256x128xbf16>, vector<128x128xbf16>, vector<256x128xf32> -> vector<256x128xf32>
    %18 = arith.addf %14, %17 : vector<256x128xf32>
    %c47 = arith.constant 47 : index
    %c0_15 = arith.constant 0 : index
    %19 = vector.load %arg9[%c47, %c0_15] : memref<320x128xbf16, #tpu.memory_space<vmem>>, vector<256x128xbf16>
    %c768 = arith.constant 768 : index
    %c0_16 = arith.constant 0 : index
    %20 = vector.load %arg2[%c768, %c0_16] : memref<1152x128xbf16, #tpu.memory_space<vmem>>, vector<128x128xbf16>
    %cst_17 = arith.constant dense<0.000000e+00> : vector<256x128xf32>
    %21 = tpu.matmul %19, %20, %cst_17 {dimension_numbers = #tpu.dot_dimension_numbers<[1], [0], [0], [1], [0, 0, 1, 1], [], []>} : vector<256x128xbf16>, vector<128x128xbf16>, vector<256x128xf32> -> vector<256x128xf32>
    %22 = arith.addf %18, %21 : vector<256x128xf32>
    %c16 = arith.constant 16 : index
    %c0_18 = arith.constant 0 : index
    %23 = vector.load %arg9[%c16, %c0_18] : memref<320x128xbf16, #tpu.memory_space<vmem>>, vector<256x128xbf16>
    %c128 = arith.constant 128 : index
    %c0_19 = arith.constant 0 : index
    %24 = vector.load %arg2[%c128, %c0_19] : memref<1152x128xbf16, #tpu.memory_space<vmem>>, vector<128x128xbf16>
    %cst_20 = arith.constant dense<0.000000e+00> : vector<256x128xf32>
    %25 = tpu.matmul %23, %24, %cst_20 {dimension_numbers = #tpu.dot_dimension_numbers<[1], [0], [0], [1], [0, 0, 1, 1], [], []>} : vector<256x128xbf16>, vector<128x128xbf16>, vector<256x128xf32> -> vector<256x128xf32>
    %c32_21 = arith.constant 32 : index
    %c0_22 = arith.constant 0 : index
    %26 = vector.load %arg9[%c32_21, %c0_22] : memref<320x128xbf16, #tpu.memory_space<vmem>>, vector<256x128xbf16>
    %c512 = arith.constant 512 : index
    %c0_23 = arith.constant 0 : index
    %27 = vector.load %arg2[%c512, %c0_23] : memref<1152x128xbf16, #tpu.memory_space<vmem>>, vector<128x128xbf16>
    %cst_24 = arith.constant dense<0.000000e+00> : vector<256x128xf32>
    %28 = tpu.matmul %26, %27, %cst_24 {dimension_numbers = #tpu.dot_dimension_numbers<[1], [0], [0], [1], [0, 0, 1, 1], [], []>} : vector<256x128xbf16>, vector<128x128xbf16>, vector<256x128xf32> -> vector<256x128xf32>
    %29 = arith.addf %25, %28 : vector<256x128xf32>
    %c48 = arith.constant 48 : index
    %c0_25 = arith.constant 0 : index
    %30 = vector.load %arg9[%c48, %c0_25] : memref<320x128xbf16, #tpu.memory_space<vmem>>, vector<256x128xbf16>
    %c896 = arith.constant 896 : index
    %c0_26 = arith.constant 0 : index
    %31 = vector.load %arg2[%c896, %c0_26] : memref<1152x128xbf16, #tpu.memory_space<vmem>>, vector<128x128xbf16>
    %cst_27 = arith.constant dense<0.000000e+00> : vector<256x128xf32>
    %32 = tpu.matmul %30, %31, %cst_27 {dimension_numbers = #tpu.dot_dimension_numbers<[1], [0], [0], [1], [0, 0, 1, 1], [], []>} : vector<256x128xbf16>, vector<128x128xbf16>, vector<256x128xf32> -> vector<256x128xf32>
    %33 = arith.addf %29, %32 : vector<256x128xf32>
    %c17 = arith.constant 17 : index
    %c0_28 = arith.constant 0 : index
    %34 = vector.load %arg9[%c17, %c0_28] : memref<320x128xbf16, #tpu.memory_space<vmem>>, vector<256x128xbf16>
    %c256 = arith.constant 256 : index
    %c0_29 = arith.constant 0 : index
    %35 = vector.load %arg2[%c256, %c0_29] : memref<1152x128xbf16, #tpu.memory_space<vmem>>, vector<128x128xbf16>
    %cst_30 = arith.constant dense<0.000000e+00> : vector<256x128xf32>
    %36 = tpu.matmul %34, %35, %cst_30 {dimension_numbers = #tpu.dot_dimension_numbers<[1], [0], [0], [1], [0, 0, 1, 1], [], []>} : vector<256x128xbf16>, vector<128x128xbf16>, vector<256x128xf32> -> vector<256x128xf32>
    %c33 = arith.constant 33 : index
    %c0_31 = arith.constant 0 : index
    %37 = vector.load %arg9[%c33, %c0_31] : memref<320x128xbf16, #tpu.memory_space<vmem>>, vector<256x128xbf16>
    %c640 = arith.constant 640 : index
    %c0_32 = arith.constant 0 : index
    %38 = vector.load %arg2[%c640, %c0_32] : memref<1152x128xbf16, #tpu.memory_space<vmem>>, vector<128x128xbf16>
    %cst_33 = arith.constant dense<0.000000e+00> : vector<256x128xf32>
    %39 = tpu.matmul %37, %38, %cst_33 {dimension_numbers = #tpu.dot_dimension_numbers<[1], [0], [0], [1], [0, 0, 1, 1], [], []>} : vector<256x128xbf16>, vector<128x128xbf16>, vector<256x128xf32> -> vector<256x128xf32>
    %40 = arith.addf %36, %39 : vector<256x128xf32>
    %c49 = arith.constant 49 : index
    %c0_34 = arith.constant 0 : index
    %41 = vector.load %arg9[%c49, %c0_34] : memref<320x128xbf16, #tpu.memory_space<vmem>>, vector<256x128xbf16>
    %c1024 = arith.constant 1024 : index
    %c0_35 = arith.constant 0 : index
    %42 = vector.load %arg2[%c1024, %c0_35] : memref<1152x128xbf16, #tpu.memory_space<vmem>>, vector<128x128xbf16>
    %cst_36 = arith.constant dense<0.000000e+00> : vector<256x128xf32>
    %43 = tpu.matmul %41, %42, %cst_36 {dimension_numbers = #tpu.dot_dimension_numbers<[1], [0], [0], [1], [0, 0, 1, 1], [], []>} : vector<256x128xbf16>, vector<128x128xbf16>, vector<256x128xf32> -> vector<256x128xf32>
    %44 = arith.addf %40, %43 : vector<256x128xf32>
    %c0_i32 = arith.constant 0 : i32
    %45 = vector.broadcast %c0_i32 : i32 to vector<256x128xi32>
    %46 = arith.cmpi sgt, %11, %45 : vector<256x128xi32>
    %cst_37 = arith.constant 0.000000e+00 : f32
    %47 = vector.broadcast %cst_37 : f32 to vector<256x128xf32>
    %48 = arith.select %46, %22, %47 : vector<256x128xi1>, vector<256x128xf32>
    %49 = arith.addf %48, %33 : vector<256x128xf32>
    %c15_i32_38 = arith.constant 15 : i32
    %50 = vector.broadcast %c15_i32_38 : i32 to vector<256x128xi32>
    %51 = arith.cmpi slt, %11, %50 : vector<256x128xi32>
    %cst_39 = arith.constant 0.000000e+00 : f32
    %52 = vector.broadcast %cst_39 : f32 to vector<256x128xf32>
    %53 = arith.select %51, %44, %52 : vector<256x128xi1>, vector<256x128xf32>
    %54 = arith.addf %49, %53 : vector<256x128xf32>
    %c0_40 = arith.constant 0 : index
    %c0_41 = arith.constant 0 : index
    %55 = vector.load %arg3[%c0_40, %c0_41] : memref<1x128xf32, #tpu.memory_space<vmem>>, vector<1x128xf32>
    %56 = vector.broadcast %55 : vector<1x128xf32> to vector<256x128xf32>
    %57 = arith.addf %54, %56 : vector<256x128xf32>
    %cst_42 = arith.constant 0.000000e+00 : f32
    %58 = vector.broadcast %cst_42 : f32 to vector<256x128xf32>
    %59 = arith.maximumf %57, %58 : vector<256x128xf32>
    %60 = arith.truncf %59 : vector<256x128xf32> to vector<256x128xbf16>
    %c32_43 = arith.constant 32 : index
    %c0_44 = arith.constant 0 : index
    %61 = vector.load %arg9[%c32_43, %c0_44] : memref<320x128xbf16, #tpu.memory_space<vmem>>, vector<256x128xbf16>
    tpu.vector_store %arg9[%c32_43, %c0_44], %60 {strides = array<i32>} : memref<320x128xbf16, #tpu.memory_space<vmem>>, vector<256x128xbf16>,
    %62 = tpu.iota {dimensions = array<i32: 0>} : vector<256x128xi32>
    %c15_i32_45 = arith.constant 15 : i32
    %63 = vector.broadcast %c15_i32_45 : i32 to vector<256x128xi32>
    %64 = arith.andi %62, %63 : vector<256x128xi32>
    %c15_46 = arith.constant 15 : index
    %c0_47 = arith.constant 0 : index
    %65 = vector.load %arg9[%c15_46, %c0_47] : memref<320x128xbf16, #tpu.memory_space<vmem>>, vector<256x128xbf16>
    %c0_48 = arith.constant 0 : index
    %c0_49 = arith.constant 0 : index
    %66 = vector.load %arg4[%c0_48, %c0_49] : memref<1152x128xbf16, #tpu.memory_space<vmem>>, vector<128x128xbf16>
    %cst_50 = arith.constant dense<0.000000e+00> : vector<256x128xf32>
    %67 = tpu.matmul %65, %66, %cst_50 {dimension_numbers = #tpu.dot_dimension_numbers<[1], [0], [0], [1], [0, 0, 1, 1], [], []>} : vector<256x128xbf16>, vector<128x128xbf16>, vector<256x128xf32> -> vector<256x128xf32>
    %c31_51 = arith.constant 31 : index
    %c0_52 = arith.constant 0 : index
    %68 = vector.load %arg9[%c31_51, %c0_52] : memref<320x128xbf16, #tpu.memory_space<vmem>>, vector<256x128xbf16>
    %c384_53 = arith.constant 384 : index
    %c0_54 = arith.constant 0 : index
    %69 = vector.load %arg4[%c384_53, %c0_54] : memref<1152x128xbf16, #tpu.memory_space<vmem>>, vector<128x128xbf16>
    %cst_55 = arith.constant dense<0.000000e+00> : vector<256x128xf32>
    %70 = tpu.matmul %68, %69, %cst_55 {dimension_numbers = #tpu.dot_dimension_numbers<[1], [0], [0], [1], [0, 0, 1, 1], [], []>} : vector<256x128xbf16>, vector<128x128xbf16>, vector<256x128xf32> -> vector<256x128xf32>
    %71 = arith.addf %67, %70 : vector<256x128xf32>
    %c47_56 = arith.constant 47 : index
    %c0_57 = arith.constant 0 : index
    %72 = vector.load %arg9[%c47_56, %c0_57] : memref<320x128xbf16, #tpu.memory_space<vmem>>, vector<256x128xbf16>
    %c768_58 = arith.constant 768 : index
    %c0_59 = arith.constant 0 : index
    %73 = vector.load %arg4[%c768_58, %c0_59] : memref<1152x128xbf16, #tpu.memory_space<vmem>>, vector<128x128xbf16>
    %cst_60 = arith.constant dense<0.000000e+00> : vector<256x128xf32>
    %74 = tpu.matmul %72, %73, %cst_60 {dimension_numbers = #tpu.dot_dimension_numbers<[1], [0], [0], [1], [0, 0, 1, 1], [], []>} : vector<256x128xbf16>, vector<128x128xbf16>, vector<256x128xf32> -> vector<256x128xf32>
    %75 = arith.addf %71, %74 : vector<256x128xf32>
    %c16_61 = arith.constant 16 : index
    %c0_62 = arith.constant 0 : index
    %76 = vector.load %arg9[%c16_61, %c0_62] : memref<320x128xbf16, #tpu.memory_space<vmem>>, vector<256x128xbf16>
    %c128_63 = arith.constant 128 : index
    %c0_64 = arith.constant 0 : index
    %77 = vector.load %arg4[%c128_63, %c0_64] : memref<1152x128xbf16, #tpu.memory_space<vmem>>, vector<128x128xbf16>
    %cst_65 = arith.constant dense<0.000000e+00> : vector<256x128xf32>
    %78 = tpu.matmul %76, %77, %cst_65 {dimension_numbers = #tpu.dot_dimension_numbers<[1], [0], [0], [1], [0, 0, 1, 1], [], []>} : vector<256x128xbf16>, vector<128x128xbf16>, vector<256x128xf32> -> vector<256x128xf32>
    %c32_66 = arith.constant 32 : index
    %c0_67 = arith.constant 0 : index
    %79 = vector.load %arg9[%c32_66, %c0_67] : memref<320x128xbf16, #tpu.memory_space<vmem>>, vector<256x128xbf16>
    %c512_68 = arith.constant 512 : index
    %c0_69 = arith.constant 0 : index
    %80 = vector.load %arg4[%c512_68, %c0_69] : memref<1152x128xbf16, #tpu.memory_space<vmem>>, vector<128x128xbf16>
    %cst_70 = arith.constant dense<0.000000e+00> : vector<256x128xf32>
    %81 = tpu.matmul %79, %80, %cst_70 {dimension_numbers = #tpu.dot_dimension_numbers<[1], [0], [0], [1], [0, 0, 1, 1], [], []>} : vector<256x128xbf16>, vector<128x128xbf16>, vector<256x128xf32> -> vector<256x128xf32>
    %82 = arith.addf %78, %81 : vector<256x128xf32>
    %c48_71 = arith.constant 48 : index
    %c0_72 = arith.constant 0 : index
    %83 = vector.load %arg9[%c48_71, %c0_72] : memref<320x128xbf16, #tpu.memory_space<vmem>>, vector<256x128xbf16>
    %c896_73 = arith.constant 896 : index
    %c0_74 = arith.constant 0 : index
    %84 = vector.load %arg4[%c896_73, %c0_74] : memref<1152x128xbf16, #tpu.memory_space<vmem>>, vector<128x128xbf16>
    %cst_75 = arith.constant dense<0.000000e+00> : vector<256x128xf32>
    %85 = tpu.matmul %83, %84, %cst_75 {dimension_numbers = #tpu.dot_dimension_numbers<[1], [0], [0], [1], [0, 0, 1, 1], [], []>} : vector<256x128xbf16>, vector<128x128xbf16>, vector<256x128xf32> -> vector<256x128xf32>
    %86 = arith.addf %82, %85 : vector<256x128xf32>
    %c17_76 = arith.constant 17 : index
    %c0_77 = arith.constant 0 : index
    %87 = vector.load %arg9[%c17_76, %c0_77] : memref<320x128xbf16, #tpu.memory_space<vmem>>, vector<256x128xbf16>
    %c256_78 = arith.constant 256 : index
    %c0_79 = arith.constant 0 : index
    %88 = vector.load %arg4[%c256_78, %c0_79] : memref<1152x128xbf16, #tpu.memory_space<vmem>>, vector<128x128xbf16>
    %cst_80 = arith.constant dense<0.000000e+00> : vector<256x128xf32>
    %89 = tpu.matmul %87, %88, %cst_80 {dimension_numbers = #tpu.dot_dimension_numbers<[1], [0], [0], [1], [0, 0, 1, 1], [], []>} : vector<256x128xbf16>, vector<128x128xbf16>, vector<256x128xf32> -> vector<256x128xf32>
    %c33_81 = arith.constant 33 : index
    %c0_82 = arith.constant 0 : index
    %90 = vector.load %arg9[%c33_81, %c0_82] : memref<320x128xbf16, #tpu.memory_space<vmem>>, vector<256x128xbf16>
    %c640_83 = arith.constant 640 : index
    %c0_84 = arith.constant 0 : index
    %91 = vector.load %arg4[%c640_83, %c0_84] : memref<1152x128xbf16, #tpu.memory_space<vmem>>, vector<128x128xbf16>
    %cst_85 = arith.constant dense<0.000000e+00> : vector<256x128xf32>
    %92 = tpu.matmul %90, %91, %cst_85 {dimension_numbers = #tpu.dot_dimension_numbers<[1], [0], [0], [1], [0, 0, 1, 1], [], []>} : vector<256x128xbf16>, vector<128x128xbf16>, vector<256x128xf32> -> vector<256x128xf32>
    %93 = arith.addf %89, %92 : vector<256x128xf32>
    %c49_86 = arith.constant 49 : index
    %c0_87 = arith.constant 0 : index
    %94 = vector.load %arg9[%c49_86, %c0_87] : memref<320x128xbf16, #tpu.memory_space<vmem>>, vector<256x128xbf16>
    %c1024_88 = arith.constant 1024 : index
    %c0_89 = arith.constant 0 : index
    %95 = vector.load %arg4[%c1024_88, %c0_89] : memref<1152x128xbf16, #tpu.memory_space<vmem>>, vector<128x128xbf16>
    %cst_90 = arith.constant dense<0.000000e+00> : vector<256x128xf32>
    %96 = tpu.matmul %94, %95, %cst_90 {dimension_numbers = #tpu.dot_dimension_numbers<[1], [0], [0], [1], [0, 0, 1, 1], [], []>} : vector<256x128xbf16>, vector<128x128xbf16>, vector<256x128xf32> -> vector<256x128xf32>
    %97 = arith.addf %93, %96 : vector<256x128xf32>
    %c0_i32_91 = arith.constant 0 : i32
    %98 = vector.broadcast %c0_i32_91 : i32 to vector<256x128xi32>
    %99 = arith.cmpi sgt, %64, %98 : vector<256x128xi32>
    %cst_92 = arith.constant 0.000000e+00 : f32
    %100 = vector.broadcast %cst_92 : f32 to vector<256x128xf32>
    %101 = arith.select %99, %75, %100 : vector<256x128xi1>, vector<256x128xf32>
    %102 = arith.addf %101, %86 : vector<256x128xf32>
    %c15_i32_93 = arith.constant 15 : i32
    %103 = vector.broadcast %c15_i32_93 : i32 to vector<256x128xi32>
    %104 = arith.cmpi slt, %64, %103 : vector<256x128xi32>
    %cst_94 = arith.constant 0.000000e+00 : f32
    %105 = vector.broadcast %cst_94 : f32 to vector<256x128xf32>
    %106 = arith.select %104, %97, %105 : vector<256x128xi1>, vector<256x128xf32>
    %107 = arith.addf %102, %106 : vector<256x128xf32>
    %c0_95 = arith.constant 0 : index
    %c0_96 = arith.constant 0 : index
    %108 = vector.load %arg5[%c0_95, %c0_96] : memref<1x128xf32, #tpu.memory_space<vmem>>, vector<1x128xf32>
    %109 = vector.broadcast %108 : vector<1x128xf32> to vector<256x128xf32>
    %110 = arith.addf %107, %109 : vector<256x128xf32>
    %c0_97 = arith.constant 0 : index
    %c0_98 = arith.constant 0 : index
    %c0_99 = arith.constant 0 : index
    %c0_100 = arith.constant 0 : index
    %111 = vector.load %arg1[%c0_97, %c0_98, %c0_99, %c0_100] : memref<1x16x16x128xf32, #tpu.memory_space<vmem>>, vector<1x16x16x128xf32>
    %112 = vector.shape_cast %111 : vector<1x16x16x128xf32> to vector<16x16x128xf32>
    %113 = vector.shape_cast %112 : vector<16x16x128xf32> to vector<256x128xf32>
    %114 = arith.addf %110, %113 : vector<256x128xf32>
    %115 = arith.truncf %114 : vector<256x128xf32> to vector<256x128xbf16>
    %c32_101 = arith.constant 32 : index
    %c0_102 = arith.constant 0 : index
    %116 = vector.load %arg9[%c32_101, %c0_102] : memref<320x128xbf16, #tpu.memory_space<vmem>>, vector<256x128xbf16>
    tpu.vector_store %arg9[%c32_101, %c0_102], %115 {strides = array<i32>} : memref<320x128xbf16, #tpu.memory_space<vmem>>, vector<256x128xbf16>,
    %117 = tpu.iota {dimensions = array<i32: 0>} : vector<256x128xi32>
    %c15_i32_103 = arith.constant 15 : i32
    %118 = vector.broadcast %c15_i32_103 : i32 to vector<256x128xi32>
    %119 = arith.andi %117, %118 : vector<256x128xi32>
    %c15_104 = arith.constant 15 : index
    %c0_105 = arith.constant 0 : index
    %120 = vector.load %arg9[%c15_104, %c0_105] : memref<320x128xbf16, #tpu.memory_space<vmem>>, vector<256x128xbf16>
    %c0_106 = arith.constant 0 : index
    %c0_107 = arith.constant 0 : index
    %121 = vector.load %arg6[%c0_106, %c0_107] : memref<1152x128xbf16, #tpu.memory_space<vmem>>, vector<128x128xbf16>
    %cst_108 = arith.constant dense<0.000000e+00> : vector<256x128xf32>
    %122 = tpu.matmul %120, %121, %cst_108 {dimension_numbers = #tpu.dot_dimension_numbers<[1], [0], [0], [1], [0, 0, 1, 1], [], []>} : vector<256x128xbf16>, vector<128x128xbf16>, vector<256x128xf32> -> vector<256x128xf32>
    %c31_109 = arith.constant 31 : index
    %c0_110 = arith.constant 0 : index
    %123 = vector.load %arg9[%c31_109, %c0_110] : memref<320x128xbf16, #tpu.memory_space<vmem>>, vector<256x128xbf16>
    %c384_111 = arith.constant 384 : index
    %c0_112 = arith.constant 0 : index
    %124 = vector.load %arg6[%c384_111, %c0_112] : memref<1152x128xbf16, #tpu.memory_space<vmem>>, vector<128x128xbf16>
    %cst_113 = arith.constant dense<0.000000e+00> : vector<256x128xf32>
    %125 = tpu.matmul %123, %124, %cst_113 {dimension_numbers = #tpu.dot_dimension_numbers<[1], [0], [0], [1], [0, 0, 1, 1], [], []>} : vector<256x128xbf16>, vector<128x128xbf16>, vector<256x128xf32> -> vector<256x128xf32>
    %126 = arith.addf %122, %125 : vector<256x128xf32>
    %c47_114 = arith.constant 47 : index
    %c0_115 = arith.constant 0 : index
    %127 = vector.load %arg9[%c47_114, %c0_115] : memref<320x128xbf16, #tpu.memory_space<vmem>>, vector<256x128xbf16>
    %c768_116 = arith.constant 768 : index
    %c0_117 = arith.constant 0 : index
    %128 = vector.load %arg6[%c768_116, %c0_117] : memref<1152x128xbf16, #tpu.memory_space<vmem>>, vector<128x128xbf16>
    %cst_118 = arith.constant dense<0.000000e+00> : vector<256x128xf32>
    %129 = tpu.matmul %127, %128, %cst_118 {dimension_numbers = #tpu.dot_dimension_numbers<[1], [0], [0], [1], [0, 0, 1, 1], [], []>} : vector<256x128xbf16>, vector<128x128xbf16>, vector<256x128xf32> -> vector<256x128xf32>
    %130 = arith.addf %126, %129 : vector<256x128xf32>
    %c16_119 = arith.constant 16 : index
    %c0_120 = arith.constant 0 : index
    %131 = vector.load %arg9[%c16_119, %c0_120] : memref<320x128xbf16, #tpu.memory_space<vmem>>, vector<256x128xbf16>
    %c128_121 = arith.constant 128 : index
    %c0_122 = arith.constant 0 : index
    %132 = vector.load %arg6[%c128_121, %c0_122] : memref<1152x128xbf16, #tpu.memory_space<vmem>>, vector<128x128xbf16>
    %cst_123 = arith.constant dense<0.000000e+00> : vector<256x128xf32>
    %133 = tpu.matmul %131, %132, %cst_123 {dimension_numbers = #tpu.dot_dimension_numbers<[1], [0], [0], [1], [0, 0, 1, 1], [], []>} : vector<256x128xbf16>, vector<128x128xbf16>, vector<256x128xf32> -> vector<256x128xf32>
    %c32_124 = arith.constant 32 : index
    %c0_125 = arith.constant 0 : index
    %134 = vector.load %arg9[%c32_124, %c0_125] : memref<320x128xbf16, #tpu.memory_space<vmem>>, vector<256x128xbf16>
    %c512_126 = arith.constant 512 : index
    %c0_127 = arith.constant 0 : index
    %135 = vector.load %arg6[%c512_126, %c0_127] : memref<1152x128xbf16, #tpu.memory_space<vmem>>, vector<128x128xbf16>
    %cst_128 = arith.constant dense<0.000000e+00> : vector<256x128xf32>
    %136 = tpu.matmul %134, %135, %cst_128 {dimension_numbers = #tpu.dot_dimension_numbers<[1], [0], [0], [1], [0, 0, 1, 1], [], []>} : vector<256x128xbf16>, vector<128x128xbf16>, vector<256x128xf32> -> vector<256x128xf32>
    %137 = arith.addf %133, %136 : vector<256x128xf32>
    %c48_129 = arith.constant 48 : index
    %c0_130 = arith.constant 0 : index
    %138 = vector.load %arg9[%c48_129, %c0_130] : memref<320x128xbf16, #tpu.memory_space<vmem>>, vector<256x128xbf16>
    %c896_131 = arith.constant 896 : index
    %c0_132 = arith.constant 0 : index
    %139 = vector.load %arg6[%c896_131, %c0_132] : memref<1152x128xbf16, #tpu.memory_space<vmem>>, vector<128x128xbf16>
    %cst_133 = arith.constant dense<0.000000e+00> : vector<256x128xf32>
    %140 = tpu.matmul %138, %139, %cst_133 {dimension_numbers = #tpu.dot_dimension_numbers<[1], [0], [0], [1], [0, 0, 1, 1], [], []>} : vector<256x128xbf16>, vector<128x128xbf16>, vector<256x128xf32> -> vector<256x128xf32>
    %141 = arith.addf %137, %140 : vector<256x128xf32>
    %c17_134 = arith.constant 17 : index
    %c0_135 = arith.constant 0 : index
    %142 = vector.load %arg9[%c17_134, %c0_135] : memref<320x128xbf16, #tpu.memory_space<vmem>>, vector<256x128xbf16>
    %c256_136 = arith.constant 256 : index
    %c0_137 = arith.constant 0 : index
    %143 = vector.load %arg6[%c256_136, %c0_137] : memref<1152x128xbf16, #tpu.memory_space<vmem>>, vector<128x128xbf16>
    %cst_138 = arith.constant dense<0.000000e+00> : vector<256x128xf32>
    %144 = tpu.matmul %142, %143, %cst_138 {dimension_numbers = #tpu.dot_dimension_numbers<[1], [0], [0], [1], [0, 0, 1, 1], [], []>} : vector<256x128xbf16>, vector<128x128xbf16>, vector<256x128xf32> -> vector<256x128xf32>
    %c33_139 = arith.constant 33 : index
    %c0_140 = arith.constant 0 : index
    %145 = vector.load %arg9[%c33_139, %c0_140] : memref<320x128xbf16, #tpu.memory_space<vmem>>, vector<256x128xbf16>
    %c640_141 = arith.constant 640 : index
    %c0_142 = arith.constant 0 : index
    %146 = vector.load %arg6[%c640_141, %c0_142] : memref<1152x128xbf16, #tpu.memory_space<vmem>>, vector<128x128xbf16>
    %cst_143 = arith.constant dense<0.000000e+00> : vector<256x128xf32>
    %147 = tpu.matmul %145, %146, %cst_143 {dimension_numbers = #tpu.dot_dimension_numbers<[1], [0], [0], [1], [0, 0, 1, 1], [], []>} : vector<256x128xbf16>, vector<128x128xbf16>, vector<256x128xf32> -> vector<256x128xf32>
    %148 = arith.addf %144, %147 : vector<256x128xf32>
    %c49_144 = arith.constant 49 : index
    %c0_145 = arith.constant 0 : index
    %149 = vector.load %arg9[%c49_144, %c0_145] : memref<320x128xbf16, #tpu.memory_space<vmem>>, vector<256x128xbf16>
    %c1024_146 = arith.constant 1024 : index
    %c0_147 = arith.constant 0 : index
    %150 = vector.load %arg6[%c1024_146, %c0_147] : memref<1152x128xbf16, #tpu.memory_space<vmem>>, vector<128x128xbf16>
    %cst_148 = arith.constant dense<0.000000e+00> : vector<256x128xf32>
    %151 = tpu.matmul %149, %150, %cst_148 {dimension_numbers = #tpu.dot_dimension_numbers<[1], [0], [0], [1], [0, 0, 1, 1], [], []>} : vector<256x128xbf16>, vector<128x128xbf16>, vector<256x128xf32> -> vector<256x128xf32>
    %152 = arith.addf %148, %151 : vector<256x128xf32>
    %c0_i32_149 = arith.constant 0 : i32
    %153 = vector.broadcast %c0_i32_149 : i32 to vector<256x128xi32>
    %154 = arith.cmpi sgt, %119, %153 : vector<256x128xi32>
    %cst_150 = arith.constant 0.000000e+00 : f32
    %155 = vector.broadcast %cst_150 : f32 to vector<256x128xf32>
    %156 = arith.select %154, %130, %155 : vector<256x128xi1>, vector<256x128xf32>
    %157 = arith.addf %156, %141 : vector<256x128xf32>
    %c15_i32_151 = arith.constant 15 : i32
    %158 = vector.broadcast %c15_i32_151 : i32 to vector<256x128xi32>
    %159 = arith.cmpi slt, %119, %158 : vector<256x128xi32>
    %cst_152 = arith.constant 0.000000e+00 : f32
    %160 = vector.broadcast %cst_152 : f32 to vector<256x128xf32>
    %161 = arith.select %159, %152, %160 : vector<256x128xi1>, vector<256x128xf32>
    %162 = arith.addf %157, %161 : vector<256x128xf32>
    %c0_153 = arith.constant 0 : index
    %c0_154 = arith.constant 0 : index
    %163 = vector.load %arg7[%c0_153, %c0_154] : memref<1x128xf32, #tpu.memory_space<vmem>>, vector<1x128xf32>
    %164 = vector.broadcast %163 : vector<1x128xf32> to vector<256x128xf32>
    %165 = arith.addf %162, %164 : vector<256x128xf32>
    %166 = vector.shape_cast %165 : vector<256x128xf32> to vector<16x16x128xf32>
    %c0_155 = arith.constant 0 : index
    %c0_156 = arith.constant 0 : index
    %c0_157 = arith.constant 0 : index
    %c0_158 = arith.constant 0 : index
    %167 = vector.load %arg8[%c0_155, %c0_156, %c0_157, %c0_158] : memref<1x16x16x128xf32, #tpu.memory_space<vmem>>, vector<1x16x16x128xf32>
    %168 = vector.shape_cast %167 : vector<1x16x16x128xf32> to vector<16x16x128xf32>
    %169 = vector.shape_cast %166 : vector<16x16x128xf32> to vector<1x16x16x128xf32>
    tpu.vector_store %arg8[%c0_155, %c0_156, %c0_157, %c0_158], %169 {strides = array<i32>} : memref<1x16x16x128xf32, #tpu.memory_space<vmem>>, vector<1x16x16x128xf32>,
    return
  }
  func.func @transform_0(%arg0: i32) -> (i32, i32, i32, i32) {
    %c0_i32 = arith.constant 0 : i32
    %c0_i32_0 = arith.constant 0 : i32
    %c0_i32_1 = arith.constant 0 : i32
    %c0_i32_2 = arith.constant 0 : i32
    return %arg0, %c0_i32, %c0_i32_0, %c0_i32_1 : i32, i32, i32, i32
  }
  func.func @transform_1(%arg0: i32) -> (i32, i32) {
    %c0_i32 = arith.constant 0 : i32
    %c0_i32_0 = arith.constant 0 : i32
    %c0_i32_1 = arith.constant 0 : i32
    return %c0_i32, %c0_i32_0 : i32, i32
  }
  func.func @transform_2(%arg0: i32) -> (i32, i32) {
    %c0_i32 = arith.constant 0 : i32
    %c0_i32_0 = arith.constant 0 : i32
    %c0_i32_1 = arith.constant 0 : i32
    return %c0_i32, %c0_i32_0 : i32, i32
  }
  func.func @transform_3(%arg0: i32) -> (i32, i32) {
    %c0_i32 = arith.constant 0 : i32
    %c0_i32_0 = arith.constant 0 : i32
    %c0_i32_1 = arith.constant 0 : i32
    return %c0_i32, %c0_i32_0 : i32, i32
  }
  func.func @transform_4(%arg0: i32) -> (i32, i32) {
    %c0_i32 = arith.constant 0 : i32
    %c0_i32_0 = arith.constant 0 : i32
    %c0_i32_1 = arith.constant 0 : i32
    return %c0_i32, %c0_i32_0 : i32, i32
  }
  func.func @transform_5(%arg0: i32) -> (i32, i32) {
    %c0_i32 = arith.constant 0 : i32
    %c0_i32_0 = arith.constant 0 : i32
    %c0_i32_1 = arith.constant 0 : i32
    return %c0_i32, %c0_i32_0 : i32, i32
  }
  func.func @transform_6(%arg0: i32) -> (i32, i32) {
    %c0_i32 = arith.constant 0 : i32
    %c0_i32_0 = arith.constant 0 : i32
    %c0_i32_1 = arith.constant 0 : i32
    return %c0_i32, %c0_i32_0 : i32, i32
  }
  func.func @transform_7(%arg0: i32) -> (i32, i32, i32, i32) {
    %c0_i32 = arith.constant 0 : i32
    %c0_i32_0 = arith.constant 0 : i32
    %c0_i32_1 = arith.constant 0 : i32
    %c0_i32_2 = arith.constant 0 : i32
    return %arg0, %c0_i32, %c0_i32_0, %c0_i32_1 : i32, i32, i32, i32
  }
}

</mosaic_0001>

<bundles_post_ra>
// kernel: inverse_transform_forward.1
= control target key start
LH: loop header
LB: loop body
LE: loop exit
PB: predicated region body
PF: predicated region fallthrough
CT: control target
= control target key end

     0   :  { %12 = vsyncpa [#allocation4], 0  ;;  %s16333_s0 = inlined_call_operand.vmem [shape: f32[2,16,16,128], index: 0, kind: input, shape index: {}]   ;;  %s16334_s1 = inlined_call_operand.vmem [shape: bf16[1152,128], index: 1, kind: input, shape index: {}]   ;;  %s16335_s2 = inlined_call_operand.vmem [shape: f32[1,128], index: 2, kind: input, shape index: {}]   ;;  %s16336_s3 = inlined_call_operand.vmem [shape: bf16[1152,128], index: 3, kind: input, shape index: {}]   ;;  %s16337_s4 = inlined_call_operand.vmem [shape: f32[1,128], index: 4, kind: input, shape index: {}]   ;;  %s16338_s5 = inlined_call_operand.vmem [shape: bf16[1152,128], index: 5, kind: input, shape index: {}]   ;;  %s16339_s6 = inlined_call_operand.vmem [shape: f32[1,128], index: 6, kind: input, shape index: {}]   ;;  %s16340_s7 = inlined_call_operand.hbm [shape: f32[2,16,16,128], index: 7, kind: output, shape index: {}]  }
   0x1   :  { %14 = vsyncpa [#allocation4 + $0x1], 0  ;;  %s12750_s24 = smov 0   ;;  %s12752_s25 = smov 0  }
   0x2   :  { %s12754_s26 = smov 0   ;;  %s12756_s27 = smov 0  }
   0x3 LB: > { %s12771_s28 = sadd.s32 4294967295, %s12704_s27   ;;  %s9595_s29 = sadd.s32 4294967294, %s12704_s27   ;;  %s12704_s27 = sphi %s12756_s27, %s17140_s27   ;;  %s12700_s26 = sphi %s12754_s26, %s17139_s26   ;;  %s12696_s25 = sphi %s12752_s25, %s17138_s25   ;;  %s12692_s24 = sphi %s12750_s24, %s17137_s24  }
   0x4   : > { %s12775_s30 = sadd.s32 1, %s12704_s27   ;;  %s179_s8 = sadd.s32 1, %s12700_s26 }
   0x5   : > { %s176_s9 = ssub.s32 %s12704_s27, %s12775_s30  ;;  %p189_p0 = scmp.ne.s32.totalorder %s12700_s26, %s12696_s25 }
   0x6   : > { %p177_p1 = scmp.eq.s32.totalorder %s176_s9, 0  ;;  %p190_p2 = scmp.eq.s32.totalorder %s12771_s28, 1 }
   0x7   : > { %p195_p3 = scmp.ne.s32.totalorder %s12696_s25, %s12692_s24  ;;  %p196_p4 = scmp.eq.s32.totalorder %s9595_s29, 1 }
   0x8   : > { %s12786_s10 = scalar_select %p177_p1, %s12700_s26, %s179_s8  }
   0x9   : > { %p12788_p5 = por %p190_p2, %p189_p0  ;;  %p12792_p6 = por %p196_p4, %p195_p3 }
   0xa   : > { %p9598_p7 = scmp.ge.s32.totalorder %s12704_s27, 1  ;;  %p240_p8 = scmp.lt.s32.totalorder %s12704_s27, 3 }
   0xc   : > { %p241_p9 = pnand %p9598_p7, %p240_p8 }
   0xe   : > { %244 = sbr.rel (%p241_p9) target bundleno = 1698 (0x6a2), region = 48 }
  0x15   : > { %v12406_v0 = vld [vmem:[%s16334_s1 + $0xc0] sm:$0xff]   ;;  %v12408_v2 = vld [vmem:[%s16334_s1 + $0xc8] sm:$0xff]   ;;  %p272_p10 = scmp.lt.s32.totalorder %s12771_s28, 1  ;;  %v12706_v3 = vmov 0   ;;  %v12410_v5 = vld [vmem:[%s16334_s1 + $0xd0] sm:$0xff]   ;;  %s269_s17 = sand.u32 1, %s12696_s25  }
  0x16   : > { %v12804_v1 = vld [vmem:[%s16334_s1] sm:$0xff]   ;;  %10476 = vmatprep.subr.bf16.mxu1 %v12406_v0  ;;  %279 = vst [vmem:[#allocation2 + $0x8] sm:$0xff] %v12706_v3  ;;  %278 = vst [vmem:[#allocation2] sm:$0xff] %v12706_v3  ;;  %v12814_v4 = vld [vmem:[%s16334_s1 + $0x8] sm:$0xff]   ;;  %v12854_v11 = vrot.slane %v12706_v3, 7  ;;  %s9599_s18 = sshll.u32 %s269_s17, 8 }
  0x17   : > { %280 = vst [vmem:[#allocation2 + $0x90] sm:$0xff] %v12706_v3  ;;  %281 = vst [vmem:[#allocation2 + $0x98] sm:$0xff] %v12706_v3  ;;  %10524 = vmatprep.subr.bf16.mxu0 %v12804_v1  ;;  %10477 = vmatpush3.bf16.msra.mxu1 %v12406_v0  ;;  %v12824_v6 = vld [vmem:[%s16334_s1 + $0x10] sm:$0xff]   ;;  %s273_s8 = scalar_select %p272_p10, %s12771_s28, 1  ;;  %v12412_v7 = vld [vmem:[%s16334_s1 + $0xd8] sm:$0xff]  }
  0x18   : > { %10525 = vmatpush3.bf16.msra.mxu0 %v12804_v1  ;;  %10478 = vmatprep.subr.bf16.mxu1 %v12408_v2  ;;  %v12837_v8 = vld [vmem:[%s16334_s1 + $0x18] sm:$0xff]   ;;  %v12414_v9 = vld [vmem:[%s16334_s1 + $0xe0] sm:$0xff]   ;;  %v12416_v12 = vld [vmem:[%s16334_s1 + $0xe8] sm:$0xff]   ;;  %vm16347_vm0 = vsmask.f32 256  ;;  %s16160_s21 = scalar_lea.vmem [#allocation3], %s9599_s18 }
  0x19   : > { %10526 = vmatprep.subr.bf16.mxu0 %v12814_v4  ;;  %s9826_s16 = sshll.u32 %s273_s8, 8  ;;  %v12847_v10 = vld [vmem:[%s16334_s1 + $0x20] sm:$0xff]   ;;  %v12862_v13 = vld [vmem:[%s16334_s1 + $0x28] sm:$0xff]   ;;  %v12418_v22 = vld [vmem:[%s16334_s1 + $0xf0] sm:$0xff]   ;;  %vm16346_vm1 = vsmask.f32 7424 }
  0x1a   : > { %s12852_s23 = scalar_lea.vmem %s16333_s0, %s9826_s16  ;;  %v12879_v27 = vld [vmem:[%s16334_s1 + $0x30] sm:$0xff]   ;;  %v12420_v36 = vld [vmem:[%s16334_s1 + $0xf8] sm:$0xff]   ;;  %v12422_v63 = vld [vmem:[%s16334_s1 + $0x180] sm:$0xff]   ;;  %s9827_s22 = sshll.u32 %s12771_s28, 12 }
  0x1b   : > { %10479 = vmatpush3.bf16.msra.mxu1 %v12408_v2  ;;  %v282_v14 = vld [vmem:[%s12852_s23] sm:$0xff]  ;;  %v283_v15 = vld [vmem:[%s12852_s23 + $0x8] sm:$0xff]  ;;  %v284_v20 = vld [vmem:[%s12852_s23 + $0x10] sm:$0xff]  ;;  %s9533_s29 = sshll.u32 %s16160_s21, 4  ;;  %s16283_s9 = scalar_lea.hbm %s16340_s7, %s9827_s22  ;;  %s16285_s29 = int_to_ptr.vmem [resolvable:$true] %s9533_s29 }
  0x1c   : > { %10527 = vmatpush3.bf16.msra.mxu0 %v12814_v4  ;;  %10480 = vmatprep.subr.bf16.mxu1 %v12410_v5  ;;  %v314_v17 = vpack.c.bf16 %v283_v15, %v282_v14  ;;  %v285_v21 = vld [vmem:[%s12852_s23 + $0x18] sm:$0xff]  ;;  %v286_v30 = vld [vmem:[%s12852_s23 + $0x20] sm:$0xff]  ;;  %v287_v33 = vld [vmem:[%s12852_s23 + $0x28] sm:$0xff]  ;;  %s16292_s28 = scalar_lea.sflag [#allocation4], %s269_s17  ;;  %s12642_s13 = scalar_lea.vmem %s16285_s29, 4096 }
  0x1d   : > { %10528 = vmatprep.subr.bf16.mxu0 %v12824_v6  ;;  %v444_v16 = vld [vmem:[#allocation2 + $0x8] sm:$0x80]  ;;  %v411_v19 = vld [vmem:[#allocation2] sm:$0x80]  ;;  %v12873_v24 = vpack.c.bf16 %v285_v21, %v284_v20  ;;  %v288_v34 = vld [vmem:[%s12852_s23 + $0x30] sm:$0xff]  ;;  %v12894_v39 = vpack.c.bf16 %v287_v33, %v286_v30  ;;  %p12643_p11 = scmp.ne.s32.totalorder %s16285_s29, %s12642_s13  ;;  %s12707_s14 = smov [#allocation3]  }
  0x1e   : > { %v464_v18 = vshrl.u32 %v444_v16, 16  ;;  %v821_v23 = vshrl.u32 %v411_v19, 16  ;;  %330 = vst [vmem:[#allocation2 + $0x10] sm:$0xff] %v314_v17  ;;  %v468_v25 = vshrl.u32 %v314_v17, 16  ;;  %v471_v26 = vshll.u32 %v314_v17, 16  ;;  %v289_v35 = vld [vmem:[%s12852_s23 + $0x38] sm:$0xff] }
  0x1f   : > { %10481 = vmatpush3.bf16.msra.mxu1 %v12410_v5  ;;  %331 = vst [vmem:[#allocation2 + $0x18] sm:$0xff] %v12873_v24  ;;  %v476_v29 = vshrl.u32 %v12873_v24, 16  ;;  %v479_v38 = vshll.u32 %v12873_v24, 16  ;;  %v12896_v40 = vpack.c.bf16 %v289_v35, %v288_v34  ;;  %v12901_v41 = vld [vmem:[%s16334_s1 + $0x38] sm:$0xff]   ;;  %332 = vst [vmem:[#allocation2 + $0x20] sm:$0xff] %v12894_v39  ;;  %v484_v45 = vshrl.u32 %v12894_v39, 16  ;;  %p12644_p12 = pnand %p12643_p11, %p12788_p5 }
  0x20   : > { %10529 = vmatpush3.bf16.msra.mxu0 %v12824_v6  ;;  %10482 = vmatprep.subr.bf16.mxu1 %v12412_v7  ;;  %v823_v28 = vrot.slane %v821_v23, 7  ;;  %v466_v31 = vrot.slane %v464_v18, 7  ;;  %v470_v32 = vrot.slane %v468_v25, 7  ;;  %v12905_v44 = vrot.slane %v471_v26, 1  ;;  %v290_v46 = vld [vmem:[%s12852_s23 + $0x40] sm:$0xff]  ;;  %v291_v47 = vld [vmem:[%s12852_s23 + $0x48] sm:$0xff] }
  0x21   : > { %10530 = vmatprep.subr.bf16.mxu0 %v12837_v8  ;;  %v478_v43 = vrot.slane %v476_v29, 7  ;;  %333 = vst [vmem:[#allocation2 + $0x28] sm:$0xff] %v12896_v40  ;;  %v292_v48 = vld [vmem:[%s12852_s23 + $0x50] sm:$0xff]  ;;  %v487_v50 = vshll.u32 %v12894_v39, 16  ;;  %v12917_v51 = vpack.c.bf16 %v291_v47, %v290_v46  ;;  %v293_v52 = vld [vmem:[%s12852_s23 + $0x58] sm:$0xff]  ;;  %v12922_v53 = vrot.slane %v484_v45, 7  ;;  %p12645_p13 = pneg %p12644_p12 }
  0x22   : > { %v831_v37 = vsel %vm16347_vm0, %v823_v28, %v12854_v11  ;;  %v473_v42 = vor.u32 %v471_v26, %v470_v32  ;;  %v12924_v54 = vpack.c.bf16 %v293_v52, %v292_v48  ;;  %v492_v56 = vshrl.u32 %v12896_v40, 16  ;;  %v294_v57 = vld [vmem:[%s12852_s23 + $0x60] sm:$0xff]  ;;  %v295_v58 = vld [vmem:[%s12852_s23 + $0x68] sm:$0xff]  ;;  %v296_v61 = vld [vmem:[%s12852_s23 + $0x70] sm:$0xff]  ;;  %s12646_s15 = sshll.u32 %s12707_s14, 4  ;;  %s12647_s15 = int_to_ptr.vmem [resolvable:$false] %s12646_s15 }
  0x23   : > { %10483 = vmatpush3.bf16.msra.mxu1 %v12412_v7  ;;  %10540 = vmatprep.mubr.bf16.mxu0 %v831_v37  ;;  %v12928_v55 = vor.u32 %v479_v38, %v478_v43  ;;  %334 = vst [vmem:[#allocation2 + $0x30] sm:$0xff] %v12917_v51  ;;  %v12935_v59 = vor.u32 %v12905_v44, %v468_v25  ;;  %v500_v60 = vshrl.u32 %v12917_v51, 16  ;;  %v297_v62 = vld [vmem:[%s12852_s23 + $0x78] sm:$0xff]  ;;  %v298_v5 = vld [vmem:[%s12852_s23 + $0x80] sm:$0xff]  ;;  %v299_v14 = vld [vmem:[%s12852_s23 + $0x88] sm:$0xff]  ;;  %v503_v17 = vshll.u32 %v12917_v51, 16  ;;  %p12649_p0 = scmp.lt.s32.totalorder %s16285_s29, %s12647_s15 }
  0x24   : > { %10531 = vmatpush3.bf16.msra.mxu0 %v12837_v8  ;;  %10484 = vmatprep.subr.bf16.mxu1 %v12414_v9  ;;  %v474_v49 = vsel %vm16347_vm0, %v466_v31, %v473_v42  ;;  %335 = vst [vmem:[#allocation2 + $0x38] sm:$0xff] %v12924_v54  ;;  %v489_v0 = vor.u32 %v487_v50, %v12922_v53  ;;  %v300_v19 = vld [vmem:[%s12852_s23 + $0x90] sm:$0xff]  ;;  %v301_v20 = vld [vmem:[%s12852_s23 + $0x98] sm:$0xff]  ;;  %v12423_v21 = vld [vmem:[%s16334_s1 + $0x188] sm:$0xff]   ;;  %s12648_s16 = scalar_lea.vmem %s12647_s15, 8192 }
  0x25   : > { %10532 = vmatprep.subr.bf16.mxu0 %v12847_v10  ;;  %10492 = vmatprep.mubr.bf16.mxu1 %v474_v49  ;;  %v12949_v2 = vpack.c.bf16 %v295_v58, %v294_v57  ;;  %v12951_v3 = vpack.c.bf16 %v297_v62, %v296_v61  ;;  %v482_v7 = vsel %vm16347_vm0, %v470_v32, %v12928_v55  ;;  %v12968_v16 = vrot.slane %v500_v60, 7  ;;  %v302_v25 = vld [vmem:[%s12852_s23 + $0xa0] sm:$0xff]  ;;  %v303_v26 = vld [vmem:[%s12852_s23 + $0xa8] sm:$0xff]  ;;  %v304_v28 = vld [vmem:[%s12852_s23 + $0xb0] sm:$0xff]  ;;  %p12650_p1 = scmp.lt.s32.totalorder %s12648_s16, %s12642_s13 }
  0x26   : > { %v832_v15 = vsel %vm16347_vm0, %v12854_v11, %v473_v42  ;;  %v12971_v18 = vpack.c.bf16 %v299_v14, %v298_v5  ;;  %v12981_v23 = vpack.c.bf16 %v301_v20, %v300_v19  ;;  %v305_v30 = vld [vmem:[%s12852_s23 + $0xb8] sm:$0xff]  ;;  %v508_v32 = vshrl.u32 %v12924_v54, 16  ;;  %v12424_v33 = vld [vmem:[%s16334_s1 + $0x190] sm:$0xff]   ;;  %v306_v37 = vld [vmem:[%s12852_s23 + $0xc0] sm:$0xff] }
  0x27   : > { %10485 = vmatpush3.bf16.msra.mxu1 %v12414_v9  ;;  %v494_v9 = vrot.slane %v492_v56, 7  ;;  %336 = vst [vmem:[#allocation2 + $0x40] sm:$0xff] %v12949_v2  ;;  %337 = vst [vmem:[#allocation2 + $0x48] sm:$0xff] %v12951_v3  ;;  %v516_v34 = vshrl.u32 %v12949_v2, 16  ;;  %v13001_v35 = vpack.c.bf16 %v303_v26, %v302_v25  ;;  %v307_v42 = vld [vmem:[%s12852_s23 + $0xc8] sm:$0xff]  ;;  %v308_v47 = vld [vmem:[%s12852_s23 + $0xd0] sm:$0xff]  ;;  %p12651_p2 = por %p12650_p1, %p12649_p0 }
  0x28   : > { %10533 = vmatpush3.bf16.msra.mxu0 %v12847_v10  ;;  %10486 = vmatprep.subr.bf16.mxu1 %v12416_v12  ;;  %338 = vst [vmem:[#allocation2 + $0x50] sm:$0xff] %v12971_v18  ;;  %339 = vst [vmem:[#allocation2 + $0x58] sm:$0xff] %v12981_v23  ;;  %v13008_v46 = vpack.c.bf16 %v307_v42, %v306_v37  ;;  %v309_v48 = vld [vmem:[%s12852_s23 + $0xd8] sm:$0xff]  ;;  %v511_v49 = vshll.u32 %v12924_v54, 16  ;;  %v1044_v52 = vld [vmem:[#allocation2 + $0x10] sm:$0x80] }
  0x29   : > { %10534 = vmatprep.subr.bf16.mxu0 %v12862_v13  ;;  %340 = vst [vmem:[#allocation2 + $0x60] sm:$0xff] %v13001_v35  ;;  %v510_v58 = vrot.slane %v508_v32, 7  ;;  %v519_v61 = vshll.u32 %v12949_v2, 16  ;;  %v310_v62 = vld [vmem:[%s12852_s23 + $0xe0] sm:$0xff]  ;;  %v2217_v5 = vrot.slane %v479_v38, 1  ;;  %v527_v14 = vshll.u32 %v12951_v3, 16  ;;  %p12652_p3 = pnand %p12651_p2, %p12645_p13 }
  0x2a   : > { %342 = vst [vmem:[#allocation2 + $0x70] sm:$0xff] %v13008_v46  ;;  %v313_v19 = vld [vmem:[%s12852_s23 + $0xf8] sm:$0xff]  ;;  %v1078_v20 = vshrl.u32 %v1044_v52, 16  ;;  %v532_v26 = vshrl.u32 %v12971_v18, 16  ;;  %v543_v42 = vshll.u32 %v12981_v23, 16  ;;  %v567_v54 = vshll.u32 %v13008_v46, 16 }
  0x2b   : > { %10487 = vmatpush3.bf16.msra.mxu1 %v12416_v12  ;;  %v495_v12 = vshll.u32 %v12896_v40, 16  ;;  %v513_v25 = vor.u32 %v511_v49, %v510_v58  ;;  %v2232_v39 = vrot.slane %v519_v61, 1  ;;  %v12428_v40 = vld [vmem:[%s16334_s1 + $0x1b0] sm:$0xff]  }
  0x2c   : > { %10535 = vmatpush3.bf16.msra.mxu0 %v12862_v13  ;;  %10488 = vmatprep.subr.bf16.mxu1 %v12418_v22  ;;  %v1080_v37 = vrot.slane %v1078_v20, 7 }
  0x2d   : > { %10536 = vmatprep.subr.bf16.mxu0 %v12879_v27  ;;  %v497_v31 = vor.u32 %v495_v12, %v494_v9  ;;  %v13082_v52 = vsel %vm16347_vm0, %v12968_v16, %v513_v25 }
  0x2f   : > { %10489 = vmatpush3.bf16.msra.mxu1 %v12418_v22  ;;  %v12979_v22 = vsel %vm16347_vm0, %v478_v43, %v489_v0  ;;  %v524_v43 = vshrl.u32 %v12951_v3, 16  ;;  %v13018_v57 = vsel %vm16347_vm0, %v12922_v53, %v497_v31  ;;  %v312_v0 = vld [vmem:[%s12852_s23 + $0xf0] sm:$0xff]  ;;  %v12425_v53 = vld [vmem:[%s16334_s1 + $0x198] sm:$0xff]   ;;  %v540_v31 = vshrl.u32 %v12981_v23, 16  ;;  %v12430_v23 = vld [vmem:[%s16334_s1 + $0x140] sm:$0xff]  }
  0x30   : > { %10537 = vmatpush3.bf16.msra.mxu0 %v12879_v27  ;;  %10490 = vmatprep.subr.bf16.mxu1 %v12420_v36 }
  0x31   : > { %10538 = vmatprep.subr.bf16.mxu0 %v12901_v41  ;;  %v13045_v38 = vrot.slane %v524_v43, 7  ;;  %v13096_v24 = vrot.slane %v540_v31, 7 }
  0x33   : > { %10491 = vmatpush3.bf16.msra.mxu1 %v12420_v36  ;;  %v13003_v36 = vpack.c.bf16 %v305_v30, %v304_v28  ;;  %v535_v30 = vshll.u32 %v12971_v18, 16 }
  0x34   : > { %10539 = vmatpush3.bf16.msra.mxu0 %v12901_v41  ;;  %11772 = vmatprep.subr.bf16.mxu1 %v12804_v1 }
  0x35   : > { %10572 = vmatprep.subr.bf16.mxu0 %v12422_v63  ;;  %341 = vst [vmem:[#allocation2 + $0x68] sm:$0xff] %v13003_v36  ;;  %v2238_v20 = vrot.slane %v535_v30, 1 }
  0x36   : > { %10493 = vmatmul.mubr.bf16.vlgmr.msra.gmra.mrb[0].mxu1 %v482_v7 }
  0x37   : > { %10541 = vmatmul.mubr.bf16.vlgmr.msra.gmra.mrb[0].mxu0 %v832_v15  ;;  %11780 = vmatpush3.bf16.msra.mxu1 %v12804_v1  ;;  %v505_v1 = vor.u32 %v503_v17, %v12968_v16  ;;  %v13040_v15 = vpack.c.bf16 %v309_v48, %v308_v47  ;;  %v13075_v47 = vsel %vm16346_vm1, %v12935_v59, %v2217_v5  ;;  %v2220_v59 = vrot.slane %v487_v50, 1 }
  0x38   : > { %10573 = vmatpush3.bf16.msra.mxu0 %v12422_v63  ;;  %10496 = vmatprep.mubr.bf16.mxu1 %v12979_v22  ;;  %v311_v63 = vld [vmem:[%s12852_s23 + $0xe8] sm:$0xff]  ;;  %v2219_v48 = vor.u32 %v2217_v5, %v476_v29  ;;  %v2223_v29 = vrot.slane %v495_v12, 1  ;;  %v2226_v50 = vrot.slane %v503_v17, 1  ;;  %v551_v12 = vshll.u32 %v13001_v35, 16 }
  0x39   : > { %10574 = vmatprep.subr.bf16.mxu0 %v12423_v21  ;;  %10544 = vmatprep.mubr.bf16.mxu0 %v482_v7  ;;  %v518_v7 = vrot.slane %v516_v34, 7  ;;  %343 = vst [vmem:[#allocation2 + $0x78] sm:$0xff] %v13040_v15 }
  0x3a   : > { %11773 = vmatprep.subr.bf16.mxu1 %v12814_v4  ;;  %v13106_v5 = vsel %vm16346_vm1, %v2219_v48, %v2220_v59  ;;  %v2244_v25 = vrot.slane %v551_v12, 1 }
  0x3b   : > { %11781 = vmatpush3.bf16.msra.mxu1 %v12814_v4  ;;  %v13034_v4 = vsel %vm16347_vm0, %v494_v9, %v505_v1  ;;  %v13049_v9 = vpack.c.bf16 %v313_v19, %v312_v0  ;;  %v521_v28 = vor.u32 %v519_v61, %v518_v7  ;;  %v12426_v1 = vld [vmem:[%s16334_s1 + $0x1a0] sm:$0xff]   ;;  %v548_v0 = vshrl.u32 %v13001_v35, 16 }
  0x3c   : > { %10575 = vmatpush3.bf16.msra.mxu0 %v12423_v21  ;;  %11774 = vmatprep.subr.bf16.mxu1 %v12824_v6  ;;  %v13047_v21 = vpack.c.bf16 %v311_v63, %v310_v62  ;;  %v13089_v62 = vrot.slane %v532_v26, 7  ;;  %v2228_v35 = vor.u32 %v2226_v50, %v500_v60  ;;  %v2235_v60 = vrot.slane %v527_v14, 1 }
  0x3d   : > { %10576 = vmatprep.subr.bf16.mxu0 %v12424_v33  ;;  %345 = vst [vmem:[#allocation2 + $0x88] sm:$0xff] %v13049_v9  ;;  %v13094_v63 = vsel %vm16347_vm0, %v510_v58, %v521_v28  ;;  %v2222_v58 = vor.u32 %v2220_v59, %v484_v45  ;;  %v2234_v19 = vor.u32 %v2232_v39, %v516_v34  ;;  %v550_v28 = vrot.slane %v548_v0, 7 }
  0x3e   : > { %10497 = vmatmul.mubr.bf16.gmra.mrb[4].mxu1 %v13018_v57  ;;  %344 = vst [vmem:[#allocation2 + $0x80] sm:$0xff] %v13047_v21  ;;  %v537_v17 = vor.u32 %v535_v30, %v13089_v62  ;;  %v2240_v34 = vor.u32 %v2238_v20, %v532_v26  ;;  %v2246_v26 = vor.u32 %v2244_v25, %v548_v0 }
  0x3f   : > { %10545 = vmatmul.mubr.bf16.gmra.mrb[4].mxu0 %v12979_v22  ;;  %10500 = vmatprep.mubr.bf16.mxu1 %v13034_v4  ;;  %v13132_v45 = vsel %vm16346_vm1, %v2222_v58, %v2223_v29  ;;  %v13162_v2 = vsel %vm16346_vm1, %v2234_v19, %v2235_v60  ;;  %v553_v59 = vor.u32 %v551_v12, %v550_v28 }
  0x40   : > { %10577 = vmatpush3.bf16.msra.mxu0 %v12424_v33  ;;  %10548 = vmatprep.mubr.bf16.mxu0 %v13018_v57  ;;  %v529_v33 = vor.u32 %v527_v14, %v13045_v38  ;;  %v2237_v14 = vor.u32 %v2235_v60, %v524_v43  ;;  %v583_v60 = vshll.u32 %v13047_v21, 16 }
  0x41   : > { %10578 = vmatprep.subr.bf16.mxu0 %v12425_v53  ;;  %11782 = vmatpush3.bf16.msra.mxu1 %v12824_v6  ;;  %v12427_v6 = vld [vmem:[%s16334_s1 + $0x1a8] sm:$0xff]  }
  0x42   : > { %11775 = vmatprep.subr.bf16.mxu1 %v12837_v8  ;;  %v13101_v16 = vsel %vm16347_vm0, %v518_v7, %v529_v33  ;;  %v556_v7 = vshrl.u32 %v13003_v36, 16  ;;  %v13167_v30 = vsel %vm16346_vm1, %v2237_v14, %v2238_v20  ;;  %v13178_v33 = vrot.slane %v567_v54, 1 }
  0x44   : > { %10579 = vmatpush3.bf16.msra.mxu0 %v12425_v53  ;;  %v2229_v53 = vrot.slane %v511_v49, 1  ;;  %v559_v49 = vshll.u32 %v13003_v36, 16  ;;  %v13159_v36 = vsel %vm16347_vm0, %v13045_v38, %v537_v17  ;;  %v12429_v38 = vld [vmem:[%s16334_s1 + $0x1b8] sm:$0xff]   ;;  %v12431_v17 = vld [vmem:[%s16334_s1 + $0x148] sm:$0xff]  }
  0x45   : > { %10580 = vmatprep.subr.bf16.mxu0 %v12426_v1  ;;  %11783 = vmatpush3.bf16.msra.mxu1 %v12837_v8  ;;  %v2225_v8 = vor.u32 %v2223_v29, %v492_v56  ;;  %v588_v29 = vshrl.u32 %v13049_v9, 16 }
  0x46   : > { %10501 = vmatmul.mubr.bf16.gmra.mrb[8].mxu1 %v13082_v52  ;;  %11776 = vmatprep.subr.bf16.mxu1 %v12847_v10  ;;  %v2231_v51 = vor.u32 %v2229_v53, %v508_v32  ;;  %v13144_v61 = vsel %vm16346_vm1, %v2228_v35, %v2229_v53  ;;  %v2247_v43 = vrot.slane %v559_v49, 1  ;;  %v13223_v53 = vsel %vm16347_vm0, %v13096_v24, %v553_v59  ;;  %v12449_v59 = vld [vmem:[%s16334_s1 + $0x88] sm:$0xff]  }
  0x47   : > { %10549 = vmatmul.mubr.bf16.gmra.mrb[8].mxu0 %v13034_v4  ;;  %10504 = vmatprep.mubr.bf16.mxu1 %v13094_v63  ;;  %v13135_v56 = vsel %vm16346_vm1, %v2225_v8, %v2226_v50  ;;  %v558_v8 = vrot.slane %v556_v7, 7  ;;  %v580_v35 = vshrl.u32 %v13047_v21, 16  ;;  %v13252_v19 = vrot.slane %v588_v29, 7 }
  0x48   : > { %10581 = vmatpush3.bf16.msra.mxu0 %v12426_v1  ;;  %10552 = vmatprep.mubr.bf16.mxu0 %v13082_v52  ;;  %v13151_v32 = vsel %vm16346_vm1, %v2231_v51, %v2232_v39  ;;  %v1088_v1 = vsel %vm16347_vm0, %v1080_v37, %v12928_v55  ;;  %v564_v55 = vshrl.u32 %v13008_v46, 16  ;;  %v13193_v37 = vsel %vm16346_vm1, %v2246_v26, %v2247_v43 }
  0x49   : > { %10582 = vmatprep.subr.bf16.mxu0 %v12427_v6  ;;  %11784 = vmatpush3.bf16.msra.mxu1 %v12847_v10  ;;  %v2241_v10 = vrot.slane %v543_v42, 1  ;;  %v1208_v26 = vsel %vm16347_vm0, %v13252_v19, %v12854_v11  ;;  %v12448_v11 = vld [vmem:[%s16334_s1 + $0x48] sm:$0xff]   ;;  %v2256_v46 = vrot.slane %v583_v60, 1 }
  0x4a   : > { %11777 = vmatprep.subr.bf16.mxu1 %v12862_v13 }
  0x4b   : > { %v2243_v3 = vor.u32 %v2241_v10, %v540_v31  ;;  %v13176_v18 = vsel %vm16346_vm1, %v2240_v34, %v2241_v10  ;;  %v591_v31 = vshll.u32 %v13049_v9, 16  ;;  %v12447_v9 = vld [vmem:[%s16334_s1 + $0x80] sm:$0xff]  }
  0x4c   : > { %10583 = vmatpush3.bf16.msra.mxu0 %v12427_v6  ;;  %v2249_v6 = vor.u32 %v2247_v43, %v556_v7  ;;  %v12439_v43 = vld [vmem:[%s16334_s1 + $0x118] sm:$0xff]  }
  0x4d   : > { %10584 = vmatprep.subr.bf16.mxu0 %v12428_v40  ;;  %11785 = vmatpush3.bf16.msra.mxu1 %v12862_v13  ;;  %v13184_v48 = vsel %vm16346_vm1, %v2243_v3, %v2244_v25  ;;  %v545_v13 = vor.u32 %v543_v42, %v13096_v24  ;;  %v13202_v50 = vrot.slane %v591_v31, 1  ;;  %v13212_v42 = vld [vmem:[%s16334_s1 + $0x100] sm:$0xff]   ;;  %v572_v24 = vshrl.u32 %v13040_v15, 16  ;;  %v12441_v25 = vld [vmem:[%s16334_s1 + $0x170] sm:$0xff]   ;;  %v12436_v3 = vld [vmem:[%s16334_s1 + $0x108] sm:$0xff]  }
  0x4e   : > { %10505 = vmatmul.mubr.bf16.gmra.mrb[12].mxu1 %v13101_v16  ;;  %11778 = vmatprep.subr.bf16.mxu1 %v12879_v27  ;;  %v13198_v0 = vsel %vm16346_vm1, %v2249_v6, %v13178_v33  ;;  %v13315_v6 = vld [vmem:[#allocation2 + $0x10] sm:$0xff] }
  0x4f   : > { %10553 = vmatmul.mubr.bf16.gmra.mrb[12].mxu0 %v13094_v63  ;;  %10508 = vmatprep.mubr.bf16.mxu1 %v13159_v36  ;;  %v13215_v12 = vor.u32 %v13202_v50, %v588_v29  ;;  %v13219_v58 = vsel %vm16347_vm0, %v13089_v62, %v545_v13  ;;  %v561_v62 = vor.u32 %v559_v49, %v558_v8  ;;  %v12433_v49 = vld [vmem:[%s16334_s1 + $0x158] sm:$0xff]   ;;  %v12446_v13 = vld [vmem:[%s16334_s1 + $0x40] sm:$0xff]  }
  0x50   : > { %10585 = vmatpush3.bf16.msra.mxu0 %v12428_v40  ;;  %10588 = vmatprep.mubr.bf16.mxu0 %v1088_v1  ;;  %v575_v40 = vshll.u32 %v13040_v15, 16  ;;  %v12443_v1 = vld [vmem:[%s16334_s1 + $0x130] sm:$0xff]   ;;  %v13328_v29 = vld [vmem:[#allocation2 + $0x18] sm:$0xff] }
  0x51   : > { %10586 = vmatprep.subr.bf16.mxu0 %v12429_v38  ;;  %11786 = vmatpush3.bf16.msra.mxu1 %v12879_v27  ;;  %v566_v27 = vrot.slane %v564_v55, 7  ;;  %v562_v39 = vsel %vm16347_vm0, %v550_v28, %v561_v62  ;;  %v12454_v62 = vld [vmem:[%s16334_s1 + $0x60] sm:$0xff]  }
  0x52   : > { %11779 = vmatprep.subr.bf16.mxu1 %v12901_v41 }
  0x53   : > { %v569_v7 = vor.u32 %v567_v54, %v566_v27  ;;  %v12435_v54 = vld [vmem:[%s16334_s1 + $0x160] sm:$0xff]  }
  0x54   : > { %10587 = vmatpush3.bf16.msra.mxu0 %v12429_v38  ;;  %v12442_v38 = vld [vmem:[%s16334_s1 + $0x128] sm:$0xff]  }
  0x55   : > { %10764 = vmatprep.subr.bf16.mxu0 %v12430_v23  ;;  %11787 = vmatpush3.bf16.msra.mxu1 %v12901_v41  ;;  %v12432_v41 = vld [vmem:[%s16334_s1 + $0x150] sm:$0xff]   ;;  %v570_v51 = vsel %vm16347_vm0, %v558_v8, %v569_v7  ;;  %v12452_v8 = vld [vmem:[%s16334_s1 + $0x58] sm:$0xff]   ;;  %v12455_v7 = vld [vmem:[%s16334_s1 + $0xa0] sm:$0xff]  }
  0x56   : > { %10509 = vmatmul.mubr.bf16.gmra.mrb[16].mxu1 %v13219_v58  ;;  %10620 = vmatprep.subr.bf16.mxu1 %v13212_v42 }
  0x57   : > { %10589 = vmatmul.mubr.bf16.vlgmr.msra.gmra.mrb[0].mxu0 %v12979_v22  ;;  %10512 = vmatprep.mubr.bf16.mxu1 %v13223_v53  ;;  %v574_v22 = vrot.slane %v572_v24, 7 }
  0x58   : > { %10765 = vmatpush3.bf16.msra.mxu0 %v12430_v23  ;;  %10592 = vmatprep.mubr.bf16.mxu0 %v13018_v57  ;;  %v582_v57 = vrot.slane %v580_v35, 7  ;;  %v13332_v23 = vld [vmem:[#allocation2 + $0x20] sm:$0xff] }
  0x59   : > { %10766 = vmatprep.subr.bf16.mxu0 %v12431_v17  ;;  %v577_v20 = vor.u32 %v575_v40, %v574_v22 }
  0x5a   : > { %v585_v14 = vor.u32 %v583_v60, %v582_v57 }
  0x5b   : > { %v578_v10 = vsel %vm16347_vm0, %v566_v27, %v577_v20  ;;  %v13348_v27 = vld [vmem:[#allocation2 + $0x28] sm:$0xff]  ;;  %v12461_v20 = vld [vmem:[%s16334_s1 + $0xb8] sm:$0xff]  }
  0x5c   : > { %10767 = vmatpush3.bf16.msra.mxu0 %v12431_v17  ;;  %v586_v34 = vsel %vm16347_vm0, %v574_v22, %v585_v14  ;;  %v13352_v17 = vld [vmem:[#allocation2 + $0x30] sm:$0xff]  ;;  %v12457_v22 = vld [vmem:[%s16334_s1 + $0xa8] sm:$0xff]  }
  0x5d   : > { %10768 = vmatprep.subr.bf16.mxu0 %v12432_v41  ;;  %v13392_v14 = vld [vmem:[#allocation2 + $0x50] sm:$0xff] }
  0x5e   : > { %10513 = vmatmul.mubr.bf16.gmra.mrb[20].mxu1 %v562_v39 }
  0x5f   : > { %10593 = vmatmul.mubr.bf16.gmra.mrb[4].mxu0 %v13034_v4  ;;  %10516 = vmatprep.mubr.bf16.mxu1 %v570_v51  ;;  %v12438_v4 = vld [vmem:[%s16334_s1 + $0x168] sm:$0xff]  }
  0x60   : > { %10596 = vmatprep.mubr.bf16.mxu0 %v13082_v52  ;;  %10769 = vmatpush3.bf16.msra.mxu0 %v12432_v41  ;;  %v593_v52 = vor.u32 %v591_v31, %v13252_v19  ;;  %v12445_v31 = vld [vmem:[%s16334_s1 + $0x138] sm:$0xff]   ;;  %v12456_v41 = vld [vmem:[%s16334_s1 + $0x68] sm:$0xff]  }
  0x61   : > { %10770 = vmatprep.subr.bf16.mxu0 %v12433_v49  ;;  %v12460_v19 = vld [vmem:[%s16334_s1 + $0x78] sm:$0xff]  }
  0x62   : > { %v594_v28 = vsel %vm16347_vm0, %v582_v57, %v593_v52  ;;  %v12458_v57 = vld [vmem:[%s16334_s1 + $0x70] sm:$0xff]   ;;  %v13406_v52 = vld [vmem:[#allocation2 + $0x60] sm:$0xff] }
  0x64   : > { %10771 = vmatpush3.bf16.msra.mxu0 %v12433_v49  ;;  %v12459_v49 = vld [vmem:[%s16334_s1 + $0xb0] sm:$0xff]  }
  0x65   : > { %10772 = vmatprep.subr.bf16.mxu0 %v12435_v54 }
  0x66   : > { %10517 = vmatmul.mubr.bf16.gmra.mrb[24].mxu1 %v578_v10 }
  0x67   : > { %10597 = vmatmul.mubr.bf16.gmra.mrb[8].mxu0 %v13094_v63  ;;  %10520 = vmatprep.mubr.bf16.mxu1 %v586_v34  ;;  %v12444_v63 = vld [vmem:[%s16334_s1 + $0x178] sm:$0xff]  }
  0x68   : > { %10600 = vmatprep.mubr.bf16.mxu0 %v13101_v16  ;;  %10773 = vmatpush3.bf16.msra.mxu0 %v12435_v54  ;;  %v13388_v54 = vld [vmem:[#allocation2 + $0x48] sm:$0xff] }
  0x69   : > { %10774 = vmatprep.subr.bf16.mxu0 %v12438_v4 }
  0x6c   : > { %10775 = vmatpush3.bf16.msra.mxu0 %v12438_v4  ;;  %v13402_v4 = vld [vmem:[#allocation2 + $0x58] sm:$0xff] }
  0x6d   : > { %10776 = vmatprep.subr.bf16.mxu0 %v12441_v25 }
  0x6e   : > { %10521 = vmatmul.mubr.bf16.gmra.mrb[28].mxu1 %v594_v28 }
  0x6f   : > { %10601 = vmatmul.mubr.bf16.gmra.mrb[12].mxu0 %v13159_v36  ;;  %10556 = vmatprep.mubr.bf16.mxu1 %v13101_v16  ;;  %v12437_v16 = vld [vmem:[%s16334_s1 + $0x110] sm:$0xff]  }
  0x70   : > { %10604 = vmatprep.mubr.bf16.mxu0 %v13219_v58  ;;  %10777 = vmatpush3.bf16.msra.mxu0 %v12441_v25  ;;  %v2252_v25 = vor.u32 %v13178_v33, %v564_v55  ;;  %v13432_v55 = vor.u32 %v2256_v46, %v580_v35  ;;  %v13452_v35 = vld [vmem:[#allocation2 + $0x80] sm:$0xff] }
  0x71   : > { %10778 = vmatprep.subr.bf16.mxu0 %v12444_v63 }
  0x72   : > { %v2260_v60 = vsel %vm16346_vm1, %v13432_v55, %v13202_v50 }
  0x74   : > { %10779 = vmatpush3.bf16.msra.mxu0 %v12444_v63 }
  0x75   : > { %10812 = vmatprep.subr.bf16.mxu0 %v12447_v9 }
  0x76   : > { %10557 = vmatmul.mubr.bf16.vlgmr.msra.gmra.mrb[16].mxu1 %v13159_v36  ;;  %v12440_v36 = vld [vmem:[%s16334_s1 + $0x120] sm:$0xff]  }
  0x77   : > { %10605 = vmatmul.mubr.bf16.gmra.mrb[16].mxu0 %v13223_v53  ;;  %10621 = vmatpush3.bf16.msra.mxu1 %v13212_v42  ;;  %v12450_v42 = vld [vmem:[%s16334_s1 + $0x50] sm:$0xff]  }
  0x78   : > { %10622 = vmatprep.subr.bf16.mxu1 %v12436_v3  ;;  %10560 = vmatprep.mubr.bf16.mxu1 %v13219_v58  ;;  %v12451_v58 = vld [vmem:[%s16334_s1 + $0x90] sm:$0xff]  }
  0x79   : > { %10608 = vmatprep.mubr.bf16.mxu0 %v562_v39 }
  0x7b   : > { %10623 = vmatpush3.bf16.msra.mxu1 %v12436_v3  ;;  %v13422_v3 = vld [vmem:[#allocation2 + $0x70] sm:$0xff] }
  0x7c   : > { %10624 = vmatprep.subr.bf16.mxu1 %v12437_v16 }
  0x7e   : > { %10561 = vmatmul.mubr.bf16.gmra.mrb[20].mxu1 %v13223_v53  ;;  %v12453_v53 = vld [vmem:[%s16334_s1 + $0x98] sm:$0xff]  }
  0x7f   : > { %10609 = vmatmul.mubr.bf16.gmra.mrb[20].mxu0 %v570_v51  ;;  %10625 = vmatpush3.bf16.msra.mxu1 %v12437_v16  ;;  %v13434_v16 = vld [vmem:[#allocation2 + $0x8] sm:$0xff] }
  0x80   : > { %10626 = vmatprep.subr.bf16.mxu1 %v12439_v43  ;;  %10564 = vmatprep.mubr.bf16.mxu1 %v562_v39  ;;  %v13365_v39 = vld [vmem:[#allocation2 + $0x38] sm:$0xff]  ;;  %16573 = vst [vmem:[#allocation6_spill] sm:$0xff] %v13434_v16  ;;  %v16342_v15 = vshrl.u32 %v13434_v16, 16 }
  0x81   : > { %10612 = vmatprep.mubr.bf16.mxu0 %v578_v10 }
  0x83   : > { %10627 = vmatpush3.bf16.msra.mxu1 %v12439_v43  ;;  %v16341_v43 = vshll.u32 %v13434_v16, 16 }
  0x84   : > { %10628 = vmatprep.subr.bf16.mxu1 %v12440_v36 }
  0x85   : > { %v13446_v21 = vrot.slane %v16341_v43, 1 }
  0x86   : > { %10565 = vmatmul.mubr.bf16.gmra.mrb[24].mxu1 %v570_v51  ;;  %v13372_v51 = vld [vmem:[#allocation2 + $0x40] sm:$0xff] }
  0x87   : > { %10613 = vmatmul.mubr.bf16.gmra.mrb[24].mxu0 %v586_v34  ;;  %10629 = vmatpush3.bf16.msra.mxu1 %v12440_v36  ;;  %v13458_v50 = vor.u32 %v13446_v21, %v16342_v15 }
  0x88   : > { %10630 = vmatprep.subr.bf16.mxu1 %v12442_v38  ;;  %10568 = vmatprep.mubr.bf16.mxu1 %v578_v10  ;;  %v12462_v10 = vld [vmem:[%s16334_s1 + $0x1c0] sm:$0xff]  }
  0x89   : > { %10616 = vmatprep.mubr.bf16.mxu0 %v594_v28  ;;  %v2253_v28 = vrot.slane %v575_v40, 1  ;;  %v2192_v40 = vld [vmem:[#allocation2 + $0x90] sm:$0x1]  ;;  %16574 = vst [vmem:[#allocation7_spill] sm:$0xff] %v13458_v50 }
  0x8b   : > { %10631 = vmatpush3.bf16.msra.mxu1 %v12442_v38  ;;  %v13416_v63 = vsel %vm16346_vm1, %v2252_v25, %v2253_v28  ;;  %v2255_v33 = vor.u32 %v2253_v28, %v572_v24  ;;  %v2263_v38 = vshll.u32 %v2192_v40, 16  ;;  %v13448_v24 = vld [vmem:[#allocation2 + $0x78] sm:$0xff] }
  0x8c   : > { %10632 = vmatprep.subr.bf16.mxu1 %v12443_v1 }
  0x8d   : > { %v13438_v36 = vsel %vm16346_vm1, %v2255_v33, %v2256_v46 }
  0x8e   : > { %10569 = vmatmul.mubr.bf16.gmra.mrb[28].mxu1 %v586_v34  ;;  %v12463_v34 = vld [vmem:[%s16334_s1 + $0x200] sm:$0xff]  }
  0x8f   : > { %10617 = vmatmul.mubr.bf16.gmra.mrb[28].mxu0 %v1208_v26  ;;  %10633 = vmatpush3.bf16.msra.mxu1 %v12443_v1  ;;  %v2265_v1 = vrot.slane %v2263_v38, 1 }
  0x90   : > { %10634 = vmatprep.subr.bf16.mxu1 %v12445_v31  ;;  %10636 = vmatprep.mubr.bf16.mxu1 %v13315_v6 }
  0x91   : > { %10780 = vmatprep.mubr.bf16.mxu0 %v13075_v47  ;;  %v2266_v26 = vsel %vm16346_vm1, %v13215_v12, %v2265_v1  ;;  %v12465_v12 = vld [vmem:[%s16334_s1 + $0x208] sm:$0xff]  }
  0x93   : > { %10635 = vmatpush3.bf16.msra.mxu1 %v12445_v31  ;;  %v2500_v31 = vsel %vm16346_vm1, %v13458_v50, %v12905_v44  ;;  %v12466_v44 = vld [vmem:[%s16334_s1 + $0x1d0] sm:$0xff]  }
  0x94   : > { %10668 = vmatprep.subr.bf16.mxu1 %v12446_v13 }
  0x96   : > { %10637 = vmatmul.mubr.bf16.vlgmr.msra.gmra.mrb[32].mxu1 %v13328_v29 }
  0x97   : > { %10781 = vmatmul.mubr.bf16.vlgmr.msra.gmra.mrb[32].mxu0 %v13106_v5  ;;  %10669 = vmatpush3.bf16.msra.mxu1 %v12446_v13  ;;  %v13465_v13 = vld [vmem:[#allocation2 + $0x88] sm:$0xff] }
  0x98   : > { %10813 = vmatpush3.bf16.msra.mxu0 %v12447_v9  ;;  %10640 = vmatprep.mubr.bf16.mxu1 %v13332_v23  ;;  %v13418_v9 = vld [vmem:[#allocation2 + $0x68] sm:$0xff] }
  0x99   : > { %10784 = vmatprep.mubr.bf16.mxu0 %v13132_v45  ;;  %10670 = vmatprep.subr.bf16.mxu1 %v12448_v11 }
  0x9a   : > { %10814 = vmatprep.subr.bf16.mxu0 %v12449_v59 }
  0x9b   : > { %10671 = vmatpush3.bf16.msra.mxu1 %v12448_v11  ;;  %v12464_v11 = vld [vmem:[%s16334_s1 + $0x1c8] sm:$0xff]  }
  0x9c   : > { %10815 = vmatpush3.bf16.msra.mxu0 %v12449_v59  ;;  %10672 = vmatprep.subr.bf16.mxu1 %v12450_v42  ;;  %v12467_v59 = vld [vmem:[%s16334_s1 + $0x210] sm:$0xff]  }
  0x9d   : > { %10816 = vmatprep.subr.bf16.mxu0 %v12451_v58 }
  0x9e   : > { %10641 = vmatmul.mubr.bf16.gmra.mrb[36].mxu1 %v13348_v27 }
  0x9f   : > { %10785 = vmatmul.mubr.bf16.gmra.mrb[36].mxu0 %v13135_v56  ;;  %10644 = vmatprep.mubr.bf16.mxu1 %v13352_v17 }
  0xa0   : > { %10788 = vmatprep.mubr.bf16.mxu0 %v13144_v61  ;;  %10673 = vmatpush3.bf16.msra.mxu1 %v12450_v42  ;;  %v12471_v42 = vld [vmem:[%s16334_s1 + $0x220] sm:$0xff]  }
  0xa1   : > { %10817 = vmatpush3.bf16.msra.mxu0 %v12451_v58  ;;  %10674 = vmatprep.subr.bf16.mxu1 %v12452_v8  ;;  %v12474_v58 = vld [vmem:[%s16334_s1 + $0x1f0] sm:$0xff]  }
  0xa2   : > { %10818 = vmatprep.subr.bf16.mxu0 %v12453_v53 }
  0xa4   : > { %10675 = vmatpush3.bf16.msra.mxu1 %v12452_v8  ;;  %v12475_v8 = vld [vmem:[%s16334_s1 + $0x230] sm:$0xff]  }
  0xa5   : > { %10819 = vmatpush3.bf16.msra.mxu0 %v12453_v53  ;;  %10676 = vmatprep.subr.bf16.mxu1 %v12454_v62  ;;  %v13530_v53 = vld [vmem:[%s16336_s3 + $0xc0] sm:$0xff]  }
  0xa6   : > { %10645 = vmatmul.mubr.bf16.gmra.mrb[40].mxu1 %v13365_v39  ;;  %10820 = vmatprep.subr.bf16.mxu0 %v12455_v7 }
  0xa7   : > { %10789 = vmatmul.mubr.bf16.gmra.mrb[40].mxu0 %v13151_v32  ;;  %10648 = vmatprep.mubr.bf16.mxu1 %v13372_v51 }
  0xa8   : > { %10792 = vmatprep.mubr.bf16.mxu0 %v13162_v2  ;;  %10677 = vmatpush3.bf16.msra.mxu1 %v12454_v62  ;;  %v13535_v62 = vld [vmem:[%s16336_s3 + $0x100] sm:$0xff]  }
  0xa9   : > { %10821 = vmatpush3.bf16.msra.mxu0 %v12455_v7  ;;  %10678 = vmatprep.subr.bf16.mxu1 %v12456_v41 }
  0xaa   : > { %10822 = vmatprep.subr.bf16.mxu0 %v12457_v22 }
  0xac   : > { %10679 = vmatpush3.bf16.msra.mxu1 %v12456_v41  ;;  %v2775_v41 = vld [vmem:[#allocation2 + $0x20] sm:$0xff] }
  0xad   : > { %10823 = vmatpush3.bf16.msra.mxu0 %v12457_v22  ;;  %10680 = vmatprep.subr.bf16.mxu1 %v12458_v57  ;;  %v2819_v33 = vshrl.u32 %v2775_v41, 16 }
  0xae   : > { %10649 = vmatmul.mubr.bf16.gmra.mrb[44].mxu1 %v13388_v54  ;;  %10824 = vmatprep.subr.bf16.mxu0 %v12459_v49 }
  0xaf   : > { %10793 = vmatmul.mubr.bf16.gmra.mrb[44].mxu0 %v13167_v30  ;;  %10652 = vmatprep.mubr.bf16.mxu1 %v13392_v14 }
  0xb0   : > { %10796 = vmatprep.mubr.bf16.mxu0 %v13176_v18  ;;  %10681 = vmatpush3.bf16.msra.mxu1 %v12458_v57 }
  0xb1   : > { %10825 = vmatpush3.bf16.msra.mxu0 %v12459_v49  ;;  %10682 = vmatprep.subr.bf16.mxu1 %v12460_v19 }
  0xb2   : > { %10826 = vmatprep.subr.bf16.mxu0 %v12461_v20 }
  0xb4   : > { %10683 = vmatpush3.bf16.msra.mxu1 %v12460_v19 }
  0xb5   : > { %10827 = vmatpush3.bf16.msra.mxu0 %v12461_v20  ;;  %10716 = vmatprep.subr.bf16.mxu1 %v12462_v10 }
  0xb6   : > { %10653 = vmatmul.mubr.bf16.gmra.mrb[48].mxu1 %v13402_v4  ;;  %10860 = vmatprep.subr.bf16.mxu0 %v12463_v34 }
  0xb7   : > { %10797 = vmatmul.mubr.bf16.gmra.mrb[48].mxu0 %v13184_v48  ;;  %10656 = vmatprep.mubr.bf16.mxu1 %v13406_v52 }
  0xb8   : > { %10800 = vmatprep.mubr.bf16.mxu0 %v13193_v37 }
  0xbe   : > { %10657 = vmatmul.mubr.bf16.gmra.mrb[52].mxu1 %v13418_v9 }
  0xbf   : > { %10801 = vmatmul.mubr.bf16.gmra.mrb[52].mxu0 %v13198_v0  ;;  %10660 = vmatprep.mubr.bf16.mxu1 %v13422_v3 }
  0xc0   : > { %10804 = vmatprep.mubr.bf16.mxu0 %v13416_v63 }
  0xc6   : > { %10661 = vmatmul.mubr.bf16.gmra.mrb[56].mxu1 %v13448_v24 }
  0xc7   : > { %10805 = vmatmul.mubr.bf16.gmra.mrb[56].mxu0 %v13438_v36  ;;  %10664 = vmatprep.mubr.bf16.mxu1 %v13452_v35 }
  0xc8   : > { %10808 = vmatprep.mubr.bf16.mxu0 %v2260_v60 }
  0xce   : > { %10665 = vmatmul.mubr.bf16.gmra.mrb[60].mxu1 %v13465_v13 }
  0xcf   : > { %10809 = vmatmul.mubr.bf16.gmra.mrb[60].mxu0 %v2266_v26  ;;  %10684 = vmatprep.mubr.bf16.mxu1 %v13434_v16  ;;  %v2778_v26 = vld [vmem:[#allocation2 + $0x38] sm:$0xff] }
  0xd0   : > { %10828 = vmatprep.mubr.bf16.mxu0 %v2500_v31 }
  0xd6   : > { %10685 = vmatmul.mubr.bf16.vlgmr.msra.gmra.mrb[32].mxu1 %v13315_v6  ;;  %v12469_v6 = vld [vmem:[%s16334_s1 + $0x218] sm:$0xff]  }
  0xd7   : > { %10829 = vmatmul.mubr.bf16.vlgmr.msra.gmra.mrb[32].mxu0 %v13075_v47  ;;  %10717 = vmatpush3.bf16.msra.mxu1 %v12462_v10  ;;  %v12468_v47 = vld [vmem:[%s16334_s1 + $0x1d8] sm:$0xff]  }
  0xd8   : > { %10861 = vmatpush3.bf16.msra.mxu0 %v12463_v34  ;;  %10688 = vmatprep.mubr.bf16.mxu1 %v13328_v29  ;;  %v2777_v34 = vld [vmem:[#allocation2 + $0x30] sm:$0xff] }
  0xd9   : > { %10832 = vmatprep.mubr.bf16.mxu0 %v13106_v5  ;;  %10718 = vmatprep.subr.bf16.mxu1 %v12464_v11  ;;  %v12470_v5 = vld [vmem:[%s16334_s1 + $0x1e0] sm:$0xff]   ;;  %v2831_v38 = vshll.u32 %v2777_v34, 16 }
  0xda   : > { %10862 = vmatprep.subr.bf16.mxu0 %v12465_v12 }
  0xdb   : > { %10719 = vmatpush3.bf16.msra.mxu1 %v12464_v11 }
  0xdc   : > { %10863 = vmatpush3.bf16.msra.mxu0 %v12465_v12  ;;  %10720 = vmatprep.subr.bf16.mxu1 %v12466_v44  ;;  %v2833_v12 = vrot.slane %v2831_v38, 1 }
  0xdd   : > { %10864 = vmatprep.subr.bf16.mxu0 %v12467_v59 }
  0xde   : > { %10689 = vmatmul.mubr.bf16.gmra.mrb[36].mxu1 %v13332_v23 }
  0xdf   : > { %10833 = vmatmul.mubr.bf16.gmra.mrb[36].mxu0 %v13132_v45  ;;  %10692 = vmatprep.mubr.bf16.mxu1 %v13348_v27  ;;  %v12472_v45 = vld [vmem:[%s16334_s1 + $0x1e8] sm:$0xff]  }
  0xe0   : > { %10836 = vmatprep.mubr.bf16.mxu0 %v13135_v56  ;;  %10721 = vmatpush3.bf16.msra.mxu1 %v12466_v44  ;;  %v12473_v56 = vld [vmem:[%s16334_s1 + $0x228] sm:$0xff]  }
  0xe1   : > { %10865 = vmatpush3.bf16.msra.mxu0 %v12467_v59  ;;  %10722 = vmatprep.subr.bf16.mxu1 %v12468_v47 }
  0xe2   : > { %10866 = vmatprep.subr.bf16.mxu0 %v12469_v6 }
  0xe4   : > { %10723 = vmatpush3.bf16.msra.mxu1 %v12468_v47  ;;  %v2839_v47 = vshll.u32 %v2778_v26, 16 }
  0xe5   : > { %10867 = vmatpush3.bf16.msra.mxu0 %v12469_v6  ;;  %10724 = vmatprep.subr.bf16.mxu1 %v12470_v5 }
  0xe6   : > { %10693 = vmatmul.mubr.bf16.gmra.mrb[40].mxu1 %v13352_v17  ;;  %10868 = vmatprep.subr.bf16.mxu0 %v12471_v42 }
  0xe7   : > { %10837 = vmatmul.mubr.bf16.gmra.mrb[40].mxu0 %v13144_v61  ;;  %10696 = vmatprep.mubr.bf16.mxu1 %v13365_v39  ;;  %v12476_v61 = vld [vmem:[%s16334_s1 + $0x1f8] sm:$0xff]  }
  0xe8   : > { %10840 = vmatprep.mubr.bf16.mxu0 %v13151_v32  ;;  %10725 = vmatpush3.bf16.msra.mxu1 %v12470_v5  ;;  %v12477_v32 = vld [vmem:[%s16334_s1 + $0x238] sm:$0xff]  }
  0xe9   : > { %10869 = vmatpush3.bf16.msra.mxu0 %v12471_v42  ;;  %10726 = vmatprep.subr.bf16.mxu1 %v12472_v45  ;;  %v2835_v42 = vshrl.u32 %v2777_v34, 16  ;;  %v12481_v34 = vld [vmem:[%s16336_s3 + $0xd8] sm:$0xff]  }
  0xea   : > { %10870 = vmatprep.subr.bf16.mxu0 %v12473_v56 }
  0xec   : > { %10727 = vmatpush3.bf16.msra.mxu1 %v12472_v45  ;;  %v2843_v45 = vshrl.u32 %v2778_v26, 16 }
  0xed   : > { %10871 = vmatpush3.bf16.msra.mxu0 %v12473_v56  ;;  %10728 = vmatprep.subr.bf16.mxu1 %v12474_v58 }
  0xee   : > { %10697 = vmatmul.mubr.bf16.gmra.mrb[44].mxu1 %v13372_v51  ;;  %10872 = vmatprep.subr.bf16.mxu0 %v12475_v8 }
  0xef   : > { %10841 = vmatmul.mubr.bf16.gmra.mrb[44].mxu0 %v13162_v2  ;;  %10700 = vmatprep.mubr.bf16.mxu1 %v13388_v54  ;;  %v2774_v2 = vld [vmem:[#allocation2 + $0x18] sm:$0xff] }
  0xf0   : > { %10844 = vmatprep.mubr.bf16.mxu0 %v13167_v30  ;;  %10729 = vmatpush3.bf16.msra.mxu1 %v12474_v58  ;;  %v2174_v30 = vld [vmem:[#allocation2 + $0x88] sm:$0x1]  ;;  %v2810_v7 = vshll.u32 %v2774_v2, 16  ;;  %v2808_v57 = vshrl.u32 %v2774_v2, 16 }
  0xf1   : > { %10873 = vmatpush3.bf16.msra.mxu0 %v12475_v8  ;;  %10730 = vmatprep.subr.bf16.mxu1 %v12476_v61  ;;  %v2545_v22 = vshll.u32 %v2174_v30, 16  ;;  %v12479_v58 = vld [vmem:[%s16336_s3 + $0xc8] sm:$0xff]  }
  0xf2   : > { %10874 = vmatprep.subr.bf16.mxu0 %v12477_v32  ;;  %v2812_v49 = vrot.slane %v2810_v7, 1  ;;  %v12483_v8 = vld [vmem:[%s16336_s3 + $0x108] sm:$0xff]  }
  0xf3   : > { %v2780_v2 = vld [vmem:[#allocation2 + $0x48] sm:$0xff] }
  0xf4   : > { %10731 = vmatpush3.bf16.msra.mxu1 %v12476_v61  ;;  %v2841_v61 = vrot.slane %v2839_v47, 1 }
  0xf5   : > { %10875 = vmatpush3.bf16.msra.mxu0 %v12477_v32  ;;  %10908 = vmatprep.subr.bf16.mxu1 %v13530_v53  ;;  %v2837_v32 = vor.u32 %v2835_v42, %v2833_v12 }
  0xf6   : > { %10701 = vmatmul.mubr.bf16.gmra.mrb[48].mxu1 %v13392_v14  ;;  %11052 = vmatprep.subr.bf16.mxu0 %v13535_v62  ;;  %v2845_v7 = vor.u32 %v2843_v45, %v2841_v61 }
  0xf7   : > { %10845 = vmatmul.mubr.bf16.gmra.mrb[48].mxu0 %v13176_v18  ;;  %10704 = vmatprep.mubr.bf16.mxu1 %v13402_v4  ;;  %v2815_v18 = vshll.u32 %v2775_v41, 16 }
  0xf8   : > { %10848 = vmatprep.mubr.bf16.mxu0 %v13184_v48  ;;  %v2547_v48 = vrot.slane %v2545_v22, 1 }
  0xf9   : > { %v2817_v20 = vrot.slane %v2815_v18, 1 }
  0xfb   : > { %v2821_v1 = vor.u32 %v2819_v33, %v2817_v20  ;;  %v2782_v33 = vld [vmem:[#allocation2 + $0x58] sm:$0xff] }
  0xfe   : > { %10705 = vmatmul.mubr.bf16.gmra.mrb[52].mxu1 %v13406_v52 }
  0xff   : > { %10849 = vmatmul.mubr.bf16.gmra.mrb[52].mxu0 %v13193_v37  ;;  %10708 = vmatprep.mubr.bf16.mxu1 %v13418_v9  ;;  %v2776_v37 = vld [vmem:[#allocation2 + $0x28] sm:$0xff] }
 0x100   : > { %10852 = vmatprep.mubr.bf16.mxu0 %v13198_v0  ;;  %v2813_v0 = vor.u32 %v2812_v49, %v2808_v57  ;;  %v2823_v28 = vshll.u32 %v2776_v37, 16  ;;  %v12485_v57 = vld [vmem:[%s16336_s3 + $0x110] sm:$0xff]   ;;  %v2855_v49 = vshll.u32 %v2780_v2, 16 }
 0x102   : > { %v2818_v40 = vsel %vm16346_vm1, %v2813_v0, %v2817_v20  ;;  %v2825_v60 = vrot.slane %v2823_v28, 1  ;;  %v2857_v28 = vrot.slane %v2855_v49, 1 }
 0x104   : > { %v2826_v5 = vsel %vm16346_vm1, %v2821_v1, %v2825_v60  ;;  %v2783_v1 = vld [vmem:[#allocation2 + $0x60] sm:$0xff] }
 0x105   : > { %v2879_v42 = vshll.u32 %v2783_v1, 16 }
 0x106   : > { %10709 = vmatmul.mubr.bf16.gmra.mrb[56].mxu1 %v13422_v3 }
 0x107   : > { %10853 = vmatmul.mubr.bf16.gmra.mrb[56].mxu0 %v13416_v63  ;;  %10712 = vmatprep.mubr.bf16.mxu1 %v13448_v24  ;;  %v2548_v63 = vsel %vm16346_vm1, %v13432_v55, %v2547_v48  ;;  %v2779_v55 = vld [vmem:[#allocation2 + $0x40] sm:$0xff]  ;;  %v2842_v48 = vsel %vm16346_vm1, %v2837_v32, %v2841_v61  ;;  %v2785_v32 = vld [vmem:[#allocation2 + $0x70] sm:$0xff] }
 0x108   : > { %10856 = vmatprep.mubr.bf16.mxu0 %v13438_v36  ;;  %v2827_v36 = vshrl.u32 %v2776_v37, 16  ;;  %v2847_v56 = vshll.u32 %v2779_v55, 16  ;;  %v2851_v37 = vshrl.u32 %v2779_v55, 16 }
 0x109   : > { %v13551_v19 = vpop.f32.mrb[0].mxu1 }
 0x10a   : > { %v13553_v10 = vpop.f32.mrb[1].mxu1  ;;  %v2829_v11 = vor.u32 %v2827_v36, %v2825_v60  ;;  %v2849_v41 = vrot.slane %v2847_v56, 1  ;;  %v12484_v60 = vld [vmem:[%s16336_s3 + $0xe0] sm:$0xff]   ;;  %v2784_v56 = vld [vmem:[#allocation2 + $0x68] sm:$0xff] }
 0x10b   : > { %v13555_v25 = vpop.f32.mrb[2].mxu1 }
 0x10c   : > { %v13557_v46 = vpop.f32.mrb[3].mxu1  ;;  %v2850_v0 = vsel %vm16346_vm1, %v2845_v7, %v2849_v41 }
 0x10e   : > { %10713 = vmatmul.mubr.bf16.gmra.mrb[60].mxu1 %v13452_v35 }
 0x10f   : > { %10857 = vmatmul.mubr.bf16.gmra.mrb[60].mxu0 %v2548_v63  ;;  %10732 = vmatprep.mubr.bf16.mxu1 %v13328_v29  ;;  %v2834_v29 = vsel %vm16346_vm1, %v2829_v11, %v2833_v12  ;;  %v2853_v63 = vor.u32 %v2851_v37, %v2849_v41  ;;  %v2887_v41 = vshll.u32 %v2784_v56, 16  ;;  %v2891_v37 = vshrl.u32 %v2784_v56, 16 }
 0x110   : > { %10876 = vmatprep.mubr.bf16.mxu0 %v2818_v40 }
 0x111   : > { %v13564_v31 = vpop.f32.mrb[4].mxu1  ;;  %v2858_v12 = vsel %vm16346_vm1, %v2853_v63, %v2857_v28  ;;  %v2787_v63 = vld [vmem:[#allocation2 + $0x80] sm:$0xff] }
 0x112   : > { %v13566_v44 = vpop.f32.mrb[5].mxu1 }
 0x113   : > { %v13568_v59 = vpop.f32.mrb[6].mxu1 }
 0x114   : > { %v13570_v6 = vpop.f32.mrb[7].mxu1 }
 0x116   : > { %10733 = vmatmul.mubr.bf16.vlgmr.msra.gmra.mrb[32].mxu1 %v13332_v23  ;;  %v12480_v23 = vld [vmem:[%s16336_s3 + $0xd0] sm:$0xff]  }
 0x117   : > { %10877 = vmatmul.mubr.bf16.vlgmr.msra.gmra.mrb[32].mxu0 %v2826_v5  ;;  %10736 = vmatprep.mubr.bf16.mxu1 %v13348_v27  ;;  %v2781_v27 = vld [vmem:[#allocation2 + $0x50] sm:$0xff]  ;;  %v2875_v5 = vshrl.u32 %v2782_v33, 16 }
 0x118   : > { %10880 = vmatprep.mubr.bf16.mxu0 %v2834_v29  ;;  %10909 = vmatpush3.bf16.msra.mxu1 %v13530_v53  ;;  %v2863_v20 = vshll.u32 %v2781_v27, 16  ;;  %v2867_v55 = vshrl.u32 %v2781_v27, 16  ;;  %v2883_v27 = vshrl.u32 %v2783_v1, 16 }
 0x119   : > { %v13583_v30 = vpop.f32.mrb[8].mxu1  ;;  %10910 = vmatprep.subr.bf16.mxu1 %v12479_v58  ;;  %11053 = vmatpush3.bf16.msra.mxu0 %v13535_v62  ;;  %v2859_v62 = vshrl.u32 %v2780_v2, 16 }
 0x11a   : > { %v13589_v22 = vpop.f32.mrb[9].mxu1  ;;  %11054 = vmatprep.subr.bf16.mxu0 %v12483_v8  ;;  %v2865_v38 = vrot.slane %v2863_v20, 1  ;;  %v2786_v20 = vld [vmem:[#allocation2 + $0x78] sm:$0xff] }
 0x11b   : > { %v13594_v53 = vpop.f32.mrb[10].mxu1  ;;  %v2861_v36 = vor.u32 %v2859_v62, %v2857_v28 }
 0x11c   : > { %v13596_v18 = vpop.f32.mrb[11].mxu1  ;;  %10911 = vmatpush3.bf16.msra.mxu1 %v12479_v58  ;;  %v2869_v45 = vor.u32 %v2867_v55, %v2865_v38  ;;  %v2907_v55 = vshrl.u32 %v2786_v20, 16 }
 0x11d   : > { %10912 = vmatprep.subr.bf16.mxu1 %v12480_v23  ;;  %11055 = vmatpush3.bf16.msra.mxu0 %v12483_v8  ;;  %v2866_v47 = vsel %vm16346_vm1, %v2861_v36, %v2865_v38  ;;  %v2881_v8 = vrot.slane %v2879_v42, 1  ;;  %v2903_v38 = vshll.u32 %v2786_v20, 16  ;;  %v2788_v42 = vld [vmem:[#allocation2 + $0x88] sm:$0xff] }
 0x11e   : > { %10737 = vmatmul.mubr.bf16.gmra.mrb[36].mxu1 %v13352_v17  ;;  %11056 = vmatprep.subr.bf16.mxu0 %v12485_v57 }
 0x11f   : > { %10881 = vmatmul.mubr.bf16.gmra.mrb[36].mxu0 %v2842_v48  ;;  %10740 = vmatprep.mubr.bf16.mxu1 %v13365_v39  ;;  %v2871_v39 = vshll.u32 %v2782_v33, 16  ;;  %v2885_v62 = vor.u32 %v2883_v27, %v2881_v8 }
 0x120   : > { %10884 = vmatprep.mubr.bf16.mxu0 %v2850_v0  ;;  %10913 = vmatpush3.bf16.msra.mxu1 %v12480_v23  ;;  %v2895_v0 = vshll.u32 %v2785_v32, 16 }
 0x121   : > { %v13605_v40 = vpop.f32.mrb[12].mxu1  ;;  %10914 = vmatprep.subr.bf16.mxu1 %v12481_v34  ;;  %11057 = vmatpush3.bf16.msra.mxu0 %v12485_v57  ;;  %v2873_v29 = vrot.slane %v2871_v39, 1 }
 0x122   : > { %v13610_v17 = vpop.f32.mrb[13].mxu1 }
 0x123   : > { %v13612_v26 = vpop.f32.mrb[14].mxu1  ;;  %v2877_v58 = vor.u32 %v2875_v5, %v2873_v29 }
 0x124   : > { %v13614_v11 = vpop.f32.mrb[15].mxu1  ;;  %10915 = vmatpush3.bf16.msra.mxu1 %v12481_v34 }
 0x125   : > { %10916 = vmatprep.subr.bf16.mxu1 %v12484_v60  ;;  %v2882_v48 = vsel %vm16346_vm1, %v2877_v58, %v2881_v8  ;;  %v2919_v8 = vshll.u32 %v2788_v42, 16 }
 0x126   : > { %10741 = vmatmul.mubr.bf16.gmra.mrb[40].mxu1 %v13372_v51 }
 0x127   : > { %10885 = vmatmul.mubr.bf16.gmra.mrb[40].mxu0 %v2858_v12  ;;  %10744 = vmatprep.mubr.bf16.mxu1 %v13388_v54  ;;  %v2874_v54 = vsel %vm16346_vm1, %v2869_v45, %v2873_v29 }
 0x128   : > { %10888 = vmatprep.mubr.bf16.mxu0 %v2866_v47  ;;  %10917 = vmatpush3.bf16.msra.mxu1 %v12484_v60  ;;  %v2911_v47 = vshll.u32 %v2787_v63, 16 }
 0x12a   : > { %v10590_v61 = vpop.f32.mrb[0].mxu0 }
 0x12b   : > { %v13621_v2 = vadd.f32 %v10590_v61, %v13551_v19  ;;  %v1307_v7 = vpop.f32.mrb[1].mxu0 }
 0x12c   : > { %v13624_v23 = vadd.f32 %v1307_v7, %v13553_v10  ;;  %v10591_v51 = vpop.f32.mrb[2].mxu0  ;;  %v2889_v10 = vrot.slane %v2887_v41, 1 }
 0x12d   : > { %v13628_v57 = vadd.f32 %v10591_v51, %v13555_v25  ;;  %v1310_v49 = vpop.f32.mrb[3].mxu0  ;;  %v2897_v25 = vrot.slane %v2895_v0, 1  ;;  %v2923_v51 = vshrl.u32 %v2788_v42, 16 }
 0x12e   : > { %v13632_v19 = vadd.f32 %v1310_v49, %v13557_v46  ;;  %10745 = vmatmul.mubr.bf16.gmra.mrb[44].mxu1 %v13392_v14  ;;  %v2893_v34 = vor.u32 %v2891_v37, %v2889_v10  ;;  %v2890_v60 = vsel %vm16346_vm1, %v2885_v62, %v2889_v10  ;;  %v2790_v49 = vld [vmem:[#allocation2 + $0x98] sm:$0x1] }
 0x12f   : > { %10889 = vmatmul.mubr.bf16.gmra.mrb[44].mxu0 %v2874_v54  ;;  %10748 = vmatprep.mubr.bf16.mxu1 %v13402_v4  ;;  %v2899_v4 = vshrl.u32 %v2785_v32, 16  ;;  %v2915_v32 = vshrl.u32 %v2787_v63, 16 }
 0x130   : > { %10892 = vmatprep.mubr.bf16.mxu0 %v2882_v48  ;;  %v2898_v12 = vsel %vm16346_vm1, %v2893_v34, %v2897_v25 }
 0x131   : > { %v2901_v5 = vor.u32 %v2899_v4, %v2897_v25 }
 0x132   : > { %v10594_v28 = vpop.f32.mrb[4].mxu0 }
 0x133   : > { %v13637_v33 = vadd.f32 %v10594_v28, %v13564_v31  ;;  %v1323_v36 = vpop.f32.mrb[5].mxu0 }
 0x134   : > { %v13640_v46 = vadd.f32 %v1323_v36, %v13566_v44  ;;  %v10595_v14 = vpop.f32.mrb[6].mxu0  ;;  %v2905_v44 = vrot.slane %v2903_v38, 1 }
 0x135   : > { %v13644_v1 = vadd.f32 %v10595_v14, %v13568_v59  ;;  %v1326_v39 = vpop.f32.mrb[7].mxu0  ;;  %v2913_v59 = vrot.slane %v2911_v47, 1 }
 0x136   : > { %v13648_v31 = vadd.f32 %v1326_v39, %v13570_v6  ;;  %10749 = vmatmul.mubr.bf16.gmra.mrb[48].mxu1 %v13406_v52  ;;  %v2909_v29 = vor.u32 %v2907_v55, %v2905_v44  ;;  %v2906_v52 = vsel %vm16346_vm1, %v2901_v5, %v2905_v44 }
 0x137   : > { %10893 = vmatmul.mubr.bf16.gmra.mrb[48].mxu0 %v2890_v60  ;;  %10752 = vmatprep.mubr.bf16.mxu1 %v13418_v9 }
 0x138   : > { %10896 = vmatprep.mubr.bf16.mxu0 %v2898_v12  ;;  %v2914_v41 = vsel %vm16346_vm1, %v2909_v29, %v2913_v59 }
 0x13a   : > { %v10598_v45 = vpop.f32.mrb[8].mxu0 }
 0x13b   : > { %v13653_v56 = vadd.f32 %v10598_v45, %v13583_v30  ;;  %v1339_v58 = vpop.f32.mrb[9].mxu0  ;;  %v2921_v30 = vrot.slane %v2919_v8, 1 }
 0x13c   : > { %v13656_v6 = vadd.f32 %v1339_v58, %v13589_v22  ;;  %v10599_v61 = vpop.f32.mrb[10].mxu0  ;;  %v2917_v22 = vor.u32 %v2915_v32, %v2913_v59 }
 0x13d   : > { %v13660_v9 = vadd.f32 %v10599_v61, %v13594_v53  ;;  %v1342_v7 = vpop.f32.mrb[11].mxu0  ;;  %v2925_v27 = vor.u32 %v2923_v51, %v2921_v30 }
 0x13e   : > { %v13664_v54 = vadd.f32 %v1342_v7, %v13596_v18  ;;  %10753 = vmatmul.mubr.bf16.gmra.mrb[52].mxu1 %v13422_v3  ;;  %v2922_v10 = vsel %vm16346_vm1, %v2917_v22, %v2921_v30  ;;  %v2935_v3 = vshll.u32 %v2790_v49, 16 }
 0x13f   : > { %10897 = vmatmul.mubr.bf16.gmra.mrb[52].mxu0 %v2906_v52  ;;  %10756 = vmatprep.mubr.bf16.mxu1 %v13448_v24  ;;  %v2930_v20 = vsel %vm16346_vm1, %v2925_v27, %v13446_v21 }
 0x140   : > { %10900 = vmatprep.mubr.bf16.mxu0 %v2914_v41 }
 0x142   : > { %v10602_v48 = vpop.f32.mrb[12].mxu0 }
 0x143   : > { %v13669_v53 = vadd.f32 %v10602_v48, %v13605_v40  ;;  %v1355_v37 = vpop.f32.mrb[13].mxu0  ;;  %v2937_v40 = vrot.slane %v2935_v3, 1 }
 0x144   : > { %v13672_v0 = vadd.f32 %v1355_v37, %v13610_v17  ;;  %v10603_v18 = vpop.f32.mrb[14].mxu0 }
 0x145   : > { %v13676_v62 = vadd.f32 %v10603_v18, %v13612_v26  ;;  %v1358_v24 = vpop.f32.mrb[15].mxu0 }
 0x146   : > { %v13681_v34 = vadd.f32 %v1358_v24, %v13614_v11  ;;  %10757 = vmatmul.mubr.bf16.gmra.mrb[56].mxu1 %v13452_v35  ;;  %v2938_v11 = vsel %vm16346_vm1, %v13458_v50, %v2937_v40  ;;  %v12486_v40 = vld [vmem:[%s16336_s3 + $0x118] sm:$0xff]  }
 0x147   : > { %10901 = vmatmul.mubr.bf16.gmra.mrb[56].mxu0 %v2922_v10  ;;  %10760 = vmatprep.mubr.bf16.mxu1 %v13465_v13 }
 0x148   : > { %10904 = vmatprep.mubr.bf16.mxu0 %v2930_v20  ;;  %11058 = vmatprep.subr.bf16.mxu0 %v12486_v40 }
 0x149   : > { %v10558_v17 = vpop.f32.mrb[16].mxu1  ;;  %11059 = vmatpush3.bf16.msra.mxu0 %v12486_v40 }
 0x14a   : > { %v10606_v25 = vpop.f32.mrb[16].mxu0  ;;  %v981_v28 = vpop.f32.mrb[17].mxu1 }
 0x14b   : > { %v13685_v63 = vadd.f32 %v10606_v25, %v10558_v17  ;;  %v1371_v26 = vpop.f32.mrb[17].mxu0  ;;  %v10559_v36 = vpop.f32.mrb[18].mxu1 }
 0x14c   : > { %v13687_v38 = vadd.f32 %v1371_v26, %v981_v28  ;;  %v10607_v21 = vpop.f32.mrb[18].mxu0  ;;  %v984_v14 = vpop.f32.mrb[19].mxu1 }
 0x14d   : > { %v13691_v35 = vadd.f32 %v10607_v21, %v10559_v36  ;;  %v1374_v60 = vpop.f32.mrb[19].mxu0 }
 0x14e   : > { %v13693_v13 = vadd.f32 %v1374_v60, %v984_v14  ;;  %10761 = vmatmul.mubr.bf16.gmra.mrb[60].mxu1 %v13434_v16  ;;  %v12488_v14 = vld [vmem:[%s16336_s3 + $0x120] sm:$0xff]   ;;  %v12491_v60 = vld [vmem:[%s16336_s3 + $0x130] sm:$0xff]   ;;  %v16588_v16 = vmov 0 }
 0x14f   : > { %10905 = vmatmul.mubr.bf16.gmra.mrb[60].mxu0 %v2938_v11  ;;  %11060 = vmatprep.subr.bf16.mxu0 %v12488_v14  ;;  %v12489_v11 = vld [vmem:[%s16336_s3 + $0x128] sm:$0xff]  }
 0x150   : > { %11061 = vmatpush3.bf16.msra.mxu0 %v12488_v14 }
 0x151   : > { %v10562_v4 = vpop.f32.mrb[20].mxu1  ;;  %11062 = vmatprep.subr.bf16.mxu0 %v12489_v11 }
 0x152   : > { %v10610_v39 = vpop.f32.mrb[20].mxu0  ;;  %v997_v12 = vpop.f32.mrb[21].mxu1 }
 0x153   : > { %v13696_v55 = vadd.f32 %v10610_v39, %v10562_v4  ;;  %v1387_v47 = vpop.f32.mrb[21].mxu0  ;;  %v10563_v44 = vpop.f32.mrb[22].mxu1  ;;  %v12487_v4 = vld [vmem:[%s16336_s3 + $0xe8] sm:$0xff]   ;;  %v12492_v39 = vld [vmem:[%s16336_s3 + $0x138] sm:$0xff]  }
 0x154   : > { %v13698_v5 = vadd.f32 %v1387_v47, %v997_v12  ;;  %v10611_v42 = vpop.f32.mrb[22].mxu0  ;;  %v1000_v29 = vpop.f32.mrb[23].mxu1  ;;  %11063 = vmatpush3.bf16.msra.mxu0 %v12489_v11  ;;  %10918 = vmatprep.subr.bf16.mxu1 %v12487_v4  ;;  %v12490_v12 = vld [vmem:[%s16336_s3 + $0xf0] sm:$0xff]   ;;  %v12493_v47 = vld [vmem:[%s16336_s3 + $0xf8] sm:$0xff]  }
 0x155   : > { %v13700_v59 = vadd.f32 %v10611_v42, %v10563_v44  ;;  %v1390_v45 = vpop.f32.mrb[23].mxu0  ;;  %11064 = vmatprep.subr.bf16.mxu0 %v12491_v60  ;;  %10919 = vmatpush3.bf16.msra.mxu1 %v12487_v4  ;;  %v13747_v44 = vld [vmem:[%s16336_s3] sm:$0xff]  }
 0x156   : > { %v13702_v58 = vadd.f32 %v1390_v45, %v1000_v29  ;;  %10920 = vmatprep.subr.bf16.mxu1 %v12490_v12  ;;  %v13753_v42 = vld [vmem:[%s16336_s3 + $0x40] sm:$0xff]   ;;  %v346_v29 = vlaneseq }
 0x158   : > { %11065 = vmatpush3.bf16.msra.mxu0 %v12491_v60  ;;  %v13756_v45 = vshrl.u32 %v346_v29, 7  ;;  %v16582_v60 = vmov 0 }
 0x159   : > { %v10566_v8 = vpop.f32.mrb[24].mxu1  ;;  %11066 = vmatprep.subr.bf16.mxu0 %v12492_v39  ;;  %10921 = vmatpush3.bf16.msra.mxu1 %v12490_v12 }
 0x15a   : > { %v10614_v61 = vpop.f32.mrb[24].mxu0  ;;  %v1013_v52 = vpop.f32.mrb[25].mxu1  ;;  %10922 = vmatprep.subr.bf16.mxu1 %v12493_v47  ;;  %v373_v40 = vadd.s32 208, %v13756_v45  ;;  %v377_v14 = vadd.s32 240, %v13756_v45  ;;  %v375_v11 = vadd.s32 224, %v13756_v45 }
 0x15b   : > { %v13704_v32 = vadd.f32 %v10614_v61, %v10566_v8  ;;  %v1403_v7 = vpop.f32.mrb[25].mxu0  ;;  %v10567_v41 = vpop.f32.mrb[26].mxu1  ;;  %v349_v8 = vadd.s32 16, %v13756_v45  ;;  %v353_v61 = vadd.s32 48, %v13756_v45 }
 0x15c   : > { %v13706_v51 = vadd.f32 %v1403_v7, %v1013_v52  ;;  %v10615_v30 = vpop.f32.mrb[26].mxu0  ;;  %v1016_v22 = vpop.f32.mrb[27].mxu1  ;;  %11067 = vmatpush3.bf16.msra.mxu0 %v12492_v39  ;;  %v351_v52 = vadd.s32 32, %v13756_v45  ;;  %v405_v15 = vand.u32 15, %v373_v40  ;;  %v16609_v40 = vmov 0 }
 0x15d   : > { %16575 = vst [vmem:[#allocation8_spill] sm:$0xff] %v13704_v32  ;;  %v13708_v27 = vadd.f32 %v10615_v30, %v10567_v41  ;;  %v1406_v49 = vpop.f32.mrb[27].mxu0  ;;  %10923 = vmatpush3.bf16.msra.mxu1 %v12493_v47  ;;  %11100 = vmatprep.subr.bf16.mxu0 %v13753_v42  ;;  %v381_v7 = vand.u32 15, %v349_v8  ;;  %v357_v41 = vadd.s32 80, %v13756_v45  ;;  %v355_v30 = vadd.s32 64, %v13756_v45 }
 0x15e   : > { %16576 = vst [vmem:[#allocation9_spill] sm:$0xff] %v13706_v51  ;;  %v13710_v48 = vadd.f32 %v1406_v49, %v1016_v22  ;;  %10956 = vmatprep.subr.bf16.mxu1 %v13747_v44  ;;  %v361_v22 = vadd.s32 112, %v13756_v45  ;;  %v379_v49 = vand.u32 15, %v13756_v45  ;;  %v16585_v47 = vmov 0 }
 0x15f   : > { %16577 = vst [vmem:[#allocation10_spill] sm:$0xff] %v13708_v27  ;;  %vm13774_vm2 = vcmp.gt.s32.totalorder %v381_v7, 0  ;;  %v389_v4 = vand.u32 15, %v357_v41  ;;  %v387_v39 = vand.u32 15, %v355_v30  ;;  %v16591_v7 = vmov 0 }
 0x160   : > { %16578 = vst [vmem:[#allocation11_spill] sm:$0xff] %v13710_v48  ;;  %v16583_v60 = vsel %vm13774_vm2, 4294967295, %v16582_v60  ;;  %v393_v12 = vand.u32 15, %v361_v22  ;;  %vm13778_vm3 = vcmp.gt.s32.totalorder %v379_v49, 0  ;;  %v409_v41 = vand.u32 15, %v377_v14 }
 0x161   : > { %v10570_v37 = vpop.f32.mrb[28].mxu1  ;;  %16584 = vst [vmem:[#allocation15_spill] sm:$0xff] %v16583_v60  ;;  %v16586_v47 = vsel %vm13778_vm3, 4294967295, %v16585_v47  ;;  %v407_v30 = vand.u32 15, %v375_v11  ;;  %v350_v22 = vadd.s32 24, %v13756_v45  ;;  %vm13791_vm6 = vcmp.gt.s32.totalorder %v389_v4, 0 }
 0x162   : > { %v10618_v18 = vpop.f32.mrb[28].mxu0  ;;  %v1029_v10 = vpop.f32.mrb[29].mxu1  ;;  %16587 = vst [vmem:[#allocation16_spill] sm:$0xff] %v16586_v47  ;;  %v16594_v49 = vmov 0  ;;  %vm13795_vm7 = vcmp.gt.s32.totalorder %v387_v39, 0  ;;  %vm13799_vm8 = vcmp.gt.s32.totalorder %v393_v12, 0 }
 0x163   : > { %v13712_v3 = vadd.f32 %v10618_v18, %v10570_v37  ;;  %v1419_v24 = vpop.f32.mrb[29].mxu0  ;;  %v10571_v20 = vpop.f32.mrb[30].mxu1  ;;  %v359_v37 = vadd.s32 96, %v13756_v45  ;;  %v365_v18 = vadd.s32 144, %v13756_v45  ;;  %v16595_v49 = vsel %vm13791_vm6, 4294967295, %v16594_v49 }
 0x164   : > { %v13717_v17 = vadd.f32 %v1419_v24, %v1029_v10  ;;  %v10619_v25 = vpop.f32.mrb[30].mxu0  ;;  %v1032_v28 = vpop.f32.mrb[31].mxu1  ;;  %v363_v10 = vadd.s32 128, %v13756_v45  ;;  %v369_v24 = vadd.s32 176, %v13756_v45  ;;  %16596 = vst [vmem:[#allocation19_spill] sm:$0xff] %v16595_v49  ;;  %vm13824_vm14 = vcmp.gt.s32.totalorder %v405_v15, 0 }
 0x165   : > { %v13719_v26 = vadd.f32 %v10619_v25, %v10571_v20  ;;  %v1422_v36 = vpop.f32.mrb[31].mxu0  ;;  %v367_v20 = vadd.s32 160, %v13756_v45  ;;  %v371_v25 = vadd.s32 192, %v13756_v45  ;;  %v391_v29 = vand.u32 15, %v359_v37 }
 0x166   : > { %16579 = vst [vmem:[#allocation12_spill] sm:$0xff] %v13717_v17  ;;  %v13721_v21 = vadd.f32 %v1422_v36, %v1032_v28  ;;  %v385_v28 = vand.u32 15, %v353_v61  ;;  %v383_v36 = vand.u32 15, %v351_v52  ;;  %v397_v8 = vand.u32 15, %v365_v18 }
 0x167   : > { %16580 = vst [vmem:[#allocation13_spill] sm:$0xff] %v13719_v26  ;;  %v395_v43 = vand.u32 15, %v363_v10  ;;  %v401_v61 = vand.u32 15, %v369_v24  ;;  %v399_v52 = vand.u32 15, %v367_v20  ;;  %v403_v50 = vand.u32 15, %v371_v25 }
 0x168   : > { %16581 = vst [vmem:[#allocation14_spill] sm:$0xff] %v13721_v21  ;;  %vm13782_vm4 = vcmp.gt.s32.totalorder %v385_v28, 0  ;;  %vm13786_vm5 = vcmp.gt.s32.totalorder %v383_v36, 0  ;;  %v16597_v37 = vmov 0  ;;  %v16600_v18 = vmov 0 }
 0x169   : > { %v16589_v16 = vsel %vm13782_vm4, 4294967295, %v16588_v16  ;;  %v16592_v7 = vsel %vm13786_vm5, 4294967295, %v16591_v7  ;;  %v16598_v37 = vsel %vm13795_vm7, 4294967295, %v16597_v37  ;;  %v16601_v18 = vsel %vm13799_vm8, 4294967295, %v16600_v18 }
 0x16a   : > { %16590 = vst [vmem:[#allocation17_spill] sm:$0xff] %v16589_v16  ;;  %16593 = vst [vmem:[#allocation18_spill] sm:$0xff] %v16592_v7  ;;  %v348_v10 = vadd.s32 8, %v13756_v45  ;;  %vm13804_vm9 = vcmp.gt.s32.totalorder %v391_v29, 0  ;;  %v16603_v24 = vmov 0  ;;  %vm13808_vm10 = vcmp.gt.s32.totalorder %v397_v8, 0 }
 0x16b   : > { %16599 = vst [vmem:[#allocation20_spill] sm:$0xff] %v16598_v37  ;;  %16602 = vst [vmem:[#allocation21_spill] sm:$0xff] %v16601_v18  ;;  %v16604_v24 = vsel %vm13804_vm9, 4294967295, %v16603_v24  ;;  %v16606_v20 = vmov 0  ;;  %vm13812_vm11 = vcmp.gt.s32.totalorder %v395_v43, 0  ;;  %vm13816_vm12 = vcmp.gt.s32.totalorder %v401_v61, 0 }
 0x16c   : > { %16605 = vst [vmem:[#allocation22_spill] sm:$0xff] %v16604_v24  ;;  %v16607_v20 = vsel %vm13808_vm10, 4294967295, %v16606_v20  ;;  %v16610_v40 = vsel %vm13812_vm11, 4294967295, %v16609_v40  ;;  %v16612_v25 = vmov 0  ;;  %vm13820_vm13 = vcmp.gt.s32.totalorder %v399_v52, 0 }
 0x16d   : > { %16608 = vst [vmem:[#allocation23_spill] sm:$0xff] %v16607_v20  ;;  %16611 = vst [vmem:[#allocation24_spill] sm:$0xff] %v16610_v40  ;;  %v16613_v25 = vsel %vm13816_vm12, 4294967295, %v16612_v25  ;;  %v16615_v28 = vmov 0  ;;  %v16618_v36 = vmov 0  ;;  %vm13828_vm15 = vcmp.gt.s32.totalorder %v403_v50, 0 }
 0x16e   : > { %16614 = vst [vmem:[#allocation25_spill] sm:$0xff] %v16613_v25  ;;  %v16616_v28 = vsel %vm13820_vm13, 4294967295, %v16615_v28  ;;  %v16619_v36 = vsel %vm13824_vm14, 4294967295, %v16618_v36  ;;  %v16621_v14 = vmov 0  ;;  %v3230_v43 = vsel %vm13774_vm2, %v13621_v2, 0.0 }
 0x16f   : > { %16617 = vst [vmem:[#allocation26_spill] sm:$0xff] %v16616_v28  ;;  %16620 = vst [vmem:[#allocation27_spill] sm:$0xff] %v16619_v36  ;;  %v16622_v14 = vsel %vm13828_vm15, 4294967295, %v16621_v14  ;;  %v3228_v11 = vsel %vm13778_vm3, %v13624_v23, 0.0  ;;  %vm13838_vm1 = vcmp.gt.s32.totalorder %v409_v41, 0  ;;  %v16624_v4 = vmov 0 }
 0x170   : > { %16623 = vst [vmem:[#allocation28_spill] sm:$0xff] %v16622_v14  ;;  %v16625_v4 = vsel %vm13838_vm1, 4294967295, %v16624_v4  ;;  %vm13842_vm0 = vcmp.gt.s32.totalorder %v407_v30, 0  ;;  %v16627_v15 = vmov 0  ;;  %v382_v50 = vand.u32 15, %v350_v22 }
 0x171   : > { %16626 = vst [vmem:[#allocation29_spill] sm:$0xff] %v16625_v4  ;;  %v16628_v15 = vsel %vm13842_vm0, 4294967295, %v16627_v15  ;;  %v380_v12 = vand.u32 15, %v348_v10  ;;  %v354_v29 = vadd.s32 56, %v13756_v45  ;;  %v352_v8 = vadd.s32 40, %v13756_v45 }
 0x172   : > { %16629 = vst [vmem:[#allocation30_spill] sm:$0xff] %v16628_v15  ;;  %v358_v52 = vadd.s32 88, %v13756_v45  ;;  %v3524_v10 = vld [vmem:[#allocation2 + $0x8] sm:$0x80]  ;;  %v13885_v22 = vld [vmem:[%s16335_s2] ss:$0 sm:$0xff] }
 0x173   : > { %vm13887_vm3 = vcmp.lt.s32.totalorder %v382_v50, 15  ;;  %v16630_v23 = vmov 0  ;;  %vm13897_vm2 = vcmp.lt.s32.totalorder %v380_v12, 15  ;;  %v16633_v60 = vmov 0 }
 0x174   : > { %v16631_v23 = vsel %vm13887_vm3, 4294967295, %v16630_v23  ;;  %v16634_v60 = vsel %vm13897_vm2, 4294967295, %v16633_v60  ;;  %v386_v21 = vand.u32 15, %v354_v29  ;;  %v384_v50 = vand.u32 15, %v352_v8 }
 0x175   : > { %16632 = vst [vmem:[#allocation31_spill] sm:$0xff] %v16631_v23  ;;  %16635 = vst [vmem:[#allocation32_spill] sm:$0xff] %v16634_v60  ;;  %v390_v32 = vand.u32 15, %v358_v52  ;;  %v356_v14 = vadd.s32 72, %v13756_v45  ;;  %v3543_v61 = vshrl.u32 %v3524_v10, 16  ;;  %v13907_v12 = vadd.s32 104, %v13756_v45 }
 0x176   : > { %v13913_v52 = vadd.s32 152, %v13756_v45  ;;  %vm13930_vm1 = vcmp.lt.s32.totalorder %v384_v50, 15  ;;  %v16642_v50 = vsel %vm13782_vm4, %v13637_v33, 0.0  ;;  %v16647_v33 = vmov 0 }
 0x177   : > { %v388_v10 = vand.u32 15, %v356_v14  ;;  %v13964_v7 = vadd.s32 168, %v13756_v45 }
 0x179   : > { %vm13953_vm0 = vcmp.lt.s32.totalorder %v388_v10, 15 }
 0x17a   : > { %v16648_v33 = vsel %vm13953_vm0, 4294967295, %v16647_v33 }
 0x17b   : > { %16649 = vst [vmem:[#allocation36_spill] sm:$0xff] %v16648_v33 }
 0x1e9   : > { %v10734_v2 = vpop.f32.mrb[32].mxu1 }
 0x1ea   : > { %v3262_v39 = vadd.f32 %v10734_v2, %v3230_v43  ;;  %v10878_v30 = vpop.f32.mrb[32].mxu0  ;;  %v2014_v47 = vpop.f32.mrb[33].mxu1  ;;  %v13904_v2 = vadd.s32 120, %v13756_v45 }
 0x1eb   : > { %v3260_v26 = vadd.f32 %v3228_v11, %v2014_v47  ;;  %v3037_v48 = vpop.f32.mrb[33].mxu0  ;;  %v10735_v27 = vpop.f32.mrb[34].mxu1 }
 0x1ec   : > { %v3358_v51 = vadd.f32 %v10878_v30, %v3262_v39  ;;  %v3263_v4 = vadd.f32 %v13628_v57, %v10735_v27  ;;  %v10879_v41 = vpop.f32.mrb[34].mxu0  ;;  %v2017_v43 = vpop.f32.mrb[35].mxu1  ;;  %v13919_v30 = vadd.s32 136, %v13756_v45  ;;  %v394_v14 = vand.u32 15, %v13904_v2 }
 0x1ed   : > { %v3356_v29 = vadd.f32 %v3260_v26, %v3037_v48  ;;  %v3327_v47 = vsel %vm13887_vm3, %v10879_v41, 0.0  ;;  %v3261_v11 = vadd.f32 %v13632_v19, %v2017_v43  ;;  %v3040_v8 = vpop.f32.mrb[35].mxu0  ;;  %vm13926_vm3 = vcmp.lt.s32.totalorder %v386_v21, 15 }
 0x1ee   : > { %v3397_v57 = vadd.f32 %v13885_v22, %v3358_v51  ;;  %v3359_v27 = vadd.f32 %v3327_v47, %v3263_v4  ;;  %v3325_v39 = vsel %vm13897_vm2, %v3040_v8, 0.0  ;;  %v16636_v43 = vmov 0 }
 0x1ef   : > { %v3395_v48 = vadd.f32 %v13885_v22, %v3356_v29  ;;  %v3357_v26 = vadd.f32 %v3325_v39, %v3261_v11  ;;  %v16637_v43 = vsel %vm13926_vm3, 4294967295, %v16636_v43  ;;  %v16639_v51 = vmov 0 }
 0x1f0   : > { %v3398_v41 = vadd.f32 %v13885_v22, %v3359_v27  ;;  %16638 = vst [vmem:[#allocation33_spill] sm:$0xff] %v16637_v43  ;;  %v16640_v51 = vsel %vm13930_vm1, 4294967295, %v16639_v51  ;;  %v13934_v4 = vrot.slane %v3543_v61, 7  ;;  %v392_v11 = vand.u32 15, %v13907_v12 }
 0x1f1   : > { %16641 = vst [vmem:[#allocation34_spill] sm:$0xff] %v16640_v51  ;;  %v3396_v29 = vadd.f32 %v13885_v22, %v3357_v26  ;;  %v10738_v47 = vpop.f32.mrb[36].mxu1  ;;  %v3429_v27 = vmax.f32 %v3397_v57, 0.0  ;;  %vm13944_vm2 = vcmp.lt.s32.totalorder %v390_v32, 15  ;;  %v16643_v61 = vmov 0 }
 0x1f2   : > { %v3430_v21 = vmax.f32 %v3398_v41, 0.0  ;;  %v3266_v39 = vadd.f32 %v10738_v47, %v16642_v50  ;;  %v10882_v19 = vpop.f32.mrb[36].mxu0  ;;  %v2030_v60 = vpop.f32.mrb[37].mxu1  ;;  %v16644_v61 = vsel %vm13944_vm2, 4294967295, %v16643_v61  ;;  %v3427_v2 = vmax.f32 %v3395_v48, 0.0 }
 0x1f3   : > { %16645 = vst [vmem:[#allocation35_spill] sm:$0xff] %v16644_v61  ;;  %v3428_v23 = vmax.f32 %v3396_v29, 0.0  ;;  %v16646_v12 = vsel %vm13786_vm5, %v13640_v46, 0.0  ;;  %v3053_v41 = vpop.f32.mrb[37].mxu0  ;;  %v10739_v8 = vpop.f32.mrb[38].mxu1  ;;  %v13958_v32 = vadd.s32 184, %v13756_v45 }
 0x1f4   : > { %v3264_v57 = vadd.f32 %v16646_v12, %v2030_v60  ;;  %v13960_v47 = vpack.c.bf16 %v3430_v21, %v3429_v27  ;;  %v3362_v50 = vadd.f32 %v10882_v19, %v3266_v39  ;;  %v3267_v48 = vadd.f32 %v13644_v1, %v10739_v8  ;;  %v10883_v29 = vpop.f32.mrb[38].mxu0  ;;  %v2033_v26 = vpop.f32.mrb[39].mxu1 }
 0x1f5   : > { %v13966_v46 = vpack.c.bf16 %v3428_v23, %v3427_v2  ;;  %v3331_v10 = vsel %vm13926_vm3, %v10883_v29, 0.0  ;;  %v3265_v12 = vadd.f32 %v13648_v31, %v2033_v26  ;;  %v3056_v16 = vpop.f32.mrb[39].mxu0  ;;  %v12499_v23 = vld [vmem:[%s16336_s3 + $0x48] sm:$0xff]   ;;  %vm14012_vm3 = vcmp.lt.s32.totalorder %v392_v11, 15 }
 0x1f6   : > { %16650 = vst [vmem:[#allocation37_spill] sm:$0xff] %v13960_v47  ;;  %v3360_v60 = vadd.f32 %v3264_v57, %v3053_v41  ;;  %3476 = vst [vmem:[#allocation2 + $0x18] sm:$0xff] %v13960_v47  ;;  %v3401_v19 = vadd.f32 %v13885_v22, %v3362_v50  ;;  %v3363_v27 = vadd.f32 %v3331_v10, %v3267_v48  ;;  %v3329_v1 = vsel %vm13930_vm1, %v3056_v16, 0.0 }
 0x1f7   : > { %16651 = vst [vmem:[#allocation38_spill] sm:$0xff] %v13966_v46  ;;  %v3555_v8 = vshrl.u32 %v13960_v47, 16  ;;  %3475 = vst [vmem:[#allocation2 + $0x10] sm:$0xff] %v13966_v46  ;;  %v3361_v31 = vadd.f32 %v3329_v1, %v3265_v12  ;;  %11068 = vmatprep.mubr.bf16.mxu0 %v13966_v46  ;;  %v3558_v39 = vshll.u32 %v13960_v47, 16  ;;  %v16382_v26 = vshrl.u32 %v13966_v46, 16 }
 0x1f8   : > { %v3399_v21 = vadd.f32 %v13885_v22, %v3360_v60  ;;  %v3433_v2 = vmax.f32 %v3401_v19, 0.0  ;;  %v3402_v16 = vadd.f32 %v13885_v22, %v3363_v27  ;;  %11069 = vmatmul.mubr.bf16.vlgmr.msra.gmra.mrb[64].mxu0 %v13960_v47  ;;  %v16394_v60 = vshll.u32 %v13966_v46, 16 }
 0x1f9   : > { %v13986_v57 = vrot.slane %v3555_v8, 7  ;;  %v3400_v50 = vadd.f32 %v13885_v22, %v3361_v31  ;;  %v10742_v48 = vpop.f32.mrb[40].mxu1  ;;  %v3549_v29 = vrot.slane %v16382_v26, 7  ;;  %11101 = vmatpush3.bf16.msra.mxu0 %v13753_v42  ;;  %v13994_v10 = vrot.slane %v3558_v39, 1  ;;  %v12501_v42 = vld [vmem:[%s16336_s3 + $0x50] sm:$0xff]  }
 0x1fa   : > { %v3431_v12 = vmax.f32 %v3399_v21, 0.0  ;;  %v3434_v19 = vmax.f32 %v3402_v16, 0.0  ;;  %v16652_v27 = vsel %vm13791_vm6, %v13653_v56, 0.0  ;;  %v10886_v41 = vpop.f32.mrb[40].mxu0  ;;  %v2046_v51 = vpop.f32.mrb[41].mxu1  ;;  %vm14000_vm1 = vcmp.lt.s32.totalorder %v394_v14, 15  ;;  %11102 = vmatprep.subr.bf16.mxu0 %v12499_v23 }
 0x1fb   : > { %v3270_v1 = vadd.f32 %v10742_v48, %v16652_v27  ;;  %v16653_v31 = vmov 0  ;;  %v3560_v26 = vor.u32 %v3558_v39, %v13986_v57  ;;  %v3432_v21 = vmax.f32 %v3400_v50, 0.0  ;;  %v3069_v48 = vpop.f32.mrb[41].mxu0  ;;  %v10743_v27 = vpop.f32.mrb[42].mxu1 }
 0x1fc   : > { %v16654_v31 = vsel %vm14000_vm1, 4294967295, %v16653_v31  ;;  %v16656_v16 = vsel %vm13795_vm7, %v13656_v6, 0.0  ;;  %v16657_v14 = vmov 0  ;;  %v14018_v39 = vor.u32 %v16394_v60, %v3549_v29  ;;  %v10887_v6 = vpop.f32.mrb[42].mxu0 }
 0x1fd   : > { %16655 = vst [vmem:[#allocation39_spill] sm:$0xff] %v16654_v31  ;;  %v3268_v56 = vadd.f32 %v16656_v16, %v2046_v51  ;;  %v16658_v14 = vsel %vm14012_vm3, 4294967295, %v16657_v14  ;;  %v14021_v43 = vor.u32 %v13994_v10, %v3555_v8  ;;  %v14023_v49 = vpack.c.bf16 %v3434_v19, %v3433_v2  ;;  %v2049_v51 = vpop.f32.mrb[43].mxu1  ;;  %v3072_v17 = vpop.f32.mrb[43].mxu0  ;;  %11103 = vmatpush3.bf16.msra.mxu0 %v12499_v23  ;;  %v16749_v20 = vld [vmem:[#allocation37_spill] sm:$0xff] }
 0x1fe   : > { %16659 = vst [vmem:[#allocation40_spill] sm:$0xff] %v16658_v14  ;;  %v3366_v50 = vadd.f32 %v10886_v41, %v3270_v1  ;;  %v3271_v37 = vadd.f32 %v13660_v9, %v10743_v27  ;;  %v14027_v11 = vpack.c.bf16 %v3432_v21, %v3431_v12  ;;  %v3335_v46 = vsel %vm13944_vm2, %v10887_v6, 0.0  ;;  %v12495_v12 = vld [vmem:[%s16336_s3 + $0x8] sm:$0xff]   ;;  %11104 = vmatprep.subr.bf16.mxu0 %v12501_v42  ;;  %v16738_v28 = vld [vmem:[#allocation38_spill] sm:$0xff] }
 0x1ff   : > { %v3364_v47 = vadd.f32 %v3268_v56, %v3069_v48  ;;  %v3269_v60 = vadd.f32 %v13664_v54, %v2049_v51  ;;  %3478 = vst [vmem:[#allocation2 + $0x28] sm:$0xff] %v14023_v49  ;;  %v3333_v9 = vsel %vm13953_vm0, %v3072_v17, 0.0  ;;  %vm16660_vm7 = vsmask.f32 256  ;;  %v12502_v54 = vld [vmem:[%s16336_s3 + $0x58] sm:$0xff]   ;;  %v12496_v48 = vld [vmem:[%s16336_s3 + $0x10] sm:$0xff]  }
 0x200   : > { %v3405_v8 = vadd.f32 %v13885_v22, %v3366_v50  ;;  %v3367_v2 = vadd.f32 %v3335_v46, %v3271_v37  ;;  %v3553_v41 = vsel %vm16660_vm7, %v13934_v4, %v14018_v39  ;;  %3477 = vst [vmem:[#allocation2 + $0x20] sm:$0xff] %v14027_v11  ;;  %vm16661_vm0 = vmmov %vm16660_vm7  ;;  %11072 = vmatprep.mubr.bf16.mxu0 %v14027_v11  ;;  %v16401_v4 = vshrl.u32 %v14027_v11, 16 }
 0x201   : > { %v3403_v37 = vadd.f32 %v13885_v22, %v3364_v47  ;;  %v3365_v46 = vadd.f32 %v3333_v9, %v3269_v60  ;;  %10924 = vmatprep.mubr.bf16.mxu1 %v3553_v41  ;;  %v14048_v17 = vsel %vm16661_vm0, %v3549_v29, %v3560_v26  ;;  %11073 = vmatmul.mubr.bf16.gmra.mrb[68].mxu0 %v14023_v49  ;;  %v16400_v19 = vshrl.u32 %v14023_v49, 16  ;;  %v10746_v60 = vpop.f32.mrb[44].mxu1 }
 0x202   : > { %v3406_v23 = vadd.f32 %v13885_v22, %v3367_v2  ;;  %10925 = vmatmul.mubr.bf16.vlgmr.msra.gmra.mrb[64].mxu1 %v14048_v17  ;;  %v14057_v1 = vadd.s32 216, %v13756_v45  ;;  %v14060_v47 = vadd.s32 200, %v13756_v45  ;;  %v3437_v26 = vmax.f32 %v3405_v8, 0.0  ;;  %11105 = vmatpush3.bf16.msra.mxu0 %v12501_v42  ;;  %v10890_v51 = vpop.f32.mrb[44].mxu0  ;;  %v2062_v8 = vpop.f32.mrb[45].mxu1 }
 0x203   : > { %v3404_v29 = vadd.f32 %v13885_v22, %v3365_v46  ;;  %10957 = vmatpush3.bf16.msra.mxu1 %v13747_v44  ;;  %v3565_v21 = vrot.slane %v16401_v4, 7  ;;  %v16406_v56 = vshll.u32 %v14027_v11, 16  ;;  %v16662_v50 = vsel %vm13799_vm8, %v13669_v53, 0.0  ;;  %11106 = vmatprep.subr.bf16.mxu0 %v12502_v54  ;;  %v12504_v53 = vld [vmem:[%s16336_s3 + $0x60] sm:$0xff]  }
 0x204   : > { %v3438_v27 = vmax.f32 %v3406_v23, 0.0  ;;  %v3274_v6 = vadd.f32 %v10746_v60, %v16662_v50  ;;  %v16663_v44 = vand.u32 15, %v13913_v52  ;;  %v16664_v2 = vmov 0  ;;  %10958 = vmatprep.subr.bf16.mxu1 %v12495_v12  ;;  %v3085_v60 = vpop.f32.mrb[45].mxu0  ;;  %v10747_v50 = vpop.f32.mrb[46].mxu1 }
 0x205   : > { %v14082_v9 = vrot.slane %v16400_v19, 7  ;;  %v3435_v41 = vmax.f32 %v3403_v37, 0.0  ;;  %v3436_v46 = vmax.f32 %v3404_v29, 0.0  ;;  %v16667_v52 = vsel %vm13804_vm9, %v13672_v0, 0.0  ;;  %v10891_v42 = vpop.f32.mrb[46].mxu0  ;;  %v2065_v33 = vpop.f32.mrb[47].mxu1 }
 0x206   : > { %vm14076_vm0 = vcmp.lt.s32.totalorder %v16663_v44, 15  ;;  %v3272_v23 = vadd.f32 %v16667_v52, %v2062_v8  ;;  %v16668_v44 = vand.u32 15, %v13919_v30  ;;  %v16669_v19 = vmov 0  ;;  %11107 = vmatpush3.bf16.msra.mxu0 %v12502_v54 }
 0x207   : > { %v16665_v2 = vsel %vm14076_vm0, 4294967295, %v16664_v2  ;;  %v3568_v4 = vor.u32 %v16406_v56, %v3565_v21  ;;  %v14100_v16 = vpack.c.bf16 %v3438_v27, %v3437_v26  ;;  %v3370_v37 = vadd.f32 %v10890_v51, %v3274_v6  ;;  %v3088_v56 = vpop.f32.mrb[47].mxu0  ;;  %10959 = vmatpush3.bf16.msra.mxu1 %v12495_v12  ;;  %11108 = vmatprep.subr.bf16.mxu0 %v12504_v53 }
 0x208   : > { %16666 = vst [vmem:[#allocation41_spill] sm:$0xff] %v16665_v2  ;;  %vm14094_vm7 = vcmp.lt.s32.totalorder %v16668_v44, 15  ;;  %v3275_v29 = vadd.f32 %v13676_v62, %v10747_v50  ;;  %v16672_v0 = vshll.u32 %v14023_v49, 16  ;;  %v14106_v52 = vpack.c.bf16 %v3436_v46, %v3435_v41  ;;  %10960 = vmatprep.subr.bf16.mxu1 %v12496_v48  ;;  %v12500_v50 = vld [vmem:[%s16336_s3 + $0x20] sm:$0xff]   ;;  %v16709_v2 = vld [vmem:[#allocation11_spill] sm:$0xff] }
 0x209   : > { %v16670_v19 = vsel %vm14094_vm7, 4294967295, %v16669_v19  ;;  %v3368_v30 = vadd.f32 %v3272_v23, %v3085_v60  ;;  %v3339_v44 = vsel %vm14000_vm1, %v10891_v42, 0.0  ;;  %v3273_v61 = vadd.f32 %v13681_v34, %v2065_v33  ;;  %3480 = vst [vmem:[#allocation2 + $0x38] sm:$0xff] %v14100_v16  ;;  %v12497_v34 = vld [vmem:[%s16336_s3 + $0x18] sm:$0xff]   ;;  %v12505_v33 = vld [vmem:[%s16336_s3 + $0x68] sm:$0xff]   ;;  %v10750_v46 = vpop.f32.mrb[48].mxu1 }
 0x20a   : > { %16671 = vst [vmem:[#allocation42_spill] sm:$0xff] %v16670_v19  ;;  %v3576_v8 = vor.u32 %v16672_v0, %v14082_v9  ;;  %v3409_v62 = vadd.f32 %v13885_v22, %v3370_v37  ;;  %v3371_v26 = vadd.f32 %v3339_v44, %v3275_v29  ;;  %v3337_v27 = vsel %vm14012_vm3, %v3088_v56, 0.0  ;;  %3479 = vst [vmem:[#allocation2 + $0x30] sm:$0xff] %v14106_v52 }
 0x20b   : > { %vm16673_vm2 = vsmask.f32 256  ;;  %v3407_v12 = vadd.f32 %v13885_v22, %v3368_v30  ;;  %v3369_v54 = vadd.f32 %v3337_v27, %v3273_v61  ;;  %11076 = vmatprep.mubr.bf16.mxu0 %v14106_v52  ;;  %v16411_v51 = vshrl.u32 %v14100_v16, 16  ;;  %10961 = vmatpush3.bf16.msra.mxu1 %v12496_v48  ;;  %v2078_v30 = vpop.f32.mrb[49].mxu1 }
 0x20c   : > { %v14117_v6 = vsel %vm16673_vm2, %v13986_v57, %v3568_v4  ;;  %vm16674_vm3 = vmmov %vm16673_vm2  ;;  %v16412_v4 = vshrl.u32 %v14106_v52, 16  ;;  %v3410_v56 = vadd.f32 %v13885_v22, %v3371_v26  ;;  %11077 = vmatmul.mubr.bf16.gmra.mrb[72].mxu0 %v14100_v16  ;;  %v3441_v41 = vmax.f32 %v3409_v62, 0.0  ;;  %10962 = vmatprep.subr.bf16.mxu1 %v12497_v34 }
 0x20d   : > { %10928 = vmatprep.mubr.bf16.mxu1 %v14117_v6  ;;  %v14129_v57 = vsel %vm16674_vm3, %v3565_v21, %v3576_v8  ;;  %v3408_v21 = vadd.f32 %v13885_v22, %v3369_v54  ;;  %v16413_v60 = vshll.u32 %v14106_v52, 16  ;;  %11109 = vmatpush3.bf16.msra.mxu0 %v12504_v53  ;;  %v16675_v29 = vsel %vm13808_vm10, %v13685_v63, 0.0  ;;  %v10894_v8 = vpop.f32.mrb[48].mxu0  ;;  %v12507_v63 = vld [vmem:[%s16336_s3 + $0x70] sm:$0xff]  }
 0x20e   : > { %10929 = vmatmul.mubr.bf16.gmra.mrb[68].mxu1 %v14129_v57  ;;  %v3581_v23 = vrot.slane %v16412_v4, 7  ;;  %v3442_v37 = vmax.f32 %v3410_v56, 0.0  ;;  %v3278_v0 = vadd.f32 %v10750_v46, %v16675_v29  ;;  %v16676_v44 = vand.u32 15, %v13958_v32  ;;  %11110 = vmatprep.subr.bf16.mxu0 %v12505_v33  ;;  %v3101_v56 = vpop.f32.mrb[49].mxu0  ;;  %v10751_v46 = vpop.f32.mrb[50].mxu1 }
 0x20f   : > { %v16677_v62 = vmov 0  ;;  %v14158_v48 = vrot.slane %v16411_v51, 7  ;;  %v16420_v53 = vshll.u32 %v14100_v16, 16  ;;  %v3439_v26 = vmax.f32 %v3407_v12, 0.0  ;;  %v10895_v61 = vpop.f32.mrb[50].mxu0  ;;  %v2081_v42 = vpop.f32.mrb[51].mxu1  ;;  %10963 = vmatpush3.bf16.msra.mxu1 %v12497_v34 }
 0x210   : > { %vm14152_vm2 = vcmp.lt.s32.totalorder %v16676_v44, 15  ;;  %v3440_v27 = vmax.f32 %v3408_v21, 0.0  ;;  %v16680_v32 = vsel %vm13812_vm11, %v13687_v38, 0.0  ;;  %v16681_v29 = vand.u32 15, %v13964_v7  ;;  %10964 = vmatprep.subr.bf16.mxu1 %v12500_v50  ;;  %v12508_v34 = vld [vmem:[%s16336_s3 + $0x78] sm:$0xff]  }
 0x211   : > { %v16678_v62 = vsel %vm14152_vm2, 4294967295, %v16677_v62  ;;  %v3276_v54 = vadd.f32 %v16680_v32, %v2078_v30  ;;  %v16682_v44 = vmov 0  ;;  %v3584_v51 = vor.u32 %v16413_v60, %v3581_v23  ;;  %v3104_v60 = vpop.f32.mrb[51].mxu0  ;;  %11111 = vmatpush3.bf16.msra.mxu0 %v12505_v33 }
 0x212   : > { %16679 = vst [vmem:[#allocation43_spill] sm:$0xff] %v16678_v62  ;;  %vm14170_vm3 = vcmp.lt.s32.totalorder %v16681_v29, 15  ;;  %v14176_v4 = vpack.c.bf16 %v3442_v37, %v3441_v41  ;;  %v3374_v12 = vadd.f32 %v10894_v8, %v3278_v0  ;;  %v3279_v21 = vadd.f32 %v13691_v35, %v10751_v46  ;;  %11112 = vmatprep.subr.bf16.mxu0 %v12507_v63 }
 0x213   : > { %v16683_v44 = vsel %vm14170_vm3, 4294967295, %v16682_v44  ;;  %v3592_v38 = vor.u32 %v16420_v53, %v14158_v48  ;;  %v14182_v30 = vpack.c.bf16 %v3440_v27, %v3439_v26  ;;  %v3372_v7 = vadd.f32 %v3276_v54, %v3101_v56  ;;  %v10754_v54 = vpop.f32.mrb[52].mxu1  ;;  %10965 = vmatpush3.bf16.msra.mxu1 %v12500_v50 }
 0x214   : > { %16684 = vst [vmem:[#allocation44_spill] sm:$0xff] %v16683_v44  ;;  %v3343_v32 = vsel %vm14076_vm0, %v10895_v61, 0.0  ;;  %v3277_v29 = vadd.f32 %v13693_v13, %v2081_v42  ;;  %3482 = vst [vmem:[#allocation2 + $0x48] sm:$0xff] %v14176_v4  ;;  %v3413_v35 = vadd.f32 %v13885_v22, %v3374_v12  ;;  %v3341_v37 = vsel %vm14094_vm7, %v3104_v60, 0.0  ;;  %v12503_v13 = vld [vmem:[%s16336_s3 + $0x28] sm:$0xff]   ;;  %v12506_v12 = vld [vmem:[%s16336_s3 + $0x30] sm:$0xff]  }
 0x215   : > { %v3375_v41 = vadd.f32 %v3343_v32, %v3279_v21  ;;  %vm16685_vm1 = vsmask.f32 256  ;;  %3481 = vst [vmem:[#allocation2 + $0x40] sm:$0xff] %v14182_v30  ;;  %v3411_v33 = vadd.f32 %v13885_v22, %v3372_v7  ;;  %11080 = vmatprep.mubr.bf16.mxu0 %v14182_v30  ;;  %v16418_v60 = vshrl.u32 %v14176_v4, 16  ;;  %11113 = vmatpush3.bf16.msra.mxu0 %v12507_v63  ;;  %v10898_v7 = vpop.f32.mrb[52].mxu0  ;;  %v2094_v32 = vpop.f32.mrb[53].mxu1 }
 0x216   : > { %v14193_v0 = vsel %vm16685_vm1, %v14082_v9, %v3584_v51  ;;  %v3373_v42 = vadd.f32 %v3341_v37, %v3277_v29  ;;  %vm16686_vm7 = vmmov %vm16685_vm1  ;;  %v16419_v51 = vshrl.u32 %v14182_v30, 16  ;;  %11081 = vmatmul.mubr.bf16.gmra.mrb[76].mxu0 %v14176_v4  ;;  %v14214_v8 = vadd.s32 248, %v13756_v45  ;;  %10966 = vmatprep.subr.bf16.mxu1 %v12503_v13 }
 0x217   : > { %10932 = vmatprep.mubr.bf16.mxu1 %v14193_v0  ;;  %v14205_v9 = vsel %vm16686_vm7, %v3581_v23, %v3592_v38  ;;  %v3414_v61 = vadd.f32 %v13885_v22, %v3375_v41  ;;  %v14217_v26 = vadd.s32 232, %v13756_v45  ;;  %v3445_v23 = vmax.f32 %v3413_v35, 0.0  ;;  %11114 = vmatprep.subr.bf16.mxu0 %v12508_v34 }
 0x218   : > { %10933 = vmatmul.mubr.bf16.gmra.mrb[72].mxu1 %v14205_v9  ;;  %v3412_v27 = vadd.f32 %v13885_v22, %v3373_v42  ;;  %v3597_v56 = vrot.slane %v16419_v51, 7  ;;  %v16423_v46 = vshll.u32 %v14182_v30, 16  ;;  %v16687_v45 = vsel %vm13816_vm12, %v13696_v55, 0.0  ;;  %v14244_v55 = vld [vmem:[%s16336_s3 + $0x1c0] sm:$0xff]  }
 0x219   : > { %v3446_v21 = vmax.f32 %v3414_v61, 0.0  ;;  %v3282_v38 = vadd.f32 %v10754_v54, %v16687_v45  ;;  %v16688_v29 = vand.u32 15, %v14057_v1  ;;  %v16689_v35 = vmov 0  ;;  %v3117_v61 = vpop.f32.mrb[53].mxu0  ;;  %v10755_v54 = vpop.f32.mrb[54].mxu1  ;;  %10967 = vmatpush3.bf16.msra.mxu1 %v12503_v13  ;;  %11115 = vmatpush3.bf16.msra.mxu0 %v12508_v34 }
 0x21a   : > { %v14238_v50 = vrot.slane %v16418_v60, 7  ;;  %v3443_v41 = vmax.f32 %v3411_v33, 0.0  ;;  %v3444_v37 = vmax.f32 %v3412_v27, 0.0  ;;  %v16692_v1 = vsel %vm13820_vm13, %v13698_v5, 0.0  ;;  %v10899_v53 = vpop.f32.mrb[54].mxu0  ;;  %v2097_v63 = vpop.f32.mrb[55].mxu1  ;;  %10968 = vmatprep.subr.bf16.mxu1 %v12506_v12  ;;  %11148 = vmatprep.subr.bf16.mxu0 %v14244_v55 }
 0x21b   : > { %vm14232_vm1 = vcmp.lt.s32.totalorder %v16688_v29, 15  ;;  %v3280_v42 = vadd.f32 %v16692_v1, %v2094_v32  ;;  %v16693_v45 = vand.u32 15, %v14060_v47  ;;  %v16694_v29 = vmov 0  ;;  %v14485_v36 = vld [vmem:[#allocation2 + $0x48] sm:$0xff] }
 0x21c   : > { %v16690_v35 = vsel %vm14232_vm1, 4294967295, %v16689_v35  ;;  %v3600_v60 = vor.u32 %v16423_v46, %v3597_v56  ;;  %v14258_v51 = vpack.c.bf16 %v3446_v21, %v3445_v23  ;;  %v3378_v33 = vadd.f32 %v10898_v7, %v3282_v38  ;;  %v3120_v46 = vpop.f32.mrb[55].mxu0 }
 0x21d   : > { %16691 = vst [vmem:[#allocation45_spill] sm:$0xff] %v16690_v35  ;;  %vm14252_vm7 = vcmp.lt.s32.totalorder %v16693_v45, 15  ;;  %v3283_v27 = vadd.f32 %v13700_v59, %v10755_v54  ;;  %v16697_v5 = vshll.u32 %v14176_v4, 16  ;;  %v14264_v1 = vpack.c.bf16 %v3444_v37, %v3443_v41  ;;  %v10758_v41 = vpop.f32.mrb[56].mxu1  ;;  %10969 = vmatpush3.bf16.msra.mxu1 %v12506_v12  ;;  %v16701_v54 = vld [vmem:[#allocation8_spill] sm:$0xff]  ;;  %v16725_v35 = vld [vmem:[#allocation13_spill] sm:$0xff] }
 0x21e   : > { %v16695_v29 = vsel %vm14252_vm7, 4294967295, %v16694_v29  ;;  %v3376_v47 = vadd.f32 %v3280_v42, %v3117_v61  ;;  %v3347_v45 = vsel %vm14152_vm2, %v10899_v53, 0.0  ;;  %v3281_v19 = vadd.f32 %v13702_v58, %v2097_v63  ;;  %3484 = vst [vmem:[#allocation2 + $0x58] sm:$0xff] %v14258_v51  ;;  %v12509_v58 = vld [vmem:[%s16336_s3 + $0x38] sm:$0xff]  }
 0x21f   : > { %16696 = vst [vmem:[#allocation46_spill] sm:$0xff] %v16695_v29  ;;  %v3608_v32 = vor.u32 %v16697_v5, %v14238_v50  ;;  %v3417_v59 = vadd.f32 %v13885_v22, %v3378_v33  ;;  %v3379_v23 = vadd.f32 %v3347_v45, %v3283_v27  ;;  %v3345_v21 = vsel %vm14170_vm3, %v3120_v46, 0.0  ;;  %3483 = vst [vmem:[#allocation2 + $0x50] sm:$0xff] %v14264_v1  ;;  %v2110_v27 = vpop.f32.mrb[57].mxu1 }
 0x220   : > { %vm16698_vm0 = vsmask.f32 256  ;;  %v3415_v53 = vadd.f32 %v13885_v22, %v3376_v47  ;;  %v3377_v13 = vadd.f32 %v3345_v21, %v3281_v19  ;;  %11084 = vmatprep.mubr.bf16.mxu0 %v14264_v1  ;;  %v410_v46 = vand.u32 15, %v14214_v8  ;;  %10970 = vmatprep.subr.bf16.mxu1 %v12509_v58  ;;  %v14313_v47 = vld [vmem:[%s16336_s3 + $0x180] sm:$0xff]  }
 0x221   : > { %v14275_v38 = vsel %vm16698_vm0, %v14158_v48, %v3600_v60  ;;  %vm16699_vm2 = vmmov %vm16698_vm0  ;;  %v16429_v48 = vshrl.u32 %v14264_v1, 16  ;;  %v3418_v60 = vadd.f32 %v13885_v22, %v3379_v23  ;;  %11085 = vmatmul.mubr.bf16.gmra.mrb[80].mxu0 %v14258_v51  ;;  %v408_v7 = vand.u32 15, %v14217_v26  ;;  %v10902_v26 = vpop.f32.mrb[56].mxu0  ;;  %v16704_v23 = vld [vmem:[#allocation9_spill] sm:$0xff]  ;;  %10971 = vmatpush3.bf16.msra.mxu1 %v12509_v58 }
 0x222   : > { %10936 = vmatprep.mubr.bf16.mxu1 %v14275_v38  ;;  %v14285_v34 = vsel %vm16699_vm2, %v3597_v56, %v3608_v32  ;;  %v16428_v19 = vshrl.u32 %v14258_v51, 16  ;;  %v3449_v63 = vmax.f32 %v3417_v59, 0.0  ;;  %v3416_v56 = vadd.f32 %v13885_v22, %v3377_v13  ;;  %11004 = vmatprep.subr.bf16.mxu1 %v14313_v47  ;;  %vm16710_vm2 = vmmov %vm16698_vm0 }
 0x223   : > { %10937 = vmatmul.mubr.bf16.gmra.mrb[76].mxu1 %v14285_v34  ;;  %v14298_v37 = vrot.slane %v16429_v48, 7  ;;  %v16436_v42 = vshll.u32 %v14264_v1, 16  ;;  %v3450_v61 = vmax.f32 %v3418_v60, 0.0  ;;  %v16702_v8 = vsel %vm13824_vm14, %v16701_v54, 0.0  ;;  %v3133_v60 = vpop.f32.mrb[57].mxu0  ;;  %v16707_v48 = vld [vmem:[#allocation10_spill] sm:$0xff] }
 0x224   : > { %v3286_v33 = vadd.f32 %v10758_v41, %v16702_v8  ;;  %v14307_v5 = vrot.slane %v16428_v19, 7  ;;  %v3447_v12 = vmax.f32 %v3415_v53, 0.0  ;;  %v3448_v45 = vmax.f32 %v3416_v56, 0.0  ;;  %v10759_v41 = vpop.f32.mrb[58].mxu1  ;;  %v10903_v44 = vpop.f32.mrb[58].mxu0 }
 0x225   : > { %16700 = vst [vmem:[#allocation47_spill] sm:$0xff] %v14298_v37  ;;  %v16705_v21 = vsel %vm13828_vm15, %v16704_v23, 0.0  ;;  %v14322_v54 = vor.u32 %v16436_v42, %v14298_v37  ;;  %v14324_v8 = vpack.c.bf16 %v3450_v61, %v3449_v63  ;;  %v3287_v32 = vadd.f32 %v16707_v48, %v10759_v41  ;;  %v2113_v53 = vpop.f32.mrb[59].mxu1  ;;  %v3136_v14 = vpop.f32.mrb[59].mxu0 }
 0x226   : > { %v3284_v13 = vadd.f32 %v16705_v21, %v2110_v27  ;;  %v3382_v19 = vadd.f32 %v10902_v26, %v3286_v33  ;;  %v16708_v56 = vshll.u32 %v14258_v51, 16  ;;  %v14330_v23 = vpack.c.bf16 %v3448_v45, %v3447_v12  ;;  %v10762_v12 = vpop.f32.mrb[60].mxu1 }
 0x227   : > { %16706 = vst [vmem:[#allocation8_spill] sm:$0xff] %v14322_v54  ;;  %v3351_v21 = vsel %vm14232_vm1, %v10903_v44, 0.0  ;;  %v3285_v42 = vadd.f32 %v16709_v2, %v2113_v53  ;;  %3486 = vst [vmem:[#allocation2 + $0x68] sm:$0xff] %v14324_v8  ;;  %v3349_v61 = vsel %vm14252_vm7, %v3136_v14, 0.0  ;;  %v14342_v33 = vsel %vm16698_vm0, %v14238_v50, %v14322_v54  ;;  %v10906_v53 = vpop.f32.mrb[60].mxu0 }
 0x228   : > { %v3624_v62 = vor.u32 %v16708_v56, %v14307_v5  ;;  %v3380_v27 = vadd.f32 %v3284_v13, %v3133_v60  ;;  %v3421_v48 = vadd.f32 %v13885_v22, %v3382_v19  ;;  %v3383_v63 = vadd.f32 %v3351_v21, %v3287_v32  ;;  %3485 = vst [vmem:[#allocation2 + $0x60] sm:$0xff] %v14330_v23  ;;  %v2126_v56 = vpop.f32.mrb[61].mxu1 }
 0x229   : > { %v3381_v44 = vadd.f32 %v3349_v61, %v3285_v42  ;;  %10940 = vmatprep.mubr.bf16.mxu1 %v14342_v33  ;;  %11088 = vmatprep.mubr.bf16.mxu0 %v14330_v23  ;;  %v16443_v14 = vshrl.u32 %v14330_v23, 16  ;;  %vm14355_vm0 = vcmp.lt.s32.totalorder %v410_v46, 15  ;;  %v16711_v19 = vmov 0  ;;  %v16721_v61 = vld [vmem:[#allocation12_spill] sm:$0xff]  ;;  %v10763_v45 = vpop.f32.mrb[62].mxu1 }
 0x22a   : > { %v3419_v2 = vadd.f32 %v13885_v22, %v3380_v27  ;;  %v14350_v58 = vsel %vm16710_vm2, %v14298_v37, %v3624_v62  ;;  %v3422_v50 = vadd.f32 %v13885_v22, %v3383_v63  ;;  %v16712_v19 = vsel %vm14355_vm0, 4294967295, %v16711_v19  ;;  %11089 = vmatmul.mubr.bf16.gmra.mrb[84].mxu0 %v14324_v8  ;;  %v2129_v21 = vpop.f32.mrb[63].mxu1 }
 0x22b   : > { %16713 = vst [vmem:[#allocation9_spill] sm:$0xff] %v16712_v19  ;;  %vm14359_vm7 = vcmp.lt.s32.totalorder %v408_v7, 15  ;;  %v16714_v26 = vmov 0  ;;  %10941 = vmatmul.mubr.bf16.gmra.mrb[80].mxu1 %v14350_v58  ;;  %v16448_v62 = vshrl.u32 %v14324_v8, 16  ;;  %v3453_v42 = vmax.f32 %v3421_v48, 0.0  ;;  %v16717_v7 = vld [vmem:[#allocation29_spill] sm:$0xff] }
 0x22c   : > { %v16715_v26 = vsel %vm14359_vm7, 4294967295, %v16714_v26  ;;  %v3420_v32 = vadd.f32 %v13885_v22, %v3381_v44  ;;  %v3629_v46 = vrot.slane %v16443_v14, 7  ;;  %v3454_v13 = vmax.f32 %v3422_v50, 0.0  ;;  %v3149_v50 = vpop.f32.mrb[61].mxu0 }
 0x22d   : > { %16716 = vst [vmem:[#allocation10_spill] sm:$0xff] %v16715_v26  ;;  %vm16718_vm2 = vnez %v16717_v7  ;;  %v3637_v27 = vrot.slane %v16448_v62, 7  ;;  %v3451_v48 = vmax.f32 %v3419_v2, 0.0  ;;  %vm16720_vm1 = vnez %v16628_v15  ;;  %v10907_v31 = vpop.f32.mrb[62].mxu0  ;;  %v14511_v26 = vld [vmem:[#allocation2 + $0x58] sm:$0xff] }
 0x22e   : > { %v16719_v60 = vsel %vm16718_vm2, %v13712_v3, 0.0  ;;  %v3452_v63 = vmax.f32 %v3420_v32, 0.0  ;;  %v16722_v44 = vsel %vm16720_vm1, %v16721_v61, 0.0  ;;  %v16723_v29 = vshll.u32 %v14330_v23, 16  ;;  %16743 = vst [vmem:[#allocation38_spill] sm:$0xff] %v14511_v26 }
 0x22f   : > { %v3290_v41 = vadd.f32 %v10762_v12, %v16719_v60  ;;  %v3288_v14 = vadd.f32 %v16722_v44, %v2126_v56  ;;  %v14385_v12 = vpack.c.bf16 %v3454_v13, %v3453_v42  ;;  %v3291_v62 = vadd.f32 %v16725_v35, %v10763_v45  ;;  %v16727_v44 = vld [vmem:[#allocation14_spill] sm:$0xff] }
 0x230   : > { %v14383_v3 = vor.u32 %v16723_v29, %v3629_v46  ;;  %v16726_v2 = vshll.u32 %v14324_v8, 16  ;;  %v14390_v15 = vpack.c.bf16 %v3452_v63, %v3451_v48  ;;  %v3355_v56 = vsel %vm14355_vm0, %v10907_v31, 0.0  ;;  %v3152_v29 = vpop.f32.mrb[63].mxu0 }
 0x231   : > { %v3386_v60 = vadd.f32 %v10906_v53, %v3290_v41  ;;  %v3384_v61 = vadd.f32 %v3288_v14, %v3149_v50  ;;  %v3289_v7 = vadd.f32 %v16727_v44, %v2129_v21  ;;  %3488 = vst [vmem:[#allocation2 + $0x78] sm:$0xff] %v14385_v12  ;;  %v3387_v13 = vadd.f32 %v3355_v56, %v3291_v62  ;;  %v3491_v21 = vld [vmem:[#allocation2] sm:$0x80] }
 0x232   : > { %16724 = vst [vmem:[#allocation11_spill] sm:$0xff] %v14383_v3  ;;  %v3640_v32 = vor.u32 %v16726_v2, %v3637_v27  ;;  %v3353_v35 = vsel %vm14359_vm7, %v3152_v29, 0.0  ;;  %vm16728_vm3 = vsmask.f32 256  ;;  %3487 = vst [vmem:[#allocation2 + $0x70] sm:$0xff] %v14390_v15  ;;  %11092 = vmatprep.mubr.bf16.mxu0 %v14390_v15  ;;  %v16459_v62 = vshrl.u32 %v14390_v15, 16 }
 0x233   : > { %v3425_v42 = vadd.f32 %v13885_v22, %v3386_v60  ;;  %v14402_v45 = vsel %vm16728_vm3, %v14307_v5, %v14383_v3  ;;  %v3423_v31 = vadd.f32 %v13885_v22, %v3384_v61  ;;  %v3385_v14 = vadd.f32 %v3353_v35, %v3289_v7  ;;  %vm16729_vm0 = vmmov %vm16728_vm3  ;;  %11093 = vmatmul.mubr.bf16.gmra.mrb[88].mxu0 %v14385_v12 }
 0x234   : > { %10944 = vmatprep.mubr.bf16.mxu1 %v14402_v45  ;;  %v14408_v41 = vsel %vm16729_vm0, %v3629_v46, %v3640_v32  ;;  %v3426_v53 = vadd.f32 %v13885_v22, %v3387_v13  ;;  %v16458_v5 = vshrl.u32 %v14385_v12, 16  ;;  %v3645_v48 = vrot.slane %v16459_v62, 7  ;;  %vm16730_vm3 = vmmov %vm16729_vm0  ;;  %v14470_v62 = vld [vmem:[#allocation2 + $0x38] sm:$0xff] }
 0x235   : > { %10945 = vmatmul.mubr.bf16.gmra.mrb[84].mxu1 %v14408_v41  ;;  %v3424_v7 = vadd.f32 %v13885_v22, %v3385_v14  ;;  %v16462_v46 = vshll.u32 %v14390_v15, 16  ;;  %v3457_v63 = vmax.f32 %v3425_v42, 0.0  ;;  %v16460_v2 = vshll.u32 %v14385_v12, 16  ;;  %vm16740_vm7 = vmmov %vm16729_vm0 }
 0x236   : > { %v3458_v50 = vmax.f32 %v3426_v53, 0.0  ;;  %v3653_v60 = vrot.slane %v16458_v5, 7  ;;  %v3455_v32 = vmax.f32 %v3423_v31, 0.0  ;;  %v3900_v44 = vshrl.u32 %v3491_v21, 16  ;;  %v16731_v53 = vld [vmem:[#allocation6_spill] sm:$0xff]  ;;  %v14468_v5 = vld [vmem:[#allocation2 + $0x30] sm:$0xff] }
 0x237   : > { %v3456_v61 = vmax.f32 %v3424_v7, 0.0  ;;  %v3648_v56 = vor.u32 %v16462_v46, %v3645_v48  ;;  %v16732_v21 = vshrl.u32 %v16731_v53, 16  ;;  %v16739_v25 = vshll.u32 %v16738_v28, 16 }
 0x238   : > { %v14425_v29 = vpack.c.bf16 %v3458_v50, %v3457_v63  ;;  %v3656_v22 = vor.u32 %v16460_v2, %v3653_v60  ;;  %v14451_v50 = vld [vmem:[#allocation2 + $0x18] sm:$0xff]  ;;  %v14472_v2 = vld [vmem:[#allocation2 + $0x40] sm:$0xff]  ;;  %v16773_v3 = vshll.u32 %v14264_v1, 16 }
 0x239   : > { %v14429_v13 = vpack.c.bf16 %v3456_v61, %v3455_v32  ;;  %v14432_v42 = vsel %vm16730_vm3, %v3637_v27, %v3648_v56  ;;  %v3906_v7 = vrot.slane %v16732_v21, 7  ;;  %v3902_v27 = vrot.slane %v3900_v44, 7  ;;  %v14464_v21 = vld [vmem:[#allocation2 + $0x20] sm:$0xff]  ;;  %vm16737_vm3 = vmmov %vm16729_vm0 }
 0x23a   : > { %3490 = vst [vmem:[#allocation2 + $0x88] sm:$0xff] %v14425_v29  ;;  %10948 = vmatprep.mubr.bf16.mxu1 %v14432_v42  ;;  %v16457_v35 = vshrl.u32 %v14425_v29, 16  ;;  %v14439_v31 = vsel %vm16729_vm0, %v3645_v48, %v3656_v22  ;;  %v16478_v48 = vshll.u32 %v14425_v29, 16  ;;  %v16734_v56 = vshll.u32 %v16731_v53, 16  ;;  %v14461_v22 = vld [vmem:[#allocation2 + $0x8] sm:$0xff] }
 0x23b   : > { %3489 = vst [vmem:[#allocation2 + $0x80] sm:$0xff] %v14429_v13  ;;  %11096 = vmatprep.mubr.bf16.mxu0 %v14429_v13  ;;  %v16461_v14 = vshrl.u32 %v14429_v13, 16  ;;  %v16473_v61 = vshll.u32 %v14429_v13, 16  ;;  %16736 = vst [vmem:[#allocation14_spill] sm:$0xff] %v14461_v22  ;;  %v16750_v24 = vshrl.u32 %v14451_v50, 16 }
 0x23c   : > { %v14448_v63 = vrot.slane %v16457_v35, 7  ;;  %11097 = vmatmul.mubr.bf16.gmra.mrb[92].mxu0 %v14425_v29  ;;  %v14459_v44 = vor.u32 %v3906_v7, %v16734_v56  ;;  %v14466_v35 = vld [vmem:[#allocation2 + $0x28] sm:$0xff] }
 0x23d   : > { %10949 = vmatmul.mubr.bf16.gmra.mrb[88].mxu1 %v14439_v31  ;;  %v3661_v32 = vrot.slane %v16461_v14, 7  ;;  %11116 = vmatprep.mubr.bf16.mxu0 %v14461_v22  ;;  %v16747_v46 = vshll.u32 %v14466_v35, 16 }
 0x23e   : > { %16733 = vst [vmem:[#allocation12_spill] sm:$0xff] %v14448_v63  ;;  %16735 = vst [vmem:[#allocation13_spill] sm:$0xff] %v14459_v44  ;;  %v3672_v53 = vor.u32 %v16478_v48, %v14448_v63  ;;  %v3910_v56 = vsel %vm16737_vm3, %v3902_v27, %v14459_v44  ;;  %v3911_v27 = vsel %vm16740_vm7, %v3906_v7, %v14018_v39  ;;  %v12515_v39 = vld [vmem:[%s16336_s3 + $0x1c8] sm:$0xff]   ;;  %v16744_v48 = vshll.u32 %v14451_v50, 16 }
 0x23f   : > { %v3664_v14 = vor.u32 %v16473_v61, %v3661_v32  ;;  %v14489_v61 = vrot.slane %v16739_v25, 1  ;;  %vm16741_vm3 = vmmov %vm16729_vm0  ;;  %v16748_v7 = vshll.u32 %v14468_v5, 16  ;;  %vm16756_vm7 = vsmask.f32 7424 }
 0x240   : > { %v14515_v19 = vrot.slane %v16744_v48, 1 }
 0x241   : > { %v14492_v40 = vsel %vm16729_vm0, %v3653_v60, %v3664_v14  ;;  %v14504_v60 = vsel %vm16741_vm3, %v3661_v32, %v3672_v53  ;;  %v16746_v53 = vshll.u32 %v14464_v21, 16  ;;  %v5301_v14 = vrot.slane %v16747_v46, 1  ;;  %vm16761_vm0 = vmmov %vm16756_vm7 }
 0x242   : > { %10952 = vmatprep.mubr.bf16.mxu1 %v14492_v40  ;;  %16742 = vst [vmem:[#allocation6_spill] sm:$0xff] %v14504_v60  ;;  %16745 = vst [vmem:[#allocation48_spill] sm:$0xff] %v14515_v19  ;;  %v5304_v59 = vrot.slane %v16748_v7, 1  ;;  %v5297_v18 = vor.u32 %v14515_v19, %v16750_v24  ;;  %v16751_v32 = vshll.u32 %v14470_v62, 16  ;;  %v16753_v7 = vshrl.u32 %v14464_v21, 16  ;;  %v12517_v24 = vld [vmem:[%s16336_s3 + $0x1d0] sm:$0xff]  }
 0x243   : > { %v5298_v25 = vrot.slane %v16746_v53, 1  ;;  %v16752_v53 = vshll.u32 %v14472_v2, 16  ;;  %v16759_v46 = vshrl.u32 %v14472_v2, 16  ;;  %v16760_v19 = vshll.u32 %v14485_v36, 16  ;;  %vm16763_vm3 = vmmov %vm16761_vm0 }
 0x244   : > { %11117 = vmatmul.mubr.bf16.vlgmr.msra.gmra.mrb[64].mxu0 %v16738_v28  ;;  %v5307_v63 = vrot.slane %v16751_v32, 1  ;;  %vm16765_vm1 = vmmov %vm16761_vm0 }
 0x245   : > { %10953 = vmatmul.mubr.bf16.gmra.mrb[92].mxu1 %v14504_v60  ;;  %11120 = vmatprep.mubr.bf16.mxu0 %v16749_v20  ;;  %v5310_v44 = vrot.slane %v16752_v53, 1  ;;  %v5300_v20 = vor.u32 %v5298_v25, %v16753_v7  ;;  %v16755_v60 = vshrl.u32 %v14468_v5, 16  ;;  %v14547_v32 = vsel %vm16756_vm7, %v5297_v18, %v5298_v25  ;;  %vm16767_vm7 = vmmov %vm16761_vm0 }
 0x246   : > { %10972 = vmatprep.mubr.bf16.mxu1 %v3910_v56  ;;  %11149 = vmatpush3.bf16.msra.mxu0 %v14244_v55  ;;  %v16754_v56 = vshrl.u32 %v14466_v35, 16  ;;  %16757 = vst [vmem:[#allocation37_spill] sm:$0xff] %v14547_v32  ;;  %v16758_v55 = vshrl.u32 %v14470_v62, 16  ;;  %vm16769_vm2 = vmmov %vm16761_vm0 }
 0x247   : > { %v5306_v22 = vor.u32 %v5304_v59, %v16755_v60  ;;  %11150 = vmatprep.subr.bf16.mxu0 %v12515_v39  ;;  %v5312_v7 = vor.u32 %v5310_v44, %v16759_v46  ;;  %v14557_v60 = vsel %vm16761_vm0, %v5300_v20, %v5301_v14  ;;  %v16771_v46 = vshrl.u32 %v14485_v36, 16 }
 0x248   : > { %v5303_v48 = vor.u32 %v5301_v14, %v16754_v56  ;;  %v5309_v53 = vor.u32 %v5307_v63, %v16758_v55  ;;  %v5313_v56 = vrot.slane %v16760_v19, 1  ;;  %16762 = vst [vmem:[#allocation49_spill] sm:$0xff] %v14557_v60  ;;  %v14577_v14 = vrot.slane %v16773_v3, 1 }
 0x249   : > { %v14563_v18 = vsel %vm16765_vm1, %v5306_v22, %v5307_v63  ;;  %v16774_v63 = vshll.u32 %v14511_v26, 16  ;;  %v16776_v22 = vshll.u32 %v14330_v23, 16  ;;  %v16777_v20 = vshll.u32 %v14324_v8, 16  ;;  %vm16779_vm1 = vmmov %vm16761_vm0 }
 0x24a   : > { %v14560_v37 = vsel %vm16763_vm3, %v5303_v48, %v5304_v59  ;;  %16766 = vst [vmem:[#allocation51_spill] sm:$0xff] %v14563_v18  ;;  %v14566_v25 = vsel %vm16767_vm7, %v5309_v53, %v5310_v44  ;;  %v14569_v55 = vsel %vm16769_vm2, %v5312_v7, %v5313_v56  ;;  %v14573_v19 = vor.u32 %v5313_v56, %v16771_v46  ;;  %v12511_v59 = vld [vmem:[%s16336_s3 + $0x188] sm:$0xff]   ;;  %vm16789_vm2 = vmmov %vm16761_vm0 }
 0x24b   : > { %16764 = vst [vmem:[#allocation50_spill] sm:$0xff] %v14560_v37  ;;  %16768 = vst [vmem:[#allocation52_spill] sm:$0xff] %v14566_v25  ;;  %11151 = vmatpush3.bf16.msra.mxu0 %v12515_v39  ;;  %v14584_v44 = vrot.slane %v16774_v63, 1  ;;  %v14588_v48 = vrot.slane %v16776_v22, 1  ;;  %v5325_v53 = vrot.slane %v16777_v20, 1  ;;  %v16778_v7 = vshll.u32 %v14390_v15, 16 }
 0x24c   : > { %16770 = vst [vmem:[#allocation53_spill] sm:$0xff] %v14569_v55  ;;  %16772 = vst [vmem:[#allocation54_spill] sm:$0xff] %v14573_v19  ;;  %11152 = vmatprep.subr.bf16.mxu0 %v12517_v24  ;;  %v14597_v56 = vsel %vm16779_vm1, %v14573_v19, %v14577_v14  ;;  %v16781_v39 = vshrl.u32 %v14264_v1, 16  ;;  %v16782_v63 = vshll.u32 %v14385_v12, 16  ;;  %v16783_v55 = vshll.u32 %v14429_v13, 16  ;;  %11121 = vmatmul.mubr.bf16.gmra.mrb[68].mxu0 %v14027_v11 }
 0x24d   : > { %16775 = vst [vmem:[#allocation55_spill] sm:$0xff] %v14584_v44  ;;  %v5328_v3 = vrot.slane %v16778_v7, 1  ;;  %16780 = vst [vmem:[#allocation56_spill] sm:$0xff] %v14597_v56  ;;  %10973 = vmatmul.mubr.bf16.vlgmr.msra.gmra.mrb[64].mxu1 %v3911_v27  ;;  %v12518_v7 = vld [vmem:[%s16336_s3 + $0x1d8] sm:$0xff]   ;;  %v16784_v19 = vshrl.u32 %v14511_v26, 16  ;;  %v16788_v27 = vshll.u32 %v14425_v29, 16  ;;  %11124 = vmatprep.mubr.bf16.mxu0 %v14023_v49 }
 0x24e   : > { %v14602_v46 = vor.u32 %v14577_v14, %v16781_v39  ;;  %v5331_v22 = vrot.slane %v16782_v63, 1  ;;  %v5334_v20 = vrot.slane %v16783_v55, 1  ;;  %v16786_v39 = vshrl.u32 %v14330_v23, 16  ;;  %10976 = vmatprep.mubr.bf16.mxu1 %v14048_v17  ;;  %11005 = vmatpush3.bf16.msra.mxu1 %v14313_v47  ;;  %v12512_v17 = vld [vmem:[%s16336_s3 + $0x190] sm:$0xff]   ;;  %vm16794_vm3 = vmmov %vm16761_vm0 }
 0x24f   : > { %v14615_v56 = vor.u32 %v14584_v44, %v16784_v19  ;;  %v16787_v63 = vshrl.u32 %v14324_v8, 16  ;;  %v5337_v55 = vrot.slane %v16788_v27, 1  ;;  %v16791_v19 = vshrl.u32 %v14390_v15, 16  ;;  %11006 = vmatprep.subr.bf16.mxu1 %v12511_v59  ;;  %vm16795_vm7 = vmmov %vm16761_vm0  ;;  %11153 = vmatpush3.bf16.msra.mxu0 %v12517_v24 }
 0x250   : > { %v5324_v25 = vor.u32 %v14588_v48, %v16786_v39  ;;  %v14629_v37 = vsel %vm16789_vm2, %v14602_v46, %v14584_v44  ;;  %v16792_v39 = vshrl.u32 %v14385_v12, 16  ;;  %vm16797_vm1 = vmmov %vm16761_vm0  ;;  %v16799_v26 = vshrl.u32 %v14429_v13, 16  ;;  %11154 = vmatprep.subr.bf16.mxu0 %v12518_v7 }
 0x251   : > { %16785 = vst [vmem:[#allocation57_spill] sm:$0xff] %v14615_v56  ;;  %v5327_v18 = vor.u32 %v5325_v53, %v16787_v63  ;;  %16790 = vst [vmem:[#allocation58_spill] sm:$0xff] %v14629_v37  ;;  %v5330_v60 = vor.u32 %v5328_v3, %v16791_v19  ;;  %v16793_v63 = vshll.u32 %v14027_v11, 16  ;;  %v14644_v47 = vsel %vm16761_vm0, %v14615_v56, %v14588_v48 }
 0x252   : > { %v5333_v32 = vor.u32 %v5331_v22, %v16792_v39  ;;  %v14647_v27 = vsel %vm16794_vm3, %v5324_v25, %v5325_v53  ;;  %v16796_v39 = vshll.u32 %v14023_v49, 16  ;;  %vm16798_vm2 = vmmov %vm16761_vm0  ;;  %v14662_v56 = vor.u32 %v5334_v20, %v16799_v26  ;;  %11007 = vmatpush3.bf16.msra.mxu1 %v12511_v59 }
 0x253   : > { %v5583_v54 = vrot.slane %v16793_v63, 1  ;;  %v14650_v19 = vsel %vm16795_vm7, %v5327_v18, %v5328_v3  ;;  %v14655_v44 = vsel %vm16797_vm1, %v5330_v60, %v5331_v22  ;;  %v16800_v25 = vshrl.u32 %v14425_v29, 16  ;;  %v16801_v18 = vld [vmem:[#allocation7_spill] sm:$0xff]  ;;  %vm16803_vm3 = vmmov %vm16761_vm0  ;;  %11008 = vmatprep.subr.bf16.mxu1 %v12512_v17  ;;  %11155 = vmatpush3.bf16.msra.mxu0 %v12518_v7 }
 0x254   : > { %v5586_v63 = vrot.slane %v16796_v39, 1  ;;  %v14658_v37 = vsel %vm16798_vm2, %v5333_v32, %v5334_v20  ;;  %v14671_v3 = vsel %vm16761_vm0, %v16801_v18, %v14489_v61  ;;  %v16802_v24 = vshrl.u32 %v16738_v28, 16  ;;  %vm16805_vm7 = vmmov %vm16761_vm0  ;;  %11125 = vmatmul.mubr.bf16.gmra.mrb[72].mxu0 %v14106_v52 }
 0x255   : > { %v14666_v53 = vor.u32 %v5337_v55, %v16800_v25  ;;  %v14678_v32 = vsel %vm16803_vm3, %v14021_v43, %v5583_v54  ;;  %v16804_v26 = vshrl.u32 %v14027_v11, 16  ;;  %v14684_v20 = vsel %vm16805_vm7, %v14662_v56, %v5337_v55  ;;  %v12520_v43 = vld [vmem:[%s16336_s3 + $0x1e0] sm:$0xff]   ;;  %vm16808_vm1 = vmmov %vm16761_vm0  ;;  %10977 = vmatmul.mubr.bf16.gmra.mrb[68].mxu1 %v14117_v6  ;;  %11128 = vmatprep.mubr.bf16.mxu0 %v14100_v16 }
 0x256   : > { %v5579_v60 = vor.u32 %v14489_v61, %v16802_v24  ;;  %v16806_v39 = vshrl.u32 %v14023_v49, 16  ;;  %v16807_v18 = vshll.u32 %v14106_v52, 16  ;;  %vm16809_vm2 = vmmov %vm16761_vm0  ;;  %v16810_v61 = vshll.u32 %v14100_v16, 16  ;;  %v12513_v24 = vld [vmem:[%s16336_s3 + $0x198] sm:$0xff]   ;;  %10980 = vmatprep.mubr.bf16.mxu1 %v14129_v57  ;;  %11009 = vmatpush3.bf16.msra.mxu1 %v12512_v17 }
 0x257   : > { %v5585_v22 = vor.u32 %v5583_v54, %v16804_v26  ;;  %v16811_v49 = vshll.u32 %v14182_v30, 16  ;;  %vm16817_vm3 = vmmov %vm16761_vm0  ;;  %11156 = vmatprep.subr.bf16.mxu0 %v12520_v43  ;;  %11010 = vmatprep.subr.bf16.mxu1 %v12513_v24 }
 0x258   : > { %v5588_v25 = vor.u32 %v5586_v63, %v16806_v39  ;;  %v5589_v28 = vrot.slane %v16807_v18, 1  ;;  %v14695_v11 = vsel %vm16808_vm1, %v5579_v60, %v13994_v10  ;;  %v5592_v59 = vrot.slane %v16810_v61, 1  ;;  %v12521_v39 = vld [vmem:[%s16336_s3 + $0x1e8] sm:$0xff]   ;;  %vm16819_vm7 = vmmov %vm16761_vm0  ;;  %11157 = vmatpush3.bf16.msra.mxu0 %v12520_v43 }
 0x259   : > { %v14698_v54 = vsel %vm16809_vm2, %v5585_v22, %v5586_v63  ;;  %v5595_v55 = vrot.slane %v16811_v49, 1  ;;  %v16812_v10 = vshrl.u32 %v14106_v52, 16  ;;  %v16813_v63 = vshll.u32 %v14176_v4, 16  ;;  %vm16820_vm1 = vmmov %vm16761_vm0  ;;  %11158 = vmatprep.subr.bf16.mxu0 %v12521_v39 }
 0x25a   : > { %v14708_v26 = vsel %vm16761_vm0, %v5588_v25, %v5589_v28  ;;  %v16814_v18 = vshrl.u32 %v14100_v16, 16  ;;  %v16815_v25 = vshrl.u32 %v14182_v30, 16  ;;  %v16816_v49 = vshll.u32 %v14258_v51, 16  ;;  %v12516_v16 = vld [vmem:[%s16336_s3 + $0x1a0] sm:$0xff]   ;;  %vm16822_vm2 = vmmov %vm16761_vm0  ;;  %11011 = vmatpush3.bf16.msra.mxu1 %v12513_v24 }
 0x25b   : > { %v5591_v60 = vor.u32 %v5589_v28, %v16812_v10  ;;  %v5598_v22 = vrot.slane %v16813_v63, 1  ;;  %v16818_v52 = vshrl.u32 %v14176_v4, 16  ;;  %11012 = vmatprep.subr.bf16.mxu1 %v12516_v16 }
 0x25c   : > { %v5594_v7 = vor.u32 %v5592_v59, %v16814_v18  ;;  %v5597_v61 = vor.u32 %v5595_v55, %v16815_v25  ;;  %v5604_v28 = vrot.slane %v16816_v49, 1  ;;  %v16821_v25 = vshrl.u32 %v14258_v51, 16  ;;  %11159 = vmatpush3.bf16.msra.mxu0 %v12521_v39 }
 0x25d   : > { %v14728_v6 = vsel %vm16817_vm3, %v5591_v60, %v5592_v59  ;;  %v5600_v10 = vor.u32 %v5598_v22, %v16818_v52  ;;  %vm16823_vm3 = vmmov %vm16761_vm0  ;;  %10981 = vmatmul.mubr.bf16.gmra.mrb[72].mxu1 %v14193_v0  ;;  %11129 = vmatmul.mubr.bf16.gmra.mrb[76].mxu0 %v14182_v30  ;;  %v12525_v30 = vld [vmem:[%s16336_s3 + $0x1b8] sm:$0xff]   ;;  %v4123_v0 = vld [vmem:[#allocation2 + $0x10] sm:$0x80]  ;;  %v16828_v60 = vshrl.u32 %v14466_v35, 16  ;;  %v16829_v39 = vshll.u32 %v14464_v21, 16 }
 0x25e   : > { %v14733_v63 = vsel %vm16819_vm7, %v5594_v7, %v5595_v55  ;;  %v14736_v18 = vsel %vm16820_vm1, %v5597_v61, %v5598_v22  ;;  %v5606_v49 = vor.u32 %v5604_v28, %v16821_v25  ;;  %v14749_v17 = vsel %vm16761_vm0, %v14602_v46, %v5604_v28  ;;  %v12523_v55 = vld [vmem:[%s16336_s3 + $0x1f0] sm:$0xff]   ;;  %10984 = vmatprep.mubr.bf16.mxu1 %v14205_v9  ;;  %v12527_v28 = vld [vmem:[%s16336_s3 + $0x148] sm:$0xff]  }
 0x25f   : > { %v14745_v57 = vsel %vm16822_vm2, %v5600_v10, %v14577_v14  ;;  %v12519_v14 = vld [vmem:[%s16336_s3 + $0x1a8] sm:$0xff]   ;;  %11132 = vmatprep.mubr.bf16.mxu0 %v14176_v4  ;;  %11013 = vmatpush3.bf16.msra.mxu1 %v12516_v16  ;;  %v12522_v46 = vld [vmem:[%s16336_s3 + $0x1b0] sm:$0xff]   ;;  %v12526_v4 = vld [vmem:[%s16336_s3 + $0x140] sm:$0xff]   ;;  %v4157_v9 = vshrl.u32 %v4123_v0, 16  ;;  %vm16827_vm7 = vsmask.f32 256 }
 0x260   : > { %v14753_v59 = vsel %vm16823_vm3, %v5606_v49, %v14588_v48  ;;  %v12524_v48 = vld [vmem:[%s16336_s3 + $0x1f8] sm:$0xff]   ;;  %11160 = vmatprep.subr.bf16.mxu0 %v12523_v55  ;;  %11014 = vmatprep.subr.bf16.mxu1 %v12519_v14  ;;  %v4179_v22 = vrot.slane %v16828_v60, 7  ;;  %vm16831_vm1 = vmmov %vm16827_vm7  ;;  %v16832_v10 = vshrl.u32 %v14468_v5, 16  ;;  %v16838_v0 = vshrl.u32 %v14472_v2, 16  ;;  %v16845_v60 = vld [vmem:[#allocation38_spill] sm:$0xff] }
 0x261   : > { %11161 = vmatpush3.bf16.msra.mxu0 %v12523_v55  ;;  %vm16833_vm2 = vmmov %vm16831_vm1  ;;  %v16835_v55 = vshll.u32 %v14468_v5, 16 }
 0x262   : > { %11162 = vmatprep.subr.bf16.mxu0 %v12524_v48  ;;  %v4187_v25 = vrot.slane %v16832_v10, 7  ;;  %vm16837_vm0 = vmmov %vm16831_vm1 }
 0x263   : > { %11015 = vmatpush3.bf16.msra.mxu1 %v12519_v14  ;;  %vm16839_vm3 = vmmov %vm16837_vm0 }
 0x264   : > { %11016 = vmatprep.subr.bf16.mxu1 %v12522_v46  ;;  %v4190_v14 = vor.u32 %v16835_v55, %v4187_v25 }
 0x265   : > { %11163 = vmatpush3.bf16.msra.mxu0 %v12524_v48  ;;  %10985 = vmatmul.mubr.bf16.gmra.mrb[76].mxu1 %v14275_v38  ;;  %v16836_v48 = vshll.u32 %v14470_v62, 16 }
 0x266   : > { %11133 = vmatmul.mubr.bf16.gmra.mrb[80].mxu0 %v14264_v1  ;;  %10988 = vmatprep.mubr.bf16.mxu1 %v14285_v34  ;;  %v4159_v34 = vrot.slane %v4157_v9, 7  ;;  %v12529_v9 = vld [vmem:[%s16336_s3 + $0x158] sm:$0xff]  }
 0x267   : > { %11136 = vmatprep.mubr.bf16.mxu0 %v14258_v51  ;;  %11017 = vmatpush3.bf16.msra.mxu1 %v12522_v46  ;;  %v16824_v51 = vshrl.u32 %v14451_v50, 16 }
 0x268   : > { %11018 = vmatprep.subr.bf16.mxu1 %v12525_v30 }
 0x269   : > { %v4163_v38 = vrot.slane %v16824_v51, 7 }
 0x26b   : > { %11019 = vmatpush3.bf16.msra.mxu1 %v12525_v30  ;;  %v4191_v30 = vsel %vm16837_vm0, %v4179_v22, %v4190_v14  ;;  %v16856_v14 = vld [vmem:[#allocation12_spill] sm:$0xff] }
 0x26c   : > { %11196 = vmatprep.subr.bf16.mxu1 %v12526_v4 }
 0x26d   : > { %10989 = vmatmul.mubr.bf16.gmra.mrb[80].mxu1 %v14342_v33  ;;  %v16825_v33 = vshll.u32 %v14451_v50, 16 }
 0x26e   : > { %11137 = vmatmul.mubr.bf16.gmra.mrb[84].mxu0 %v14330_v23  ;;  %10992 = vmatprep.mubr.bf16.mxu1 %v14350_v58 }
 0x26f   : > { %11140 = vmatprep.mubr.bf16.mxu0 %v14324_v8  ;;  %v4166_v58 = vor.u32 %v16825_v33, %v4163_v38  ;;  %v12530_v33 = vld [vmem:[%s16336_s3 + $0x160] sm:$0xff]  }
 0x271   : > { %v4167_v24 = vsel %vm16827_vm7, %v4159_v34, %v4166_v58  ;;  %v16842_v58 = vshll.u32 %v14485_v36, 16  ;;  %vm16843_vm7 = vmmov %vm16837_vm0 }
 0x275   : > { %10993 = vmatmul.mubr.bf16.gmra.mrb[84].mxu1 %v14402_v45  ;;  %v16826_v45 = vshrl.u32 %v14464_v21, 16 }
 0x276   : > { %11141 = vmatmul.mubr.bf16.gmra.mrb[88].mxu0 %v14390_v15  ;;  %10996 = vmatprep.mubr.bf16.mxu1 %v14408_v41 }
 0x277   : > { %11144 = vmatprep.mubr.bf16.mxu0 %v14385_v12  ;;  %v4171_v43 = vrot.slane %v16826_v45, 7 }
 0x279   : > { %v4174_v7 = vor.u32 %v16829_v39, %v4171_v43 }
 0x27b   : > { %v4175_v52 = vsel %vm16831_vm1, %v4163_v38, %v4174_v7  ;;  %v16841_v38 = vshll.u32 %v14472_v2, 16  ;;  %vm16844_vm1 = vmmov %vm16837_vm0  ;;  %v16847_v7 = vshll.u32 %v16845_v60, 16 }
 0x27d   : > { %10997 = vmatmul.mubr.bf16.gmra.mrb[88].mxu1 %v14432_v42 }
 0x27e   : > { %11145 = vmatmul.mubr.bf16.gmra.mrb[92].mxu0 %v14429_v13  ;;  %11000 = vmatprep.mubr.bf16.mxu1 %v14439_v31 }
 0x27f   : > { %11164 = vmatprep.mubr.bf16.mxu0 %v14451_v50  ;;  %v16830_v50 = vshll.u32 %v14466_v35, 16 }
 0x281   : > { %v4182_v61 = vor.u32 %v16830_v50, %v4179_v22  ;;  %v16846_v22 = vshrl.u32 %v16845_v60, 16 }
 0x283   : > { %v4183_v49 = vsel %vm16833_vm2, %v4171_v43, %v4182_v61  ;;  %v4227_v39 = vrot.slane %v16846_v22, 7  ;;  %v16848_v61 = vld [vmem:[#allocation8_spill] sm:$0xff]  ;;  %vm16849_vm2 = vmmov %vm16837_vm0 }
 0x284   : > { %v12552_v22 = vld [vmem:[%s16338_s5 + $0xd0] sm:$0xff]  }
 0x285   : > { %11001 = vmatmul.mubr.bf16.gmra.mrb[92].mxu1 %v14492_v40  ;;  %v4230_v50 = vor.u32 %v16847_v7, %v4227_v39 }
 0x286   : > { %11165 = vmatmul.mubr.bf16.vlgmr.msra.gmra.mrb[64].mxu0 %v14464_v21  ;;  %11020 = vmatprep.mubr.bf16.mxu1 %v4167_v24  ;;  %v16834_v21 = vshrl.u32 %v14470_v62, 16  ;;  %v12531_v24 = vld [vmem:[%s16336_s3 + $0x168] sm:$0xff]  }
 0x287   : > { %11168 = vmatprep.mubr.bf16.mxu0 %v14466_v35  ;;  %v12528_v35 = vld [vmem:[%s16336_s3 + $0x150] sm:$0xff]  }
 0x288   : > { %v4195_v16 = vrot.slane %v16834_v21, 7 }
 0x28a   : > { %v4198_v46 = vor.u32 %v16836_v48, %v4195_v16  ;;  %v16861_v48 = vld [vmem:[#allocation49_spill] sm:$0xff] }
 0x28c   : > { %v4199_v51 = vsel %vm16839_vm3, %v4187_v25, %v4198_v46  ;;  %v12534_v25 = vld [vmem:[%s16336_s3 + $0x80] sm:$0xff]   ;;  %vm16852_vm3 = vmmov %vm16837_vm0  ;;  %v12536_v46 = vld [vmem:[%s16336_s3 + $0x90] sm:$0xff]  }
 0x28d   : > { %11021 = vmatmul.mubr.bf16.vlgmr.msra.gmra.mrb[64].mxu1 %v4175_v52  ;;  %v16850_v52 = vld [vmem:[#allocation47_spill] sm:$0xff] }
 0x28e   : > { %11169 = vmatmul.mubr.bf16.gmra.mrb[68].mxu0 %v14468_v5  ;;  %11024 = vmatprep.mubr.bf16.mxu1 %v4183_v49  ;;  %v16840_v5 = vshrl.u32 %v14485_v36, 16  ;;  %v4231_v10 = vsel %vm16837_vm0, %v16850_v52, %v4230_v50  ;;  %v16851_v49 = vld [vmem:[#allocation11_spill] sm:$0xff]  ;;  %v16870_v52 = vld [vmem:[#allocation54_spill] sm:$0xff] }
 0x28f   : > { %11197 = vmatpush3.bf16.msra.mxu1 %v12526_v4  ;;  %11172 = vmatprep.mubr.bf16.mxu0 %v14470_v62  ;;  %v4203_v4 = vrot.slane %v16838_v0, 7  ;;  %v4239_v21 = vsel %vm16852_vm3, %v4227_v39, %v16851_v49  ;;  %v16862_v0 = vld [vmem:[#allocation50_spill] sm:$0xff] }
 0x290   : > { %11198 = vmatprep.subr.bf16.mxu1 %v12527_v28  ;;  %v4211_v62 = vrot.slane %v16840_v5, 7  ;;  %v16864_v5 = vld [vmem:[#allocation52_spill] sm:$0xff]  ;;  %v12554_v39 = vld [vmem:[%s16338_s5 + $0x100] sm:$0xff]  }
 0x291   : > { %v4206_v34 = vor.u32 %v16841_v38, %v4203_v4  ;;  %v12540_v38 = vld [vmem:[%s16336_s3 + $0xb0] sm:$0xff]  }
 0x292   : > { %v4214_v45 = vor.u32 %v16842_v58, %v4211_v62  ;;  %v16867_v58 = vld [vmem:[#allocation58_spill] sm:$0xff] }
 0x293   : > { %11199 = vmatpush3.bf16.msra.mxu1 %v12527_v28  ;;  %v4207_v43 = vsel %vm16843_vm7, %v4195_v16, %v4206_v34  ;;  %v4223_v28 = vsel %vm16849_vm2, %v4211_v62, %v16848_v61  ;;  %v16853_v16 = vld [vmem:[#allocation14_spill] sm:$0xff]  ;;  %vm16857_vm7 = vmmov %vm16837_vm0  ;;  %v16865_v62 = vld [vmem:[#allocation53_spill] sm:$0xff] }
 0x294   : > { %11200 = vmatprep.subr.bf16.mxu1 %v12528_v35  ;;  %v12541_v34 = vld [vmem:[%s16336_s3 + $0xb8] sm:$0xff]  }
 0x295   : > { %11025 = vmatmul.mubr.bf16.gmra.mrb[68].mxu1 %v4191_v30  ;;  %v12537_v30 = vld [vmem:[%s16336_s3 + $0x98] sm:$0xff]  }
 0x296   : > { %11173 = vmatmul.mubr.bf16.gmra.mrb[72].mxu0 %v14472_v2  ;;  %11028 = vmatprep.mubr.bf16.mxu1 %v4199_v51  ;;  %v4215_v2 = vsel %vm16844_vm1, %v4203_v4, %v4214_v45  ;;  %vm16859_vm1 = vsmask.f32 7424  ;;  %v16863_v4 = vld [vmem:[#allocation51_spill] sm:$0xff]  ;;  %v12542_v45 = vld [vmem:[%s16336_s3 + $0x200] sm:$0xff]  }
 0x297   : > { %11176 = vmatprep.mubr.bf16.mxu0 %v14485_v36  ;;  %11201 = vmatpush3.bf16.msra.mxu1 %v12528_v35  ;;  %v12532_v36 = vld [vmem:[%s16336_s3 + $0x170] sm:$0xff]   ;;  %v12539_v51 = vld [vmem:[%s16336_s3 + $0xa8] sm:$0xff]   ;;  %vm16868_vm2 = vmmov %vm16859_vm1 }
 0x298   : > { %11202 = vmatprep.subr.bf16.mxu1 %v12529_v9  ;;  %vm16869_vm0 = vmmov %vm16859_vm1 }
 0x299   : > { %vm16871_vm3 = vmmov %vm16869_vm0 }
 0x29b   : > { %11203 = vmatpush3.bf16.msra.mxu1 %v12529_v9  ;;  %v12538_v9 = vld [vmem:[%s16336_s3 + $0xa0] sm:$0xff]  }
 0x29c   : > { %11204 = vmatprep.subr.bf16.mxu1 %v12530_v33 }
 0x29d   : > { %11029 = vmatmul.mubr.bf16.gmra.mrb[72].mxu1 %v4207_v43  ;;  %v5271_v43 = vld [vmem:[#allocation2 + $0x90] sm:$0x1] }
 0x29e   : > { %11177 = vmatmul.mubr.bf16.gmra.mrb[76].mxu0 %v14264_v1  ;;  %11032 = vmatprep.mubr.bf16.mxu1 %v4215_v2  ;;  %v12533_v1 = vld [vmem:[%s16336_s3 + $0x178] sm:$0xff]  }
 0x29f   : > { %11180 = vmatprep.mubr.bf16.mxu0 %v16845_v60  ;;  %11205 = vmatpush3.bf16.msra.mxu1 %v12530_v33  ;;  %v16866_v33 = vld [vmem:[#allocation56_spill] sm:$0xff] }
 0x2a0   : > { %11206 = vmatprep.subr.bf16.mxu1 %v12531_v24 }
 0x2a3   : > { %11207 = vmatpush3.bf16.msra.mxu1 %v12531_v24  ;;  %v5341_v24 = vshll.u32 %v5271_v43, 16 }
 0x2a4   : > { %11208 = vmatprep.subr.bf16.mxu1 %v12532_v36 }
 0x2a5   : > { %11033 = vmatmul.mubr.bf16.gmra.mrb[76].mxu1 %v4223_v28  ;;  %v5343_v2 = vrot.slane %v5341_v24, 1  ;;  %v5861_v28 = vld [vmem:[#allocation2 + $0x60] sm:$0xff] }
 0x2a6   : > { %11181 = vmatmul.mubr.bf16.gmra.mrb[80].mxu0 %v14330_v23  ;;  %11036 = vmatprep.mubr.bf16.mxu1 %v4231_v10 }
 0x2a7   : > { %11184 = vmatprep.mubr.bf16.mxu0 %v14324_v8  ;;  %11209 = vmatpush3.bf16.msra.mxu1 %v12532_v36  ;;  %v5270_v8 = vld [vmem:[#allocation2 + $0x10] sm:$0xff]  ;;  %v5344_v60 = vsel %vm16868_vm2, %v14666_v53, %v5343_v2  ;;  %v12545_v53 = vld [vmem:[%s16336_s3 + $0x218] sm:$0xff]   ;;  %v12556_v36 = vld [vmem:[%s16338_s5 + $0xe0] sm:$0xff]  }
 0x2a8   : > { %11210 = vmatprep.subr.bf16.mxu1 %v12533_v1  ;;  %v5291_v23 = vshll.u32 %v5270_v8, 16  ;;  %vm16877_vm2 = vmmov %vm16869_vm0 }
 0x2aa   : > { %v5293_v35 = vrot.slane %v5291_v23, 1 }
 0x2ab   : > { %11211 = vmatpush3.bf16.msra.mxu1 %v12533_v1 }
 0x2ac   : > { %11244 = vmatprep.subr.bf16.mxu1 %v12534_v25 }
 0x2ad   : > { %11037 = vmatmul.mubr.bf16.gmra.mrb[80].mxu1 %v4239_v21 }
 0x2ae   : > { %11185 = vmatmul.mubr.bf16.gmra.mrb[84].mxu0 %v14390_v15  ;;  %11040 = vmatprep.mubr.bf16.mxu1 %v14408_v41  ;;  %v16854_v15 = vld [vmem:[#allocation6_spill] sm:$0xff]  ;;  %v5289_v41 = vshrl.u32 %v5270_v8, 16 }
 0x2af   : > { %11188 = vmatprep.mubr.bf16.mxu0 %v14385_v12  ;;  %v16855_v12 = vld [vmem:[#allocation13_spill] sm:$0xff] }
 0x2b0   : > { %v5294_v55 = vor.u32 %v5293_v35, %v5289_v41  ;;  %v5862_v35 = vld [vmem:[#allocation2 + $0x68] sm:$0xff] }
 0x2b5   : > { %11041 = vmatmul.mubr.bf16.gmra.mrb[84].mxu1 %v14432_v42  ;;  %v4287_v42 = vsel %vm16857_vm7, %v16856_v14, %v16855_v12 }
 0x2b6   : > { %11189 = vmatmul.mubr.bf16.gmra.mrb[88].mxu0 %v14429_v13  ;;  %11044 = vmatprep.mubr.bf16.mxu1 %v14439_v31  ;;  %v16858_v13 = vld [vmem:[#allocation48_spill] sm:$0xff] }
 0x2b7   : > { %11192 = vmatprep.mubr.bf16.mxu0 %v14425_v29  ;;  %v5296_v31 = vsel %vm16859_vm1, %v5294_v55, %v16858_v13  ;;  %v16860_v29 = vld [vmem:[#allocation37_spill] sm:$0xff]  ;;  %v16874_v13 = vld [vmem:[#allocation16_spill] sm:$0xff] }
 0x2b8   : > { %vm16875_vm1 = vnez %v16874_v13 }
 0x2bd   : > { %11045 = vmatmul.mubr.bf16.gmra.mrb[88].mxu1 %v14492_v40  ;;  %v12535_v40 = vld [vmem:[%s16336_s3 + $0x88] sm:$0xff]  }
 0x2be   : > { %11193 = vmatmul.mubr.bf16.gmra.mrb[92].mxu0 %v16853_v16  ;;  %11048 = vmatprep.mubr.bf16.mxu1 %v16854_v15  ;;  %v16872_v15 = vld [vmem:[#allocation15_spill] sm:$0xff] }
 0x2bf   : > { %vm16873_vm7 = vnez %v16872_v15 }
 0x2c5   : > { %11049 = vmatmul.mubr.bf16.gmra.mrb[92].mxu1 %v4287_v42 }
 0x2c6   : > { %11212 = vmatprep.mubr.bf16.mxu1 %v5296_v31 }
 0x2cd   : > { %11213 = vmatmul.mubr.bf16.vlgmr.msra.gmra.mrb[96].mxu1 %v16860_v29 }
 0x2ce   : > { %11216 = vmatprep.mubr.bf16.mxu1 %v16861_v48  ;;  %11245 = vmatpush3.bf16.msra.mxu1 %v12534_v25  ;;  %v5957_v25 = vshll.u32 %v5861_v28, 16 }
 0x2cf   : > { %11246 = vmatprep.subr.bf16.mxu1 %v12535_v40 }
 0x2d0   : > { %v5959_v14 = vrot.slane %v5957_v25, 1 }
 0x2d2   : > { %11247 = vmatpush3.bf16.msra.mxu1 %v12535_v40 }
 0x2d3   : > { %11248 = vmatprep.subr.bf16.mxu1 %v12536_v46 }
 0x2d5   : > { %11217 = vmatmul.mubr.bf16.gmra.mrb[100].mxu1 %v16862_v0 }
 0x2d6   : > { %11220 = vmatprep.mubr.bf16.mxu1 %v16863_v4  ;;  %11249 = vmatpush3.bf16.msra.mxu1 %v12536_v46 }
 0x2d7   : > { %11250 = vmatprep.subr.bf16.mxu1 %v12537_v30 }
 0x2da   : > { %11251 = vmatpush3.bf16.msra.mxu1 %v12537_v30 }
 0x2db   : > { %11252 = vmatprep.subr.bf16.mxu1 %v12538_v9 }
 0x2dd   : > { %11221 = vmatmul.mubr.bf16.gmra.mrb[104].mxu1 %v16864_v5 }
 0x2de   : > { %11224 = vmatprep.mubr.bf16.mxu1 %v16865_v62  ;;  %11253 = vmatpush3.bf16.msra.mxu1 %v12538_v9  ;;  %v5965_v9 = vshll.u32 %v5862_v35, 16 }
 0x2df   : > { %11254 = vmatprep.subr.bf16.mxu1 %v12539_v51 }
 0x2e2   : > { %11255 = vmatpush3.bf16.msra.mxu1 %v12539_v51 }
 0x2e3   : > { %11256 = vmatprep.subr.bf16.mxu1 %v12540_v38 }
 0x2e5   : > { %11225 = vmatmul.mubr.bf16.gmra.mrb[108].mxu1 %v16866_v33 }
 0x2e6   : > { %11228 = vmatprep.mubr.bf16.mxu1 %v16867_v58  ;;  %11257 = vmatpush3.bf16.msra.mxu1 %v12540_v38  ;;  %v16878_v38 = vld [vmem:[#allocation57_spill] sm:$0xff]  ;;  %v5961_v58 = vshrl.u32 %v5861_v28, 16 }
 0x2e7   : > { %11258 = vmatprep.subr.bf16.mxu1 %v12541_v34 }
 0x2e8   : > { %v5963_v2 = vor.u32 %v5961_v58, %v5959_v14 }
 0x2ea   : > { %11259 = vmatpush3.bf16.msra.mxu1 %v12541_v34  ;;  %v5960_v34 = vsel %vm16869_vm0, %v16878_v38, %v5959_v14 }
 0x2eb   : > { %11292 = vmatprep.subr.bf16.mxu1 %v12542_v45 }
 0x2ed   : > { %11229 = vmatmul.mubr.bf16.gmra.mrb[112].mxu1 %v14644_v47  ;;  %v12543_v47 = vld [vmem:[%s16336_s3 + $0x208] sm:$0xff]  }
 0x2ee   : > { %11232 = vmatprep.mubr.bf16.mxu1 %v14647_v27 }
 0x2f5   : > { %11233 = vmatmul.mubr.bf16.gmra.mrb[116].mxu1 %v14650_v19 }
 0x2f6   : > { %11236 = vmatprep.mubr.bf16.mxu1 %v14655_v44 }
 0x2fd   : > { %11237 = vmatmul.mubr.bf16.gmra.mrb[120].mxu1 %v14658_v37 }
 0x2fe   : > { %11240 = vmatprep.mubr.bf16.mxu1 %v14684_v20  ;;  %v12544_v20 = vld [vmem:[%s16336_s3 + $0x210] sm:$0xff]  }
 0x305   : > { %11241 = vmatmul.mubr.bf16.gmra.mrb[124].mxu1 %v5344_v60  ;;  %v5864_v60 = vld [vmem:[#allocation2 + $0x78] sm:$0xff] }
 0x306   : > { %11260 = vmatprep.mubr.bf16.mxu1 %v14671_v3  ;;  %v12546_v3 = vld [vmem:[%s16336_s3 + $0x220] sm:$0xff]  }
 0x30d   : > { %11261 = vmatmul.mubr.bf16.vlgmr.msra.gmra.mrb[96].mxu1 %v14695_v11  ;;  %v12550_v11 = vld [vmem:[%s16338_s5 + $0xc0] sm:$0xff]  }
 0x30e   : > { %11264 = vmatprep.mubr.bf16.mxu1 %v14678_v32  ;;  %11293 = vmatpush3.bf16.msra.mxu1 %v12542_v45  ;;  %v12547_v32 = vld [vmem:[%s16336_s3 + $0x228] sm:$0xff]   ;;  %v5967_v45 = vrot.slane %v5965_v9, 1 }
 0x30f   : > { %11294 = vmatprep.subr.bf16.mxu1 %v12543_v47  ;;  %11340 = vmatprep.subr.bf16.mxu0 %v12550_v11 }
 0x310   : > { %11341 = vmatpush3.bf16.msra.mxu0 %v12550_v11 }
 0x312   : > { %11295 = vmatpush3.bf16.msra.mxu1 %v12543_v47 }
 0x313   : > { %11296 = vmatprep.subr.bf16.mxu1 %v12544_v20 }
 0x315   : > { %11265 = vmatmul.mubr.bf16.gmra.mrb[100].mxu1 %v14698_v54  ;;  %v12551_v54 = vld [vmem:[%s16338_s5 + $0xc8] sm:$0xff]  }
 0x316   : > { %11268 = vmatprep.mubr.bf16.mxu1 %v14708_v26  ;;  %11297 = vmatpush3.bf16.msra.mxu1 %v12544_v20  ;;  %v12548_v26 = vld [vmem:[%s16336_s3 + $0x230] sm:$0xff]  }
 0x317   : > { %11298 = vmatprep.subr.bf16.mxu1 %v12545_v53  ;;  %11342 = vmatprep.subr.bf16.mxu0 %v12551_v54 }
 0x318   : > { %11343 = vmatpush3.bf16.msra.mxu0 %v12551_v54 }
 0x319   : > { %11344 = vmatprep.subr.bf16.mxu0 %v12552_v22 }
 0x31a   : > { %11299 = vmatpush3.bf16.msra.mxu1 %v12545_v53 }
 0x31b   : > { %11300 = vmatprep.subr.bf16.mxu1 %v12546_v3 }
 0x31c   : > { %11345 = vmatpush3.bf16.msra.mxu0 %v12552_v22 }
 0x31d   : > { %11269 = vmatmul.mubr.bf16.gmra.mrb[104].mxu1 %v14728_v6  ;;  %v12549_v6 = vld [vmem:[%s16336_s3 + $0x238] sm:$0xff]  }
 0x31e   : > { %11272 = vmatprep.mubr.bf16.mxu1 %v14733_v63  ;;  %11301 = vmatpush3.bf16.msra.mxu1 %v12546_v3  ;;  %v12553_v63 = vld [vmem:[%s16338_s5 + $0xd8] sm:$0xff]  }
 0x31f   : > { %11302 = vmatprep.subr.bf16.mxu1 %v12547_v32  ;;  %11346 = vmatprep.subr.bf16.mxu0 %v12553_v63 }
 0x320   : > { %11347 = vmatpush3.bf16.msra.mxu0 %v12553_v63 }
 0x321   : > { %11348 = vmatprep.subr.bf16.mxu0 %v12556_v36 }
 0x322   : > { %11303 = vmatpush3.bf16.msra.mxu1 %v12547_v32  ;;  %v5969_v32 = vshrl.u32 %v5862_v35, 16 }
 0x323   : > { %11304 = vmatprep.subr.bf16.mxu1 %v12548_v26 }
 0x324   : > { %11349 = vmatpush3.bf16.msra.mxu0 %v12556_v36 }
 0x325   : > { %11273 = vmatmul.mubr.bf16.gmra.mrb[108].mxu1 %v14736_v18  ;;  %v5253_v18 = vld [vmem:[#allocation2 + $0x88] sm:$0x1] }
 0x326   : > { %11276 = vmatprep.mubr.bf16.mxu1 %v14745_v57  ;;  %11305 = vmatpush3.bf16.msra.mxu1 %v12548_v26  ;;  %v5623_v57 = vshll.u32 %v5253_v18, 16 }
 0x327   : > { %11306 = vmatprep.subr.bf16.mxu1 %v12549_v6 }
 0x328   : > { %v5625_v7 = vrot.slane %v5623_v57, 1 }
 0x32a   : > { %11307 = vmatpush3.bf16.msra.mxu1 %v12549_v6  ;;  %v5626_v50 = vsel %vm16869_vm0, %v14662_v56, %v5625_v7 }
 0x32b   : > { %11484 = vmatprep.subr.bf16.mxu1 %v12554_v39 }
 0x32d   : > { %11277 = vmatmul.mubr.bf16.gmra.mrb[112].mxu1 %v14749_v17  ;;  %v12555_v17 = vld [vmem:[%s16338_s5 + $0x108] sm:$0xff]  }
 0x32e   : > { %11280 = vmatprep.mubr.bf16.mxu1 %v14753_v59 }
 0x335   : > { %11281 = vmatmul.mubr.bf16.gmra.mrb[116].mxu1 %v14647_v27 }
 0x336   : > { %11284 = vmatprep.mubr.bf16.mxu1 %v14650_v19 }
 0x33d   : > { %11285 = vmatmul.mubr.bf16.gmra.mrb[120].mxu1 %v14655_v44  ;;  %v5859_v44 = vld [vmem:[#allocation2 + $0x50] sm:$0xff] }
 0x33e   : > { %11288 = vmatprep.mubr.bf16.mxu1 %v14658_v37  ;;  %v12557_v37 = vld [vmem:[%s16338_s5 + $0x110] sm:$0xff]   ;;  %v5941_v56 = vshll.u32 %v5859_v44, 16  ;;  %v5945_v49 = vshrl.u32 %v5859_v44, 16 }
 0x340   : > { %v5943_v59 = vrot.slane %v5941_v56, 1 }
 0x342   : > { %v5944_v10 = vsel %vm16871_vm3, %v16870_v52, %v5943_v59  ;;  %v5947_v23 = vor.u32 %v5945_v49, %v5943_v59  ;;  %vm16881_vm3 = vmmov %vm16869_vm0  ;;  %v5866_v59 = vld [vmem:[#allocation2 + $0x88] sm:$0xff] }
 0x343   : > { %v5968_v44 = vsel %vm16881_vm3, %v5963_v2, %v5967_v45  ;;  %v5997_v35 = vshll.u32 %v5866_v59, 16  ;;  %v6001_v58 = vshrl.u32 %v5866_v59, 16 }
 0x345   : > { %11289 = vmatmul.mubr.bf16.gmra.mrb[124].mxu1 %v5626_v50  ;;  %v5971_v50 = vor.u32 %v5969_v32, %v5967_v45  ;;  %v5999_v38 = vrot.slane %v5997_v35, 1  ;;  %v5868_v45 = vld [vmem:[#allocation2 + $0x98] sm:$0x1] }
 0x346   : > { %11308 = vmatprep.mubr.bf16.mxu1 %v16860_v29 }
 0x347   : > { %v6003_v32 = vor.u32 %v6001_v58, %v5999_v38 }
 0x34d   : > { %11309 = vmatmul.mubr.bf16.vlgmr.msra.gmra.mrb[96].mxu1 %v16861_v48  ;;  %v5863_v48 = vld [vmem:[#allocation2 + $0x70] sm:$0xff] }
 0x34e   : > { %11312 = vmatprep.mubr.bf16.mxu1 %v16862_v0  ;;  %11485 = vmatpush3.bf16.msra.mxu1 %v12554_v39  ;;  %v5973_v33 = vshll.u32 %v5863_v48, 16  ;;  %v5865_v39 = vld [vmem:[#allocation2 + $0x80] sm:$0xff] }
 0x34f   : > { %11486 = vmatprep.subr.bf16.mxu1 %v12555_v17 }
 0x350   : > { %v5975_v11 = vrot.slane %v5973_v33, 1  ;;  %v5993_v33 = vshrl.u32 %v5865_v39, 16 }
 0x352   : > { %11487 = vmatpush3.bf16.msra.mxu1 %v12555_v17  ;;  %v5981_v17 = vshll.u32 %v5864_v60, 16 }
 0x353   : > { %11488 = vmatprep.subr.bf16.mxu1 %v12557_v37 }
 0x355   : > { %11313 = vmatmul.mubr.bf16.gmra.mrb[100].mxu1 %v16863_v4 }
 0x356   : > { %11316 = vmatprep.mubr.bf16.mxu1 %v16864_v5  ;;  %11489 = vmatpush3.bf16.msra.mxu1 %v12557_v37  ;;  %v16876_v5 = vld [vmem:[#allocation55_spill] sm:$0xff] }
 0x359   : > { %v11166_v27 = vpop.f32.mrb[64].mxu0 }
 0x35a   : > { %v5093_v19 = vpop.f32.mrb[65].mxu0 }
 0x35b   : > { %v11167_v61 = vpop.f32.mrb[66].mxu0 }
 0x35c   : > { %v5096_v1 = vpop.f32.mrb[67].mxu0 }
 0x35d   : > { %11317 = vmatmul.mubr.bf16.gmra.mrb[104].mxu1 %v16865_v62  ;;  %v5952_v62 = vsel %vm16877_vm2, %v5947_v23, %v16876_v5  ;;  %vm16882_vm2 = vmmov %vm16869_vm0 }
 0x35e   : > { %11320 = vmatprep.mubr.bf16.mxu1 %v5944_v10  ;;  %v5976_v56 = vsel %vm16882_vm2, %v5971_v50, %v5975_v11  ;;  %vm16886_vm3 = vmmov %vm16882_vm2  ;;  %v6013_v50 = vshll.u32 %v5868_v45, 16  ;;  %v16931_v10 = vld [vmem:[#allocation41_spill] sm:$0xff] }
 0x360   : > { %v11022_v21 = vpop.f32.mrb[64].mxu1 }
 0x361   : > { %v11170_v8 = vpop.f32.mrb[68].mxu0  ;;  %v6276_v41 = vsel %vm16873_vm7, %v11022_v21, 0.0  ;;  %v4386_v55 = vpop.f32.mrb[65].mxu1 }
 0x362   : > { %v5109_v12 = vpop.f32.mrb[69].mxu0  ;;  %v15000_v42 = vadd.f32 %v11166_v27, %v6276_v41  ;;  %v6274_v31 = vsel %vm16875_vm1, %v4386_v55, 0.0  ;;  %v11023_v40 = vpop.f32.mrb[66].mxu1  ;;  %v5989_v27 = vshll.u32 %v5865_v39, 16  ;;  %v16884_v55 = vld [vmem:[#allocation20_spill] sm:$0xff]  ;;  %v15049_v39 = vld [vmem:[#allocation2 + $0x8] sm:$0xff] }
 0x363   : > { %v11171_v29 = vpop.f32.mrb[70].mxu0  ;;  %v15004_v46 = vadd.f32 %v6274_v31, %v5093_v19  ;;  %v15006_v30 = vadd.f32 %v11167_v61, %v11023_v40  ;;  %v4389_v0 = vpop.f32.mrb[67].mxu1  ;;  %v5977_v19 = vshrl.u32 %v5863_v48, 16  ;;  %v5983_v61 = vrot.slane %v5981_v17, 1 }
 0x364   : > { %v5112_v4 = vpop.f32.mrb[71].mxu0  ;;  %v15008_v51 = vadd.f32 %v5096_v1, %v4389_v0  ;;  %v5991_v23 = vrot.slane %v5989_v27, 1  ;;  %vm16885_vm0 = vnez %v16884_v55 }
 0x365   : > { %11321 = vmatmul.mubr.bf16.gmra.mrb[108].mxu1 %v5952_v62  ;;  %v5979_v52 = vor.u32 %v5977_v19, %v5975_v11 }
 0x366   : > { %11324 = vmatprep.mubr.bf16.mxu1 %v5960_v34  ;;  %v6005_v34 = vshll.u32 %v16853_v16, 16  ;;  %v5995_v2 = vor.u32 %v5993_v33, %v5991_v23 }
 0x367   : > { %v5984_v5 = vsel %vm16886_vm3, %v5979_v52, %v5983_v61  ;;  %vm16889_vm3 = vmmov %vm16882_vm2 }
 0x368   : > { %v11026_v43 = vpop.f32.mrb[68].mxu1  ;;  %v6007_v11 = vrot.slane %v6005_v34, 1  ;;  %v6000_v59 = vsel %vm16889_vm3, %v5995_v2, %v5999_v38  ;;  %vm16892_vm3 = vmmov %vm16882_vm2 }
 0x369   : > { %v11174_v24 = vpop.f32.mrb[72].mxu0  ;;  %v6280_v20 = vsel %vm13782_vm4, %v11026_v43, 0.0  ;;  %v4402_v53 = vpop.f32.mrb[69].mxu1 }
 0x36a   : > { %v5125_v3 = vpop.f32.mrb[73].mxu0  ;;  %v15016_v54 = vadd.f32 %v11170_v8, %v6280_v20  ;;  %v6278_v22 = vsel %vm13786_vm5, %v4402_v53, 0.0  ;;  %v11027_v6 = vpop.f32.mrb[70].mxu1  ;;  %v5985_v8 = vshrl.u32 %v5864_v60, 16 }
 0x36b   : > { %v11175_v63 = vpop.f32.mrb[74].mxu0  ;;  %v15020_v36 = vadd.f32 %v6278_v22, %v5109_v12  ;;  %v15022_v18 = vadd.f32 %v11171_v29, %v11027_v6  ;;  %v4405_v57 = vpop.f32.mrb[71].mxu1 }
 0x36c   : > { %v5128_v7 = vpop.f32.mrb[75].mxu0  ;;  %v15024_v37 = vadd.f32 %v5112_v4, %v4405_v57  ;;  %v5987_v4 = vor.u32 %v5985_v8, %v5983_v61  ;;  %v6008_v61 = vsel %vm16882_vm2, %v6003_v32, %v6007_v11 }
 0x36d   : > { %11325 = vmatmul.mubr.bf16.gmra.mrb[112].mxu1 %v5968_v44 }
 0x36e   : > { %11328 = vmatprep.mubr.bf16.mxu1 %v5976_v56  ;;  %v5992_v62 = vsel %vm16882_vm2, %v5987_v4, %v5991_v23 }
 0x370   : > { %v11030_v28 = vpop.f32.mrb[72].mxu1 }
 0x371   : > { %v11178_v1 = vpop.f32.mrb[76].mxu0  ;;  %v6284_v25 = vsel %vm13791_vm6, %v11030_v28, 0.0  ;;  %v4418_v49 = vpop.f32.mrb[73].mxu1 }
 0x372   : > { %v5141_v21 = vpop.f32.mrb[77].mxu0  ;;  %v15030_v41 = vadd.f32 %v11174_v24, %v6284_v25  ;;  %v6282_v12 = vsel %vm16885_vm0, %v4418_v49, 0.0  ;;  %v11031_v14 = vpop.f32.mrb[74].mxu1  ;;  %v16905_v49 = vld [vmem:[#allocation33_spill] sm:$0xff] }
 0x373   : > { %v11179_v31 = vpop.f32.mrb[78].mxu0  ;;  %v15034_v40 = vadd.f32 %v6282_v12, %v5125_v3  ;;  %v15036_v29 = vadd.f32 %v11175_v63, %v11031_v14  ;;  %v4421_v48 = vpop.f32.mrb[75].mxu1  ;;  %v6570_v12 = vld [vmem:[#allocation2 + $0x8] sm:$0x80] }
 0x374   : > { %v5144_v0 = vpop.f32.mrb[79].mxu0  ;;  %v15038_v9 = vadd.f32 %v5128_v7, %v4421_v48  ;;  %v15052_v7 = vshrl.u32 %v15049_v39, 16 }
 0x375   : > { %11329 = vmatmul.mubr.bf16.gmra.mrb[116].mxu1 %v5984_v5 }
 0x376   : > { %11332 = vmatprep.mubr.bf16.mxu1 %v5992_v62  ;;  %v6011_v28 = vor.u32 %v15052_v7, %v6007_v11 }
 0x378   : > { %v11034_v43 = vpop.f32.mrb[76].mxu1 }
 0x379   : > { %v11182_v24 = vpop.f32.mrb[80].mxu0  ;;  %v6288_v20 = vsel %vm13799_vm8, %v11034_v43, 0.0  ;;  %v4434_v53 = vpop.f32.mrb[77].mxu1 }
 0x37a   : > { %v5157_v3 = vpop.f32.mrb[81].mxu0  ;;  %v15045_v22 = vadd.f32 %v11178_v1, %v6288_v20  ;;  %v6286_v63 = vsel %vm13804_vm9, %v4434_v53, 0.0  ;;  %v11035_v16 = vpop.f32.mrb[78].mxu1  ;;  %v6015_v1 = vrot.slane %v6013_v50, 1  ;;  %v6441_v53 = vld [vmem:[%s12852_s23] sm:$0xff] }
 0x37b   : > { %v11183_v57 = vpop.f32.mrb[82].mxu0  ;;  %v15054_v17 = vadd.f32 %v6286_v63, %v5141_v21  ;;  %v15056_v44 = vadd.f32 %v11179_v31, %v11035_v16  ;;  %v4437_v56 = vpop.f32.mrb[79].mxu1 }
 0x37c   : > { %v5160_v27 = vpop.f32.mrb[83].mxu0  ;;  %v15058_v19 = vadd.f32 %v5144_v0, %v4437_v56  ;;  %v6016_v0 = vsel %vm16892_vm3, %v6011_v28, %v6015_v1 }
 0x37d   : > { %11333 = vmatmul.mubr.bf16.gmra.mrb[120].mxu1 %v6000_v59 }
 0x37e   : > { %11336 = vmatprep.mubr.bf16.mxu1 %v6008_v61 }
 0x380   : > { %v11038_v52 = vpop.f32.mrb[80].mxu1 }
 0x381   : > { %v11186_v25 = vpop.f32.mrb[84].mxu0  ;;  %v6292_v21 = vsel %vm13808_vm10, %v11038_v52, 0.0  ;;  %v4450_v8 = vpop.f32.mrb[81].mxu1 }
 0x382   : > { %v5173_v23 = vpop.f32.mrb[85].mxu0  ;;  %v15065_v35 = vadd.f32 %v11182_v24, %v6292_v21  ;;  %v6290_v14 = vsel %vm13812_vm11, %v4450_v8, 0.0  ;;  %v11039_v31 = vpop.f32.mrb[82].mxu1  ;;  %v6444_v21 = vld [vmem:[%s12852_s23 + $0x18] sm:$0xff] }
 0x383   : > { %v11187_v48 = vpop.f32.mrb[86].mxu0  ;;  %v15070_v4 = vadd.f32 %v6290_v14, %v5157_v3  ;;  %v15072_v5 = vadd.f32 %v11183_v57, %v11039_v31  ;;  %v4453_v62 = vpop.f32.mrb[83].mxu1 }
 0x384   : > { %v5176_v38 = vpop.f32.mrb[87].mxu0  ;;  %v15074_v34 = vadd.f32 %v5160_v27, %v4453_v62 }
 0x385   : > { %11337 = vmatmul.mubr.bf16.gmra.mrb[124].mxu1 %v6016_v0 }
 0x388   : > { %v11042_v33 = vpop.f32.mrb[84].mxu1 }
 0x389   : > { %v11190_v58 = vpop.f32.mrb[88].mxu0  ;;  %v6296_v43 = vsel %vm13816_vm12, %v11042_v33, 0.0  ;;  %v4466_v24 = vpop.f32.mrb[85].mxu1 }
 0x38a   : > { %v5189_v2 = vpop.f32.mrb[89].mxu0  ;;  %v15078_v20 = vadd.f32 %v11186_v25, %v6296_v43  ;;  %v6294_v3 = vsel %vm13820_vm13, %v4466_v24, 0.0  ;;  %v11043_v32 = vpop.f32.mrb[86].mxu1  ;;  %v16897_v43 = vld [vmem:[#allocation29_spill] sm:$0xff] }
 0x38b   : > { %v11191_v11 = vpop.f32.mrb[90].mxu0  ;;  %v15082_v63 = vadd.f32 %v6294_v3, %v5173_v23  ;;  %v15084_v16 = vadd.f32 %v11187_v48, %v11043_v32  ;;  %v4469_v57 = vpop.f32.mrb[87].mxu1  ;;  %vm16898_vm2 = vnez %v16897_v43  ;;  %v16899_v32 = vld [vmem:[#allocation30_spill] sm:$0xff] }
 0x38c   : > { %v5192_v50 = vpop.f32.mrb[91].mxu0  ;;  %v15086_v56 = vadd.f32 %v5176_v38, %v4469_v57  ;;  %vm16900_vm3 = vnez %v16899_v32  ;;  %v16903_v32 = vld [vmem:[#allocation32_spill] sm:$0xff] }
 0x390   : > { %v11046_v27 = vpop.f32.mrb[88].mxu1 }
 0x391   : > { %v11194_v59 = vpop.f32.mrb[92].mxu0  ;;  %v6300_v28 = vsel %vm13824_vm14, %v11046_v27, 0.0  ;;  %v4482_v1 = vpop.f32.mrb[89].mxu1 }
 0x392   : > { %v5205_v52 = vpop.f32.mrb[93].mxu0  ;;  %v15090_v25 = vadd.f32 %v11190_v58, %v6300_v28  ;;  %v6298_v8 = vsel %vm13828_vm15, %v4482_v1, 0.0  ;;  %v11047_v23 = vpop.f32.mrb[90].mxu1  ;;  %vm16914_vm15 = vsmask.f32 256 }
 0x393   : > { %v11195_v14 = vpop.f32.mrb[94].mxu0  ;;  %v15094_v31 = vadd.f32 %v6298_v8, %v5189_v2  ;;  %v15096_v48 = vadd.f32 %v11191_v11, %v11047_v23  ;;  %v4485_v0 = vpop.f32.mrb[91].mxu1  ;;  %v12560_v8 = vld [vmem:[%s16338_s5 + $0x120] sm:$0xff]   ;;  %v12562_v23 = vld [vmem:[%s16338_s5 + $0xf0] sm:$0xff]   ;;  %vm16915_vm14 = vmmov %vm16914_vm15 }
 0x394   : > { %v5208_v62 = vpop.f32.mrb[95].mxu0  ;;  %v15098_v38 = vadd.f32 %v5192_v50, %v4485_v0  ;;  %v12558_v50 = vld [vmem:[%s16338_s5 + $0x118] sm:$0xff]  }
 0x395   : > { %11490 = vmatprep.subr.bf16.mxu1 %v12558_v50  ;;  %v12564_v0 = vld [vmem:[%s16338_s5 + $0x138] sm:$0xff]  }
 0x396   : > { %11491 = vmatpush3.bf16.msra.mxu1 %v12558_v50 }
 0x397   : > { %11492 = vmatprep.subr.bf16.mxu1 %v12560_v8 }
 0x398   : > { %v11050_v33 = vpop.f32.mrb[92].mxu1 }
 0x399   : > { %v6304_v24 = vsel %vm16898_vm2, %v11050_v33, 0.0  ;;  %v4498_v3 = vpop.f32.mrb[93].mxu1  ;;  %v15139_v33 = vld [vmem:[%s16338_s5] sm:$0xff]   ;;  %vm16904_vm2 = vnez %v16903_v32 }
 0x39a   : > { %v15102_v58 = vadd.f32 %v11194_v59, %v6304_v24  ;;  %v6302_v57 = vsel %vm16900_vm3, %v4498_v3, 0.0  ;;  %v11051_v27 = vpop.f32.mrb[94].mxu1  ;;  %v12559_v59 = vld [vmem:[%s16338_s5 + $0xe8] sm:$0xff]   ;;  %11493 = vmatpush3.bf16.msra.mxu1 %v12560_v8  ;;  %v12570_v24 = vld [vmem:[%s16338_s5 + $0x40] sm:$0xff]   ;;  %v16505_v3 = vshll.u32 %v15049_v39, 16 }
 0x39b   : > { %v15106_v28 = vadd.f32 %v6302_v57, %v5205_v52  ;;  %v15108_v2 = vadd.f32 %v11195_v14, %v11051_v27  ;;  %v4501_v11 = vpop.f32.mrb[95].mxu1  ;;  %11350 = vmatprep.subr.bf16.mxu0 %v12559_v59  ;;  %v12561_v52 = vld [vmem:[%s16338_s5 + $0x128] sm:$0xff]   ;;  %v12563_v14 = vld [vmem:[%s16338_s5 + $0x130] sm:$0xff]  }
 0x39c   : > { %v15110_v1 = vadd.f32 %v5208_v62, %v4501_v11  ;;  %11351 = vmatpush3.bf16.msra.mxu0 %v12559_v59  ;;  %11494 = vmatprep.subr.bf16.mxu1 %v12561_v52  ;;  %v12565_v62 = vld [vmem:[%s16338_s5 + $0xf8] sm:$0xff]   ;;  %v15148_v57 = vrot.slane %v16505_v3, 1  ;;  %v15156_v59 = vld [vmem:[%s16337_s4] ss:$0 sm:$0xff] }
 0x39d   : > { %11352 = vmatprep.subr.bf16.mxu0 %v12562_v23 }
 0x39e   : > { %11495 = vmatpush3.bf16.msra.mxu1 %v12561_v52 }
 0x39f   : > { %11496 = vmatprep.subr.bf16.mxu1 %v12563_v14 }
 0x3a0   : > { %11353 = vmatpush3.bf16.msra.mxu0 %v12562_v23 }
 0x3a1   : > { %11354 = vmatprep.subr.bf16.mxu0 %v12565_v62 }
 0x3a2   : > { %11497 = vmatpush3.bf16.msra.mxu1 %v12563_v14  ;;  %v16901_v14 = vld [vmem:[#allocation31_spill] sm:$0xff] }
 0x3a3   : > { %11498 = vmatprep.subr.bf16.mxu1 %v12564_v0  ;;  %vm16902_vm3 = vnez %v16901_v14 }
 0x3a4   : > { %11355 = vmatpush3.bf16.msra.mxu0 %v12565_v62 }
 0x3a5   : > { %11388 = vmatprep.subr.bf16.mxu0 %v15139_v33 }
 0x3a6   : > { %11499 = vmatpush3.bf16.msra.mxu1 %v12564_v0 }
 0x3a7   : > { %11532 = vmatprep.subr.bf16.mxu1 %v12570_v24 }
 0x420   : > { %v11310_v11 = vpop.f32.mrb[96].mxu1 }
 0x421   : > { %v6372_v50 = vadd.f32 %v11310_v11, %v15000_v42  ;;  %v6115_v8 = vpop.f32.mrb[97].mxu1  ;;  %v6443_v11 = vld [vmem:[%s12852_s23 + $0x10] sm:$0xff] }
 0x422   : > { %v6370_v52 = vadd.f32 %v15004_v46, %v6115_v8  ;;  %v11311_v23 = vpop.f32.mrb[98].mxu1  ;;  %v6442_v8 = vld [vmem:[%s12852_s23 + $0x8] sm:$0xff] }
 0x423   : > { %v6341_v0 = vsel %vm16902_vm3, %v11311_v23, 0.0  ;;  %v6118_v62 = vpop.f32.mrb[99].mxu1  ;;  %v6411_v3 = vadd.f32 %v15156_v59, %v6372_v50 }
 0x424   : > { %v6373_v27 = vadd.f32 %v6341_v0, %v15006_v30  ;;  %v6339_v42 = vsel %vm16904_vm2, %v6118_v62, 0.0  ;;  %v6409_v43 = vadd.f32 %v15156_v59, %v6370_v52  ;;  %vm16906_vm2 = vnez %v16905_v49 }
 0x425   : > { %v6371_v61 = vadd.f32 %v6339_v42, %v15008_v51  ;;  %v6475_v14 = vadd.f32 %v6443_v11, %v6411_v3  ;;  %v6589_v3 = vshrl.u32 %v6570_v12, 16  ;;  %v6448_v11 = vld [vmem:[%s12852_s23 + $0x38] sm:$0xff] }
 0x426   : > { %v6412_v46 = vadd.f32 %v15156_v59, %v6373_v27  ;;  %v6473_v30 = vadd.f32 %v6441_v53, %v6409_v43  ;;  %v16907_v53 = vld [vmem:[#allocation34_spill] sm:$0xff] }
 0x427   : > { %v6410_v23 = vadd.f32 %v15156_v59, %v6371_v61  ;;  %vm16908_vm3 = vnez %v16907_v53  ;;  %v12573_v53 = vld [vmem:[%s16338_s5 + $0x50] sm:$0xff]  }
 0x428   : > { %v6476_v45 = vadd.f32 %v6444_v21, %v6412_v46  ;;  %v11314_v50 = vpop.f32.mrb[100].mxu1 }
 0x429   : > { %v6474_v0 = vadd.f32 %v6442_v8, %v6410_v23  ;;  %v6376_v62 = vadd.f32 %v11314_v50, %v15016_v54  ;;  %v6131_v32 = vpop.f32.mrb[101].mxu1  ;;  %v6445_v23 = vld [vmem:[%s12852_s23 + $0x20] sm:$0xff] }
 0x42a   : > { %v15174_v52 = vpack.c.bf16 %v6476_v45, %v6475_v14  ;;  %v6374_v51 = vadd.f32 %v15020_v36, %v6131_v32  ;;  %v11315_v42 = vpop.f32.mrb[102].mxu1  ;;  %v12571_v32 = vld [vmem:[%s16338_s5 + $0x48] sm:$0xff]   ;;  %v6447_v14 = vld [vmem:[%s12852_s23 + $0x30] sm:$0xff] }
 0x42b   : > { %v15177_v27 = vpack.c.bf16 %v6474_v0, %v6473_v30  ;;  %v6345_v61 = vsel %vm16906_vm2, %v11315_v42, 0.0  ;;  %v6134_v21 = vpop.f32.mrb[103].mxu1  ;;  %v6415_v54 = vadd.f32 %v15156_v59, %v6376_v62  ;;  %v6446_v30 = vld [vmem:[%s12852_s23 + $0x28] sm:$0xff] }
 0x42c   : > { %6522 = vst [vmem:[#allocation2 + $0x18] sm:$0xff] %v15174_v52  ;;  %v6377_v45 = vadd.f32 %v6345_v61, %v15022_v18  ;;  %v6343_v43 = vsel %vm16908_vm3, %v6134_v21, 0.0  ;;  %v16506_v36 = vshrl.u32 %v15174_v52, 16  ;;  %v6413_v12 = vadd.f32 %v15156_v59, %v6374_v51 }
 0x42d   : > { %6521 = vst [vmem:[#allocation2 + $0x10] sm:$0xff] %v15177_v27  ;;  %v6375_v46 = vadd.f32 %v6343_v43, %v15024_v37  ;;  %v16507_v8 = vshrl.u32 %v15177_v27, 16  ;;  %v6596_v18 = vshll.u32 %v15177_v27, 16  ;;  %11500 = vmatprep.mubr.bf16.mxu1 %v15177_v27  ;;  %v16508_v62 = vshll.u32 %v15174_v52, 16 }
 0x42e   : > { %v6416_v50 = vadd.f32 %v15156_v59, %v6377_v45  ;;  %v15203_v0 = vrot.slane %v16506_v36, 7  ;;  %11501 = vmatmul.mubr.bf16.vlgmr.msra.gmra.mrb[128].mxu1 %v15174_v52  ;;  %v6591_v51 = vrot.slane %v6589_v3, 7  ;;  %v6479_v21 = vadd.f32 %v6447_v14, %v6415_v54 }
 0x42f   : > { %v6414_v37 = vadd.f32 %v15156_v59, %v6375_v46  ;;  %v6595_v42 = vrot.slane %v16507_v8, 7  ;;  %11533 = vmatpush3.bf16.msra.mxu1 %v12570_v24  ;;  %v15210_v61 = vrot.slane %v6596_v18, 1  ;;  %v6477_v46 = vadd.f32 %v6445_v23, %v6413_v12  ;;  %v16912_v12 = vld [vmem:[#allocation35_spill] sm:$0xff] }
 0x430   : > { %v6480_v45 = vadd.f32 %v6448_v11, %v6416_v50  ;;  %v11318_v43 = vpop.f32.mrb[104].mxu1  ;;  %v6606_v36 = vor.u32 %v16508_v62, %v15203_v0  ;;  %11534 = vmatprep.subr.bf16.mxu1 %v12571_v32  ;;  %v16909_v11 = vor.u32 %v15148_v57, %v15052_v7  ;;  %vm16910_vm3 = vsmask.f32 7424  ;;  %v12567_v57 = vld [vmem:[%s16338_s5 + $0x8] sm:$0xff]  }
 0x431   : > { %v6478_v3 = vadd.f32 %v6446_v30, %v6414_v37  ;;  %v6380_v49 = vadd.f32 %v11318_v43, %v15030_v41  ;;  %v6147_v8 = vpop.f32.mrb[105].mxu1  ;;  %v15219_v24 = vor.u32 %v6596_v18, %v6595_v42  ;;  %vm16913_vm2 = vnez %v16912_v12  ;;  %v16916_v37 = vld [vmem:[#allocation36_spill] sm:$0xff] }
 0x432   : > { %v15221_v6 = vpack.c.bf16 %v6480_v45, %v6479_v21  ;;  %v6378_v54 = vadd.f32 %v15034_v40, %v6147_v8  ;;  %v11319_v14 = vpop.f32.mrb[106].mxu1  ;;  %v15229_v50 = vsel %vm16910_vm3, %v16909_v11, %v15210_v61  ;;  %v15238_v40 = vsel %vm16915_vm14, %v6595_v42, %v6606_v36  ;;  %v6452_v42 = vld [vmem:[%s12852_s23 + $0x58] sm:$0xff] }
 0x433   : > { %16911 = vst [vmem:[#allocation7_spill] sm:$0xff] %v15229_v50  ;;  %v15231_v62 = vpack.c.bf16 %v6478_v3, %v6477_v46  ;;  %v6349_v41 = vsel %vm16913_vm2, %v11319_v14, 0.0  ;;  %v6150_v18 = vpop.f32.mrb[107].mxu1  ;;  %v6599_v23 = vsel %vm16914_vm15, %v6591_v51, %v15219_v24  ;;  %11535 = vmatpush3.bf16.msra.mxu1 %v12571_v32  ;;  %v6419_v8 = vadd.f32 %v15156_v59, %v6380_v49  ;;  %v12574_v51 = vld [vmem:[%s16338_s5 + $0x58] sm:$0xff]   ;;  %v6451_v32 = vld [vmem:[%s12852_s23 + $0x50] sm:$0xff]  ;;  %v6449_v46 = vld [vmem:[%s12852_s23 + $0x40] sm:$0xff] }
 0x434   : > { %6524 = vst [vmem:[#allocation2 + $0x28] sm:$0xff] %v15221_v6  ;;  %v6381_v30 = vadd.f32 %v6349_v41, %v15036_v29  ;;  %vm16917_vm3 = vnez %v16916_v37  ;;  %11356 = vmatprep.mubr.bf16.mxu0 %v6599_v23  ;;  %v16511_v36 = vshrl.u32 %v15221_v6, 16  ;;  %11536 = vmatprep.subr.bf16.mxu1 %v12573_v53  ;;  %v6417_v49 = vadd.f32 %v15156_v59, %v6378_v54  ;;  %v15260_v43 = vld [vmem:[#allocation2 + $0x18] sm:$0xff]  ;;  %v6450_v14 = vld [vmem:[%s12852_s23 + $0x48] sm:$0xff] }
 0x435   : > { %v6347_v21 = vsel %vm16917_vm3, %v6150_v18, 0.0  ;;  %6523 = vst [vmem:[#allocation2 + $0x20] sm:$0xff] %v15231_v62  ;;  %11357 = vmatmul.mubr.bf16.vlgmr.msra.gmra.mrb[96].mxu0 %v15238_v40  ;;  %v16512_v45 = vshrl.u32 %v15231_v62, 16  ;;  %11504 = vmatprep.mubr.bf16.mxu1 %v15231_v62  ;;  %16918 = vst [vmem:[#allocation38_spill] sm:$0xff] %v15260_v43  ;;  %v16513_v11 = vshll.u32 %v15221_v6, 16  ;;  %v6483_v23 = vadd.f32 %v6451_v32, %v6419_v8 }
 0x436   : > { %v6379_v29 = vadd.f32 %v6347_v21, %v15038_v9  ;;  %v6420_v3 = vadd.f32 %v15156_v59, %v6381_v30  ;;  %11389 = vmatpush3.bf16.msra.mxu0 %v15139_v33  ;;  %11505 = vmatmul.mubr.bf16.gmra.mrb[132].mxu1 %v15221_v6  ;;  %v15270_v9 = vrot.slane %v16511_v36, 7  ;;  %v12568_v33 = vld [vmem:[%s16338_s5 + $0x10] sm:$0xff]   ;;  %v6481_v41 = vadd.f32 %v6449_v46, %v6417_v49  ;;  %vm16922_vm3 = vmmov %vm16915_vm14 }
 0x437   : > { %v6611_v18 = vrot.slane %v16512_v45, 7  ;;  %11390 = vmatprep.subr.bf16.mxu0 %v12567_v57  ;;  %11537 = vmatpush3.bf16.msra.mxu1 %v12573_v53  ;;  %v16919_v53 = vshll.u32 %v15231_v62, 16  ;;  %v16920_v45 = vld [vmem:[#allocation39_spill] sm:$0xff] }
 0x438   : > { %v6418_v54 = vadd.f32 %v15156_v59, %v6379_v29  ;;  %v6484_v30 = vadd.f32 %v6452_v42, %v6420_v3  ;;  %v11322_v21 = vpop.f32.mrb[108].mxu1  ;;  %v6622_v36 = vor.u32 %v16513_v11, %v15270_v9  ;;  %11538 = vmatprep.subr.bf16.mxu1 %v12574_v51  ;;  %v12576_v29 = vld [vmem:[%s16338_s5 + $0x60] sm:$0xff]   ;;  %vm16921_vm15 = vnez %v16920_v45 }
 0x439   : > { %v6384_v12 = vadd.f32 %v11322_v21, %v15045_v22  ;;  %v6163_v60 = vpop.f32.mrb[109].mxu1  ;;  %v6614_v8 = vor.u32 %v16919_v53, %v6611_v18  ;;  %v6453_v21 = vld [vmem:[%s12852_s23 + $0x60] sm:$0xff] }
 0x43a   : > { %v6482_v37 = vadd.f32 %v6450_v14, %v6418_v54  ;;  %v15289_v32 = vpack.c.bf16 %v6484_v30, %v6483_v23  ;;  %v6382_v42 = vadd.f32 %v15054_v17, %v6163_v60  ;;  %v11323_v3 = vpop.f32.mrb[110].mxu1  ;;  %v15293_v11 = vsel %vm16915_vm14, %v6611_v18, %v6622_v36  ;;  %11391 = vmatpush3.bf16.msra.mxu0 %v12567_v57  ;;  %v12569_v60 = vld [vmem:[%s16338_s5 + $0x18] sm:$0xff]  }
 0x43b   : > { %v6353_v49 = vsel %vm16921_vm15, %v11323_v3, 0.0  ;;  %v6166_v22 = vpop.f32.mrb[111].mxu1  ;;  %v15301_v46 = vsel %vm16922_vm3, %v15203_v0, %v6614_v8  ;;  %11392 = vmatprep.subr.bf16.mxu0 %v12568_v33  ;;  %11539 = vmatpush3.bf16.msra.mxu1 %v12574_v51  ;;  %v16923_v17 = vshll.u32 %v15260_v43, 16  ;;  %v16925_v0 = vld [vmem:[#allocation40_spill] sm:$0xff]  ;;  %v12577_v51 = vld [vmem:[%s16338_s5 + $0x68] sm:$0xff]   ;;  %v6456_v18 = vld [vmem:[%s12852_s23 + $0x78] sm:$0xff]  ;;  %vm16932_vm14 = vnez %v16931_v10 }
 0x43c   : > { %v15295_v55 = vpack.c.bf16 %v6482_v37, %v6481_v41  ;;  %6526 = vst [vmem:[#allocation2 + $0x38] sm:$0xff] %v15289_v32  ;;  %v6423_v37 = vadd.f32 %v15156_v59, %v6384_v12  ;;  %v6385_v36 = vadd.f32 %v6353_v49, %v15056_v44  ;;  %vm16926_vm3 = vnez %v16925_v0  ;;  %v6455_v41 = vld [vmem:[%s12852_s23 + $0x70] sm:$0xff]  ;;  %v6454_v8 = vld [vmem:[%s12852_s23 + $0x68] sm:$0xff] }
 0x43d   : > { %v15308_v57 = vrot.slane %v16923_v17, 1  ;;  %v6351_v14 = vsel %vm16926_vm3, %v6166_v22, 0.0  ;;  %11360 = vmatprep.mubr.bf16.mxu0 %v15301_v46  ;;  %v16514_v54 = vshrl.u32 %v15289_v32, 16  ;;  %11540 = vmatprep.subr.bf16.mxu1 %v12576_v29  ;;  %v6421_v12 = vadd.f32 %v15156_v59, %v6382_v42  ;;  %v12572_v17 = vld [vmem:[%s16338_s5 + $0x20] sm:$0xff]  }
 0x43e   : > { %6525 = vst [vmem:[#allocation2 + $0x30] sm:$0xff] %v15295_v55  ;;  %v6383_v44 = vadd.f32 %v6351_v14, %v15058_v19  ;;  %11361 = vmatmul.mubr.bf16.gmra.mrb[100].mxu0 %v15293_v11  ;;  %v16515_v23 = vshrl.u32 %v15295_v55, 16  ;;  %11508 = vmatprep.mubr.bf16.mxu1 %v15295_v55  ;;  %v16516_v30 = vshrl.u32 %v15260_v43, 16  ;;  %v6424_v53 = vadd.f32 %v15156_v59, %v6385_v36 }
 0x43f   : > { %16924 = vst [vmem:[#allocation8_spill] sm:$0xff] %v15308_v57  ;;  %v16517_v3 = vshll.u32 %v15289_v32, 16  ;;  %11509 = vmatmul.mubr.bf16.gmra.mrb[136].mxu1 %v15289_v32  ;;  %v15336_v42 = vrot.slane %v16514_v54, 7  ;;  %11393 = vmatpush3.bf16.msra.mxu0 %v12568_v33  ;;  %v6487_v33 = vadd.f32 %v6455_v41, %v6423_v37  ;;  %v6485_v49 = vadd.f32 %v6453_v21, %v6421_v12 }
 0x440   : > { %v6422_v19 = vadd.f32 %v15156_v59, %v6383_v44  ;;  %v15342_v22 = vrot.slane %v16515_v23, 7  ;;  %11394 = vmatprep.subr.bf16.mxu0 %v12569_v60  ;;  %11541 = vmatpush3.bf16.msra.mxu1 %v12576_v29  ;;  %v15350_v36 = vor.u32 %v15308_v57, %v16516_v30  ;;  %v6488_v14 = vadd.f32 %v6456_v18, %v6424_v53  ;;  %v11326_v44 = vpop.f32.mrb[112].mxu1  ;;  %v12579_v23 = vld [vmem:[%s16338_s5 + $0x70] sm:$0xff]  }
 0x441   : > { %v6638_v54 = vor.u32 %v16517_v3, %v15336_v42  ;;  %11542 = vmatprep.subr.bf16.mxu1 %v12577_v51  ;;  %v6388_v29 = vadd.f32 %v11326_v44, %v15065_v35  ;;  %v6179_v45 = vpop.f32.mrb[113].mxu1  ;;  %v16928_v30 = vshll.u32 %v15295_v55, 16  ;;  %vm16933_vm3 = vsmask.f32 256 }
 0x442   : > { %16927 = vst [vmem:[#allocation47_spill] sm:$0xff] %v15342_v22  ;;  %v6486_v0 = vadd.f32 %v6454_v8, %v6422_v19  ;;  %v15364_v41 = vpack.c.bf16 %v6488_v14, %v6487_v33  ;;  %v6386_v18 = vadd.f32 %v15070_v4, %v6179_v45  ;;  %v11327_v53 = vpop.f32.mrb[114].mxu1  ;;  %vm16934_vm15 = vmmov %vm16933_vm3  ;;  %v12575_v4 = vld [vmem:[%s16338_s5 + $0x28] sm:$0xff]   ;;  %v6459_v8 = vld [vmem:[%s12852_s23 + $0x90] sm:$0xff] }
 0x443   : > { %v15362_v37 = vor.u32 %v16928_v30, %v15342_v22  ;;  %11395 = vmatpush3.bf16.msra.mxu0 %v12569_v60  ;;  %v6357_v12 = vsel %vm16932_vm14, %v11327_v53, 0.0  ;;  %v6182_v21 = vpop.f32.mrb[115].mxu1  ;;  %v15378_v30 = vsel %vm16934_vm15, %v15342_v22, %v6638_v54  ;;  %v6427_v45 = vadd.f32 %v15156_v59, %v6388_v29  ;;  %v6457_v14 = vld [vmem:[%s12852_s23 + $0x80] sm:$0xff]  ;;  %v6458_v29 = vld [vmem:[%s12852_s23 + $0x88] sm:$0xff]  ;;  %vm16946_vm14 = vmmov %vm16934_vm15 }
 0x444   : > { %16930 = vst [vmem:[#allocation14_spill] sm:$0xff] %v15364_v41  ;;  %v15367_v3 = vpack.c.bf16 %v6486_v0, %v6485_v49  ;;  %11396 = vmatprep.subr.bf16.mxu0 %v12572_v17  ;;  %11543 = vmatpush3.bf16.msra.mxu1 %v12577_v51  ;;  %6528 = vst [vmem:[#allocation2 + $0x48] sm:$0xff] %v15364_v41  ;;  %v6389_v60 = vadd.f32 %v6357_v12, %v15072_v5  ;;  %v16518_v54 = vshrl.u32 %v15364_v41, 16  ;;  %v12580_v51 = vld [vmem:[%s16338_s5 + $0x78] sm:$0xff]  }
 0x445   : > { %16929 = vst [vmem:[#allocation11_spill] sm:$0xff] %v15362_v37  ;;  %v15374_v35 = vsel %vm16933_vm3, %v15270_v9, %v15362_v37  ;;  %v16935_v9 = vld [vmem:[#allocation42_spill] sm:$0xff]  ;;  %11544 = vmatprep.subr.bf16.mxu1 %v12579_v23  ;;  %v6425_v19 = vadd.f32 %v15156_v59, %v6386_v18  ;;  %v6460_v49 = vld [vmem:[%s12852_s23 + $0x98] sm:$0xff]  ;;  %v6491_v53 = vadd.f32 %v6459_v8, %v6427_v45 }
 0x446   : > { %vm16936_vm3 = vnez %v16935_v9  ;;  %11364 = vmatprep.mubr.bf16.mxu0 %v15374_v35  ;;  %6527 = vst [vmem:[#allocation2 + $0x40] sm:$0xff] %v15367_v3  ;;  %v16519_v33 = vshrl.u32 %v15367_v3, 16  ;;  %11512 = vmatprep.mubr.bf16.mxu1 %v15367_v3  ;;  %v6428_v44 = vadd.f32 %v15156_v59, %v6389_v60  ;;  %v15408_v18 = vrot.slane %v16518_v54, 7  ;;  %v12578_v60 = vld [vmem:[%s16338_s5 + $0x30] sm:$0xff]  }
 0x447   : > { %v6355_v0 = vsel %vm16936_vm3, %v6182_v21, 0.0  ;;  %11365 = vmatmul.mubr.bf16.gmra.mrb[104].mxu0 %v15378_v30  ;;  %11513 = vmatmul.mubr.bf16.gmra.mrb[140].mxu1 %v15364_v41  ;;  %v6489_v12 = vadd.f32 %v6457_v14, %v6425_v19  ;;  %v16939_v47 = vshll.u32 %v15367_v3, 16  ;;  %v16948_v14 = vld [vmem:[#allocation44_spill] sm:$0xff] }
 0x448   : > { %v6387_v5 = vadd.f32 %v6355_v0, %v15074_v34  ;;  %11397 = vmatpush3.bf16.msra.mxu0 %v12572_v17  ;;  %v6643_v21 = vrot.slane %v16519_v33, 7  ;;  %11545 = vmatpush3.bf16.msra.mxu1 %v12579_v23  ;;  %v15417_v0 = vld [vmem:[#allocation2 + $0x28] sm:$0xff]  ;;  %v6492_v9 = vadd.f32 %v6460_v49, %v6428_v44  ;;  %v11330_v54 = vpop.f32.mrb[116].mxu1  ;;  %v16938_v17 = vshll.u32 %v15364_v41, 16  ;;  %v15425_v33 = vld [vmem:[%s16338_s5 + $0x1c0] sm:$0xff]  }
 0x449   : > { %11398 = vmatprep.subr.bf16.mxu0 %v12575_v4  ;;  %16937 = vst [vmem:[#allocation6_spill] sm:$0xff] %v15417_v0  ;;  %11546 = vmatprep.subr.bf16.mxu1 %v12580_v51  ;;  %v6392_v26 = vadd.f32 %v11330_v54, %v15078_v20  ;;  %v6195_v23 = vpop.f32.mrb[117].mxu1  ;;  %v16524_v13 = vshll.u32 %v15417_v0, 16  ;;  %v16944_v54 = vld [vmem:[#allocation43_spill] sm:$0xff] }
 0x44a   : > { %v6426_v34 = vadd.f32 %v15156_v59, %v6387_v5  ;;  %v6654_v5 = vor.u32 %v16938_v17, %v15408_v18  ;;  %v15430_v45 = vor.u32 %v16939_v47, %v6643_v21  ;;  %v15432_v8 = vpack.c.bf16 %v6492_v9, %v6491_v53  ;;  %v11331_v44 = vpop.f32.mrb[118].mxu1  ;;  %v6461_v53 = vld [vmem:[%s12852_s23 + $0xa0] sm:$0xff] }
 0x44b   : > { %v6390_v49 = vadd.f32 %v15082_v63, %v6195_v23  ;;  %v6431_v20 = vadd.f32 %v15156_v59, %v6392_v26  ;;  %vm16945_vm3 = vnez %v16944_v54  ;;  %v6198_v9 = vpop.f32.mrb[119].mxu1 }
 0x44c   : > { %v6490_v10 = vadd.f32 %v6458_v29, %v6426_v34  ;;  %16940 = vst [vmem:[#allocation13_spill] sm:$0xff] %v15430_v45  ;;  %16941 = vst [vmem:[#allocation12_spill] sm:$0xff] %v15432_v8  ;;  %v15436_v17 = vsel %vm16934_vm15, %v6643_v21, %v6654_v5  ;;  %11399 = vmatpush3.bf16.msra.mxu0 %v12575_v4  ;;  %v6361_v47 = vsel %vm16945_vm3, %v11331_v44, 0.0  ;;  %11547 = vmatpush3.bf16.msra.mxu1 %v12580_v51  ;;  %v6463_v51 = vld [vmem:[%s12852_s23 + $0xb0] sm:$0xff]  ;;  %v6464_v34 = vld [vmem:[%s12852_s23 + $0xb8] sm:$0xff] }
 0x44d   : > { %16942 = vst [vmem:[#allocation48_spill] sm:$0xff] %v15436_v17  ;;  %v15447_v63 = vsel %vm16946_vm14, %v15336_v42, %v15430_v45  ;;  %11400 = vmatprep.subr.bf16.mxu0 %v12578_v60  ;;  %6530 = vst [vmem:[#allocation2 + $0x58] sm:$0xff] %v15432_v8  ;;  %v6429_v26 = vadd.f32 %v15156_v59, %v6390_v49  ;;  %v6393_v4 = vadd.f32 %v6361_v47, %v15084_v16  ;;  %v6462_v5 = vld [vmem:[%s12852_s23 + $0xa8] sm:$0xff] }
 0x44e   : > { %v15439_v19 = vpack.c.bf16 %v6490_v10, %v6489_v12  ;;  %16947 = vst [vmem:[#allocation49_spill] sm:$0xff] %v15447_v63  ;;  %v12581_v10 = vld [vmem:[%s16338_s5 + $0x38] sm:$0xff]   ;;  %vm16949_vm15 = vnez %v16948_v14  ;;  %11368 = vmatprep.mubr.bf16.mxu0 %v15447_v63  ;;  %v16520_v42 = vshrl.u32 %v15432_v8, 16  ;;  %11580 = vmatprep.subr.bf16.mxu1 %v15425_v33  ;;  %v16950_v47 = vshll.u32 %v15432_v8, 16 }
 0x44f   : > { %v6359_v29 = vsel %vm16949_vm15, %v6198_v9, 0.0  ;;  %11369 = vmatmul.mubr.bf16.gmra.mrb[108].mxu0 %v15436_v17  ;;  %v6432_v21 = vadd.f32 %v15156_v59, %v6393_v4  ;;  %v6537_v4 = vld [vmem:[#allocation2] sm:$0x80]  ;;  %v16952_v45 = vshrl.u32 %v15417_v0, 16  ;;  %vm16958_vm15 = vsmask.f32 256 }
 0x450   : > { %16943 = vst [vmem:[#allocation37_spill] sm:$0xff] %v15439_v19  ;;  %6529 = vst [vmem:[#allocation2 + $0x50] sm:$0xff] %v15439_v19  ;;  %v6391_v12 = vadd.f32 %v6359_v29, %v15086_v56  ;;  %v16521_v16 = vshrl.u32 %v15439_v19, 16  ;;  %11516 = vmatprep.mubr.bf16.mxu1 %v15439_v19  ;;  %v15474_v49 = vrot.slane %v16520_v42, 7  ;;  %11401 = vmatpush3.bf16.msra.mxu0 %v12578_v60  ;;  %v15484_v29 = vld [vmem:[%s16338_s5 + $0x180] sm:$0xff]   ;;  %v15488_v42 = vrot.slane %v16524_v13, 1 }
 0x451   : > { %11517 = vmatmul.mubr.bf16.gmra.mrb[144].mxu1 %v15432_v8  ;;  %11402 = vmatprep.subr.bf16.mxu0 %v12581_v10  ;;  %v6495_v60 = vadd.f32 %v6463_v51, %v6431_v20  ;;  %v6493_v56 = vadd.f32 %v6461_v53, %v6429_v26  ;;  %v6496_v23 = vadd.f32 %v6464_v34, %v6432_v21  ;;  %v16951_v50 = vshll.u32 %v15439_v19, 16  ;;  %vm16960_vm3 = vmmov %vm16958_vm15 }
 0x452   : > { %v6430_v44 = vadd.f32 %v15156_v59, %v6391_v12  ;;  %v6659_v9 = vrot.slane %v16521_v16, 7  ;;  %v11334_v12 = vpop.f32.mrb[120].mxu1  ;;  %v6670_v14 = vor.u32 %v16950_v47, %v15474_v49  ;;  %v15499_v13 = vor.u32 %v15488_v42, %v16952_v45 }
 0x453   : > { %v6396_v54 = vadd.f32 %v11334_v12, %v15090_v25  ;;  %v6211_v15 = vpop.f32.mrb[121].mxu1  ;;  %v15501_v20 = vpack.c.bf16 %v6496_v23, %v6495_v60  ;;  %v6946_v53 = vshrl.u32 %v6537_v4, 16  ;;  %v16954_v34 = vshll.u32 %v15295_v55, 16  ;;  %v6465_v4 = vld [vmem:[%s12852_s23 + $0xc0] sm:$0xff]  ;;  %v6466_v12 = vld [vmem:[%s12852_s23 + $0xc8] sm:$0xff] }
 0x454   : > { %v6494_v16 = vadd.f32 %v6462_v5, %v6430_v44  ;;  %v6662_v57 = vor.u32 %v16951_v50, %v6659_v9  ;;  %v6394_v26 = vadd.f32 %v15094_v31, %v6211_v15  ;;  %v11335_v51 = vpop.f32.mrb[122].mxu1  ;;  %11403 = vmatpush3.bf16.msra.mxu0 %v12581_v10  ;;  %v16956_v50 = vld [vmem:[#allocation45_spill] sm:$0xff]  ;;  %v15517_v15 = vsel %vm16960_vm3, %v6659_v9, %v6670_v14 }
 0x455   : > { %16953 = vst [vmem:[#allocation50_spill] sm:$0xff] %v15501_v20  ;;  %v15506_v25 = vrot.slane %v16954_v34, 1  ;;  %vm16957_vm14 = vnez %v16956_v50  ;;  %v6214_v45 = vpop.f32.mrb[123].mxu1  ;;  %16961 = vst [vmem:[#allocation53_spill] sm:$0xff] %v15517_v15  ;;  %11436 = vmatprep.subr.bf16.mxu0 %v15484_v29  ;;  %v6435_v31 = vadd.f32 %v15156_v59, %v6396_v54  ;;  %v6468_v44 = vld [vmem:[%s12852_s23 + $0xd8] sm:$0xff]  ;;  %v16995_v63 = vshll.u32 %v15049_v39, 16 }
 0x456   : > { %v15508_v21 = vpack.c.bf16 %v6494_v16, %v6493_v56  ;;  %v6365_v5 = vsel %vm16957_vm14, %v11335_v51, 0.0  ;;  %v15514_v23 = vsel %vm16958_vm15, %v15408_v18, %v6662_v57  ;;  %6532 = vst [vmem:[#allocation2 + $0x68] sm:$0xff] %v15501_v20  ;;  %v16962_v16 = vld [vmem:[#allocation46_spill] sm:$0xff]  ;;  %v16525_v57 = vshrl.u32 %v15501_v20, 16  ;;  %v6467_v18 = vld [vmem:[%s12852_s23 + $0xd0] sm:$0xff]  ;;  %v15536_v9 = vld [vmem:[#allocation2 + $0x38] sm:$0xff] }
 0x457   : > { %16959 = vst [vmem:[#allocation52_spill] sm:$0xff] %v15514_v23  ;;  %v6397_v10 = vadd.f32 %v6365_v5, %v15096_v48  ;;  %vm16963_vm2 = vnez %v16962_v16  ;;  %11372 = vmatprep.mubr.bf16.mxu0 %v15514_v23  ;;  %v6433_v14 = vadd.f32 %v15156_v59, %v6394_v26  ;;  %16964 = vst [vmem:[#allocation56_spill] sm:$0xff] %v15536_v9  ;;  %v15547_v26 = vrot.slane %v6946_v53, 7 }
 0x458   : > { %16955 = vst [vmem:[#allocation51_spill] sm:$0xff] %v15508_v21  ;;  %v6363_v56 = vsel %vm16963_vm2, %v6214_v45, 0.0  ;;  %6531 = vst [vmem:[#allocation2 + $0x60] sm:$0xff] %v15508_v21  ;;  %11373 = vmatmul.mubr.bf16.gmra.mrb[112].mxu0 %v15517_v15  ;;  %v16527_v48 = vshrl.u32 %v15508_v21, 16  ;;  %11520 = vmatprep.mubr.bf16.mxu1 %v15508_v21  ;;  %v6499_v51 = vadd.f32 %v6467_v18, %v6435_v31  ;;  %v16966_v53 = vshll.u32 %v15501_v20, 16 }
 0x459   : > { %v6395_v47 = vadd.f32 %v6363_v56, %v15098_v38  ;;  %v6436_v60 = vadd.f32 %v15156_v59, %v6397_v10  ;;  %11521 = vmatmul.mubr.bf16.gmra.mrb[148].mxu1 %v15501_v20  ;;  %v15545_v38 = vrot.slane %v16525_v57, 7  ;;  %v15553_v56 = vld [vmem:[#allocation2 + $0x20] sm:$0xff]  ;;  %v16965_v10 = vshrl.u32 %v15295_v55, 16  ;;  %v11338_v57 = vpop.f32.mrb[124].mxu1  ;;  %vm16974_vm14 = vmmov %vm16958_vm15 }
 0x45a   : > { %v6675_v45 = vrot.slane %v16527_v48, 7  ;;  %v16533_v5 = vshll.u32 %v15536_v9, 16  ;;  %v6497_v50 = vadd.f32 %v6465_v4, %v6433_v14  ;;  %v6400_v48 = vadd.f32 %v11338_v57, %v15102_v58  ;;  %v6227_v37 = vpop.f32.mrb[125].mxu1  ;;  %v6471_v57 = vld [vmem:[%s12852_s23 + $0xf0] sm:$0xff]  ;;  %v16969_v4 = vld [vmem:[#allocation9_spill] sm:$0xff] }
 0x45b   : > { %v6434_v34 = vadd.f32 %v15156_v59, %v6395_v47  ;;  %v15558_v54 = vor.u32 %v15506_v25, %v16965_v10  ;;  %v6500_v16 = vadd.f32 %v6468_v44, %v6436_v60  ;;  %v6686_v47 = vor.u32 %v16966_v53, %v15545_v38  ;;  %v11339_v18 = vpop.f32.mrb[126].mxu1 }
 0x45c   : > { %v16967_v0 = vshll.u32 %v15508_v21, 16  ;;  %v6398_v31 = vadd.f32 %v15106_v28, %v6227_v37  ;;  %v15573_v60 = vrot.slane %v16533_v5, 1  ;;  %v6439_v58 = vadd.f32 %v15156_v59, %v6400_v48 }
 0x45d   : > { %v6498_v22 = vadd.f32 %v6466_v12, %v6434_v34  ;;  %v15567_v10 = vpack.c.bf16 %v6500_v16, %v6499_v51  ;;  %vm16970_vm3 = vnez %v16969_v4  ;;  %v6230_v16 = vpop.f32.mrb[127].mxu1  ;;  %v16972_v12 = vld [vmem:[#allocation10_spill] sm:$0xff]  ;;  %v16541_v34 = vshrl.u32 %v15536_v9, 16 }
 0x45e   : > { %v6678_v43 = vor.u32 %v16967_v0, %v6675_v45  ;;  %v6369_v0 = vsel %vm16970_vm3, %v11339_v18, 0.0  ;;  %vm16973_vm2 = vnez %v16972_v12  ;;  %v6503_v53 = vadd.f32 %v6471_v57, %v6439_v58  ;;  %v6470_v18 = vld [vmem:[%s12852_s23 + $0xe8] sm:$0xff] }
 0x45f   : > { %v15575_v14 = vpack.c.bf16 %v6498_v22, %v6497_v50  ;;  %6534 = vst [vmem:[#allocation2 + $0x78] sm:$0xff] %v15567_v10  ;;  %v6401_v37 = vadd.f32 %v6369_v0, %v15108_v2  ;;  %v6367_v22 = vsel %vm16973_vm2, %v6230_v16, 0.0  ;;  %v15591_v50 = vsel %vm16974_vm14, %v6675_v45, %v6686_v47  ;;  %v6469_v45 = vld [vmem:[%s12852_s23 + $0xe0] sm:$0xff]  ;;  %vm16999_vm2 = vmmov %vm16974_vm14 }
 0x460   : > { %v15583_v28 = vsel %vm16958_vm15, %v15474_v49, %v6678_v43  ;;  %16975 = vst [vmem:[#allocation55_spill] sm:$0xff] %v15591_v50  ;;  %v16534_v48 = vshrl.u32 %v15567_v10, 16  ;;  %v6437_v43 = vadd.f32 %v15156_v59, %v6398_v31  ;;  %v6472_v49 = vld [vmem:[%s12852_s23 + $0xf8] sm:$0xff]  ;;  %v6399_v51 = vadd.f32 %v6367_v22, %v15110_v1  ;;  %vm16984_vm15 = vmmov %vm16974_vm14 }
 0x461   : > { %16968 = vst [vmem:[#allocation58_spill] sm:$0xff] %v15575_v14  ;;  %16971 = vst [vmem:[#allocation54_spill] sm:$0xff] %v15583_v28  ;;  %11376 = vmatprep.mubr.bf16.mxu0 %v15583_v28  ;;  %v6689_v2 = vshrl.u32 %v15575_v14, 16  ;;  %11524 = vmatprep.mubr.bf16.mxu1 %v15575_v14  ;;  %v6440_v47 = vadd.f32 %v15156_v59, %v6401_v37  ;;  %v6700_v0 = vshll.u32 %v15567_v10, 16  ;;  %v6692_v16 = vshll.u32 %v15575_v14, 16 }
 0x462   : > { %6533 = vst [vmem:[#allocation2 + $0x70] sm:$0xff] %v15575_v14  ;;  %11377 = vmatmul.mubr.bf16.gmra.mrb[116].mxu0 %v15591_v50  ;;  %11525 = vmatmul.mubr.bf16.gmra.mrb[152].mxu1 %v15567_v10  ;;  %v6699_v1 = vrot.slane %v16534_v48, 7  ;;  %v6438_v31 = vadd.f32 %v15156_v59, %v6399_v51  ;;  %v15614_v58 = vor.u32 %v15573_v60, %v16541_v34  ;;  %v16976_v5 = vshll.u32 %v15367_v3, 16  ;;  %vm17003_vm13 = vmmov %vm16999_vm2 }
 0x463   : > { %v6691_v22 = vrot.slane %v6689_v2, 7  ;;  %v6504_v57 = vadd.f32 %v6472_v49, %v6440_v47  ;;  %v16977_v12 = vshll.u32 %v15364_v41, 16  ;;  %v6501_v48 = vadd.f32 %v6469_v45, %v6437_v43 }
 0x464   : > { %v6702_v37 = vor.u32 %v6700_v0, %v6699_v1  ;;  %v15618_v44 = vrot.slane %v16976_v5, 1  ;;  %v6502_v50 = vadd.f32 %v6470_v18, %v6438_v31  ;;  %v16978_v51 = vshll.u32 %v15553_v56, 16 }
 0x465   : > { %v8359_v4 = vrot.slane %v16977_v12, 1  ;;  %v6694_v59 = vor.u32 %v6692_v16, %v6691_v22  ;;  %v15624_v28 = vpack.c.bf16 %v6504_v57, %v6503_v53  ;;  %v16981_v49 = vshrl.u32 %v15367_v3, 16 }
 0x466   : > { %v8344_v14 = vrot.slane %v16978_v51, 1  ;;  %v15627_v34 = vsel %vm16974_vm14, %v6691_v22, %v6702_v37  ;;  %v16982_v5 = vshrl.u32 %v15364_v41, 16  ;;  %v15634_v15 = vpack.c.bf16 %v6502_v50, %v6501_v48 }
 0x467   : > { %16979 = vst [vmem:[#allocation57_spill] sm:$0xff] %v15624_v28  ;;  %16980 = vst [vmem:[#allocation59_spill] sm:$0xff] %v15627_v34  ;;  %v8358_v47 = vor.u32 %v15618_v44, %v16981_v49  ;;  %v15638_v12 = vsel %vm16984_vm15, %v15545_v38, %v6694_v59  ;;  %v16986_v43 = vshll.u32 %v15439_v19, 16  ;;  %v16987_v45 = vshll.u32 %v15432_v8, 16 }
 0x468   : > { %v8361_v9 = vor.u32 %v8359_v4, %v16982_v5  ;;  %16983 = vst [vmem:[#allocation60_spill] sm:$0xff] %v15634_v15  ;;  %16985 = vst [vmem:[#allocation61_spill] sm:$0xff] %v15638_v12  ;;  %11380 = vmatprep.mubr.bf16.mxu0 %v15638_v12  ;;  %v6713_v31 = vshrl.u32 %v15624_v28, 16  ;;  %v6716_v22 = vshll.u32 %v15624_v28, 16  ;;  %v16988_v50 = vshll.u32 %v15508_v21, 16  ;;  %11528 = vmatprep.mubr.bf16.mxu1 %v15634_v15 }
 0x469   : > { %v8362_v53 = vrot.slane %v16986_v43, 1  ;;  %v8365_v18 = vrot.slane %v16987_v45, 1  ;;  %6536 = vst [vmem:[#allocation2 + $0x88] sm:$0xff] %v15624_v28  ;;  %v16989_v38 = vshll.u32 %v15501_v20, 16  ;;  %6535 = vst [vmem:[#allocation2 + $0x80] sm:$0xff] %v15634_v15  ;;  %v6705_v37 = vshrl.u32 %v15634_v15, 16 }
 0x46a   : > { %v8368_v48 = vrot.slane %v16988_v50, 1  ;;  %11381 = vmatmul.mubr.bf16.gmra.mrb[120].mxu0 %v15627_v34  ;;  %v6708_v59 = vshll.u32 %v15634_v15, 16  ;;  %v16990_v51 = vshrl.u32 %v15439_v19, 16  ;;  %v16991_v5 = vshrl.u32 %v15432_v8, 16  ;;  %11529 = vmatmul.mubr.bf16.gmra.mrb[156].mxu1 %v15624_v28 }
 0x46b   : > { %v8371_v57 = vrot.slane %v16989_v38, 1  ;;  %v15661_v45 = vrot.slane %v6713_v31, 7  ;;  %v16992_v50 = vshrl.u32 %v15508_v21, 16  ;;  %v16993_v34 = vshrl.u32 %v15501_v20, 16  ;;  %11548 = vmatprep.mubr.bf16.mxu1 %v15049_v39 }
 0x46c   : > { %v8364_v49 = vor.u32 %v8362_v53, %v16990_v51  ;;  %v8367_v43 = vor.u32 %v8365_v18, %v16991_v5  ;;  %v8374_v23 = vrot.slane %v6692_v16, 1  ;;  %v6707_v17 = vrot.slane %v6705_v37, 7 }
 0x46d   : > { %v8370_v38 = vor.u32 %v8368_v48, %v16992_v50  ;;  %v8373_v12 = vor.u32 %v8371_v57, %v16993_v34  ;;  %v8377_v15 = vrot.slane %v6700_v0, 1  ;;  %v8380_v19 = vrot.slane %v6708_v59, 1 }
 0x46e   : > { %v8383_v51 = vrot.slane %v6716_v22, 1  ;;  %v6718_v8 = vor.u32 %v6716_v22, %v15661_v45  ;;  %v16994_v5 = vrot.slane %v15052_v7, 7  ;;  %v7215_v50 = vshrl.u32 %v15553_v56, 16 }
 0x46f   : > { %v8376_v21 = vor.u32 %v8374_v23, %v6689_v2  ;;  %v6710_v20 = vor.u32 %v6708_v59, %v6707_v17  ;;  %v16996_v34 = vshrl.u32 %v15567_v10, 16  ;;  %v15679_v41 = vor.u32 %v8380_v19, %v6705_v37 }
 0x470   : > { %v15674_v28 = vor.u32 %v16995_v63, %v16994_v5  ;;  %v15681_v0 = vor.u32 %v8383_v51, %v6713_v31  ;;  %vm16997_vm15 = vsmask.f32 7424  ;;  %v8346_v63 = vor.u32 %v8344_v14, %v7215_v50 }
 0x471   : > { %v8379_v16 = vor.u32 %v8377_v15, %v16996_v34  ;;  %v15688_v39 = vsel %vm16997_vm15, %v15350_v36, %v8344_v14  ;;  %v16998_v2 = vshll.u32 %v15174_v52, 16  ;;  %v15695_v5 = vsel %vm16999_vm2, %v6699_v1, %v6710_v20  ;;  %vm17000_vm3 = vmmov %vm16997_vm15  ;;  %v12587_v14 = vld [vmem:[%s16338_s5 + $0x1c8] sm:$0xff]  }
 0x472   : > { %v6956_v22 = vsel %vm16974_vm14, %v15547_v26, %v15674_v28  ;;  %v15700_v31 = vsel %vm17000_vm3, %v15499_v13, %v15506_v25  ;;  %vm17001_vm14 = vmmov %vm17000_vm3  ;;  %11384 = vmatprep.mubr.bf16.mxu0 %v15695_v5  ;;  %v15714_v20 = vsel %vm17003_vm13, %v6707_v17, %v6718_v8  ;;  %11549 = vmatmul.mubr.bf16.vlgmr.msra.gmra.mrb[128].mxu1 %v15177_v27 }
 0x473   : > { %v8626_v59 = vrot.slane %v16998_v2, 1  ;;  %v15705_v26 = vsel %vm17001_vm14, %v15558_v54, %v15573_v60  ;;  %vm17002_vm15 = vmmov %vm17000_vm3  ;;  %11385 = vmatmul.mubr.bf16.gmra.mrb[124].mxu0 %v15714_v20  ;;  %11552 = vmatprep.mubr.bf16.mxu1 %v15174_v52 }
 0x474   : > { %v15710_v36 = vsel %vm17002_vm15, %v15614_v58, %v15618_v44  ;;  %vm17004_vm2 = vmmov %vm17000_vm3  ;;  %11404 = vmatprep.mubr.bf16.mxu0 %v6956_v22  ;;  %11581 = vmatpush3.bf16.msra.mxu1 %v15425_v33  ;;  %v12589_v33 = vld [vmem:[%s16338_s5 + $0x1d0] sm:$0xff]  }
 0x475   : > { %v15721_v1 = vsel %vm17004_vm2, %v8346_v63, %v15488_v42  ;;  %vm17005_vm3 = vmmov %vm17004_vm2  ;;  %11582 = vmatprep.subr.bf16.mxu1 %v12587_v14 }
 0x476   : > { %v15724_v37 = vsel %vm17005_vm3, %v8358_v47, %v8359_v4  ;;  %vm17006_vm14 = vmmov %vm17004_vm2  ;;  %v17012_v47 = vshll.u32 %v15231_v62, 16 }
 0x477   : > { %v15727_v34 = vsel %vm17006_vm14, %v8361_v9, %v8362_v53  ;;  %vm17007_vm15 = vmmov %vm17004_vm2  ;;  %v15744_v9 = vsel %vm17004_vm2, %v8376_v21, %v8377_v15  ;;  %v17015_v21 = vshll.u32 %v15221_v6, 16 }
 0x478   : > { %v15731_v2 = vsel %vm17007_vm15, %v8364_v49, %v8365_v18  ;;  %vm17008_vm13 = vmmov %vm17004_vm2  ;;  %v8629_v53 = vrot.slane %v17012_v47, 1  ;;  %11583 = vmatpush3.bf16.msra.mxu1 %v12587_v14 }
 0x479   : > { %v15734_v8 = vsel %vm17008_vm13, %v8367_v43, %v8368_v48  ;;  %vm17009_vm12 = vmmov %vm17004_vm2  ;;  %v8632_v15 = vrot.slane %v17015_v21, 1  ;;  %11584 = vmatprep.subr.bf16.mxu1 %v12589_v33  ;;  %v17031_v21 = vld [vmem:[#allocation37_spill] sm:$0xff] }
 0x47a   : > { %v15737_v17 = vsel %vm17009_vm12, %v8370_v38, %v8371_v57  ;;  %vm17010_vm11 = vmmov %vm17004_vm2  ;;  %v17018_v57 = vshrl.u32 %v15174_v52, 16  ;;  %v17021_v38 = vshrl.u32 %v15221_v6, 16  ;;  %v12583_v52 = vld [vmem:[%s16338_s5 + $0x188] sm:$0xff]   ;;  %11553 = vmatmul.mubr.bf16.gmra.mrb[132].mxu1 %v15231_v62 }
 0x47b   : > { %v15740_v42 = vsel %vm17010_vm11, %v8373_v12, %v8374_v23  ;;  %vm17011_vm3 = vmmov %vm17004_vm2  ;;  %v17014_v12 = vshrl.u32 %v15177_v27, 16  ;;  %vm17017_vm11 = vsmask.f32 256  ;;  %v17019_v27 = vshrl.u32 %v15231_v62, 16  ;;  %11556 = vmatprep.mubr.bf16.mxu1 %v15221_v6  ;;  %v12593_v6 = vld [vmem:[%s16338_s5 + $0x1e8] sm:$0xff]   ;;  %v12588_v62 = vld [vmem:[%s16338_s5 + $0x1a0] sm:$0xff]  }
 0x47c   : > { %v15747_v4 = vsel %vm17011_vm3, %v8379_v16, %v8380_v19  ;;  %vm17013_vm12 = vmmov %vm17004_vm2  ;;  %v17016_v19 = vrot.slane %v15052_v7, 7  ;;  %v8628_v49 = vor.u32 %v8626_v59, %v17018_v57  ;;  %v17022_v7 = vshll.u32 %v15289_v32, 16  ;;  %11585 = vmatpush3.bf16.msra.mxu1 %v12589_v33  ;;  %v17034_v33 = vld [vmem:[#allocation53_spill] sm:$0xff]  ;;  %v17035_v57 = vld [vmem:[#allocation51_spill] sm:$0xff] }
 0x47d   : > { %v15755_v23 = vsel %vm17013_vm12, %v15679_v41, %v8383_v51  ;;  %v8625_v18 = vor.u32 %v15210_v61, %v17014_v12  ;;  %v8631_v43 = vor.u32 %v8629_v53, %v17019_v27  ;;  %vm17020_vm14 = vmmov %vm17004_vm2  ;;  %v8634_v51 = vor.u32 %v8632_v15, %v17021_v38  ;;  %v12590_v12 = vld [vmem:[%s16338_s5 + $0x1d8] sm:$0xff]   ;;  %v17037_v27 = vld [vmem:[#allocation54_spill] sm:$0xff] }
 0x47e   : > { %v6957_v48 = vsel %vm17017_vm11, %v17016_v19, %v15219_v24  ;;  %v8638_v24 = vrot.slane %v17022_v7, 1  ;;  %vm17023_vm15 = vmmov %vm17004_vm2  ;;  %11586 = vmatprep.subr.bf16.mxu1 %v12590_v12  ;;  %v17032_v19 = vld [vmem:[#allocation12_spill] sm:$0xff]  ;;  %v17039_v38 = vld [vmem:[#allocation58_spill] sm:$0xff] }
 0x47f   : > { %v15774_v61 = vsel %vm17020_vm14, %v8625_v18, %v8626_v59  ;;  %v15781_v16 = vsel %vm17023_vm15, %v8628_v49, %v8629_v53  ;;  %vm17024_vm13 = vmmov %vm17004_vm2  ;;  %v15791_v63 = vsel %vm17004_vm2, %v8634_v51, %v15506_v25  ;;  %v17025_v59 = vshrl.u32 %v15289_v32, 16  ;;  %11405 = vmatmul.mubr.bf16.vlgmr.msra.gmra.mrb[96].mxu0 %v6957_v48  ;;  %v12584_v25 = vld [vmem:[%s16338_s5 + $0x190] sm:$0xff]   ;;  %v17036_v49 = vld [vmem:[#allocation50_spill] sm:$0xff] }
 0x480   : > { %v15784_v22 = vsel %vm17024_vm13, %v8631_v43, %v8632_v15  ;;  %vm17026_vm3 = vmmov %vm17004_vm2  ;;  %11408 = vmatprep.mubr.bf16.mxu0 %v15238_v40  ;;  %11437 = vmatpush3.bf16.msra.mxu0 %v15484_v29  ;;  %v12585_v40 = vld [vmem:[%s16338_s5 + $0x198] sm:$0xff]   ;;  %v12594_v29 = vld [vmem:[%s16338_s5 + $0x1b0] sm:$0xff]  }
 0x481   : > { %v8640_v47 = vor.u32 %v8638_v24, %v17025_v59  ;;  %v15797_v53 = vsel %vm17026_vm3, %v15558_v54, %v8638_v24  ;;  %vm17027_vm12 = vmmov %vm17004_vm2  ;;  %11438 = vmatprep.subr.bf16.mxu0 %v12583_v52  ;;  %v12592_v54 = vld [vmem:[%s16338_s5 + $0x1e0] sm:$0xff]   ;;  %11587 = vmatpush3.bf16.msra.mxu1 %v12590_v12  ;;  %v17030_v18 = vld [vmem:[#allocation48_spill] sm:$0xff] }
 0x482   : > { %11588 = vmatprep.subr.bf16.mxu1 %v12592_v54  ;;  %11557 = vmatmul.mubr.bf16.gmra.mrb[136].mxu1 %v15295_v55  ;;  %v12598_v15 = vld [vmem:[%s16338_s5 + $0x140] sm:$0xff]   ;;  %v17033_v48 = vld [vmem:[#allocation52_spill] sm:$0xff]  ;;  %v17038_v43 = vld [vmem:[#allocation55_spill] sm:$0xff] }
 0x483   : > { %v15804_v14 = vsel %vm17027_vm12, %v8640_v47, %v15618_v44  ;;  %11560 = vmatprep.mubr.bf16.mxu1 %v15289_v32  ;;  %v12596_v32 = vld [vmem:[%s16338_s5 + $0x1f8] sm:$0xff]   ;;  %v17028_v44 = vld [vmem:[#allocation14_spill] sm:$0xff]  ;;  %v7169_v51 = vld [vmem:[#allocation2 + $0x10] sm:$0x80] }
 0x484   : > { %11439 = vmatpush3.bf16.msra.mxu0 %v12583_v52  ;;  %v17040_v7 = vld [vmem:[#allocation61_spill] sm:$0xff]  ;;  %v17041_v24 = vld [vmem:[#allocation38_spill] sm:$0xff]  ;;  %v7203_v47 = vshrl.u32 %v7169_v51, 16  ;;  %v17043_v12 = vld [vmem:[#allocation59_spill] sm:$0xff] }
 0x485   : > { %11440 = vmatprep.subr.bf16.mxu0 %v12584_v25  ;;  %11589 = vmatpush3.bf16.msra.mxu1 %v12592_v54  ;;  %v17042_v52 = vshrl.u32 %v17041_v24, 16  ;;  %v17045_v54 = vshll.u32 %v17041_v24, 16  ;;  %vm17050_vm14 = vmmov %vm17017_vm11 }
 0x486   : > { %11590 = vmatprep.subr.bf16.mxu1 %v12593_v6  ;;  %vm17051_vm15 = vmmov %vm17017_vm11 }
 0x487   : > { %11409 = vmatmul.mubr.bf16.gmra.mrb[100].mxu0 %v15301_v46  ;;  %v12595_v46 = vld [vmem:[%s16338_s5 + $0x1f0] sm:$0xff]   ;;  %v7209_v59 = vrot.slane %v17042_v52, 7  ;;  %vm17056_vm13 = vmmov %vm17017_vm11 }
 0x488   : > { %11412 = vmatprep.mubr.bf16.mxu0 %v15293_v11  ;;  %11441 = vmatpush3.bf16.msra.mxu0 %v12584_v25  ;;  %v12591_v11 = vld [vmem:[%s16338_s5 + $0x1a8] sm:$0xff]   ;;  %v17044_v25 = vld [vmem:[#allocation60_spill] sm:$0xff]  ;;  %vm17058_vm2 = vmmov %vm17017_vm11 }
 0x489   : > { %11442 = vmatprep.subr.bf16.mxu0 %v12585_v40  ;;  %11591 = vmatpush3.bf16.msra.mxu1 %v12593_v6  ;;  %v7205_v6 = vrot.slane %v7203_v47, 7  ;;  %vm17060_vm3 = vmmov %vm17058_vm2 }
 0x48a   : > { %11592 = vmatprep.subr.bf16.mxu1 %v12595_v46  ;;  %11561 = vmatmul.mubr.bf16.gmra.mrb[140].mxu1 %v15367_v3  ;;  %vm17062_vm12 = vmmov %vm17058_vm2 }
 0x48b   : > { %11564 = vmatprep.mubr.bf16.mxu1 %v17028_v44 }
 0x48c   : > { %11443 = vmatpush3.bf16.msra.mxu0 %v12585_v40  ;;  %v7212_v40 = vor.u32 %v17045_v54, %v7209_v59  ;;  %v17052_v54 = vld [vmem:[#allocation56_spill] sm:$0xff] }
 0x48d   : > { %11444 = vmatprep.subr.bf16.mxu0 %v12588_v62  ;;  %11593 = vmatpush3.bf16.msra.mxu1 %v12595_v46 }
 0x48e   : > { %11594 = vmatprep.subr.bf16.mxu1 %v12596_v32  ;;  %v7213_v46 = vsel %vm17017_vm11, %v7205_v6, %v7212_v40  ;;  %v17053_v40 = vshrl.u32 %v17052_v54, 16  ;;  %vm17064_vm11 = vsmask.f32 7424 }
 0x48f   : > { %11413 = vmatmul.mubr.bf16.gmra.mrb[104].mxu0 %v15374_v35  ;;  %v12597_v35 = vld [vmem:[%s16338_s5 + $0x1b8] sm:$0xff]  }
 0x490   : > { %11416 = vmatprep.mubr.bf16.mxu0 %v15378_v30  ;;  %11445 = vmatpush3.bf16.msra.mxu0 %v12588_v62  ;;  %v17029_v30 = vld [vmem:[#allocation49_spill] sm:$0xff]  ;;  %v7217_v62 = vrot.slane %v7215_v50, 7  ;;  %v12599_v50 = vld [vmem:[%s16338_s5 + $0x148] sm:$0xff]   ;;  %v7241_v6 = vrot.slane %v17053_v40, 7 }
 0x491   : > { %11446 = vmatprep.subr.bf16.mxu0 %v12591_v11  ;;  %11595 = vmatpush3.bf16.msra.mxu1 %v12596_v32 }
 0x492   : > { %11565 = vmatmul.mubr.bf16.gmra.mrb[144].mxu1 %v17031_v21 }
 0x493   : > { %11568 = vmatprep.mubr.bf16.mxu1 %v17032_v19 }
 0x494   : > { %11447 = vmatpush3.bf16.msra.mxu0 %v12591_v11  ;;  %v17046_v11 = vld [vmem:[#allocation6_spill] sm:$0xff] }
 0x495   : > { %11448 = vmatprep.subr.bf16.mxu0 %v12594_v29  ;;  %v17047_v32 = vshrl.u32 %v17046_v11, 16  ;;  %v17049_v51 = vshll.u32 %v17046_v11, 16 }
 0x497   : > { %11417 = vmatmul.mubr.bf16.gmra.mrb[108].mxu0 %v17029_v30 }
 0x498   : > { %11420 = vmatprep.mubr.bf16.mxu0 %v17030_v18  ;;  %11449 = vmatpush3.bf16.msra.mxu0 %v12594_v29  ;;  %v7225_v29 = vrot.slane %v17047_v32, 7 }
 0x499   : > { %11450 = vmatprep.subr.bf16.mxu0 %v12597_v35 }
 0x49a   : > { %11569 = vmatmul.mubr.bf16.gmra.mrb[148].mxu1 %v17035_v57 }
 0x49b   : > { %11572 = vmatprep.mubr.bf16.mxu1 %v17036_v49 }
 0x49c   : > { %11451 = vmatpush3.bf16.msra.mxu0 %v12597_v35  ;;  %v17048_v35 = vshll.u32 %v15553_v56, 16 }
 0x49d   : > { %11628 = vmatprep.subr.bf16.mxu0 %v12598_v15 }
 0x49e   : > { %v7220_v30 = vor.u32 %v17048_v35, %v7217_v62  ;;  %v12602_v35 = vld [vmem:[%s16338_s5 + $0x160] sm:$0xff]  }
 0x49f   : > { %11421 = vmatmul.mubr.bf16.gmra.mrb[112].mxu0 %v17033_v48 }
 0x4a0   : > { %11424 = vmatprep.mubr.bf16.mxu0 %v17034_v33  ;;  %v7221_v52 = vsel %vm17050_vm14, %v7209_v59, %v7220_v30  ;;  %v17059_v30 = vld [vmem:[#allocation13_spill] sm:$0xff]  ;;  %vm17065_vm14 = vmmov %vm17064_vm11 }
 0x4a2   : > { %11573 = vmatmul.mubr.bf16.gmra.mrb[152].mxu1 %v17039_v38 }
 0x4a3   : > { %11576 = vmatprep.mubr.bf16.mxu1 %v15567_v10 }
 0x4a7   : > { %11425 = vmatmul.mubr.bf16.gmra.mrb[116].mxu0 %v17037_v27 }
 0x4a8   : > { %11428 = vmatprep.mubr.bf16.mxu0 %v17038_v43 }
 0x4aa   : > { %11577 = vmatmul.mubr.bf16.gmra.mrb[156].mxu1 %v17044_v25 }
 0x4ab   : > { %11596 = vmatprep.mubr.bf16.mxu1 %v17041_v24  ;;  %v7228_v24 = vor.u32 %v17049_v51, %v7225_v29  ;;  %v7253_v51 = vsel %vm17060_vm3, %v7241_v6, %v17059_v30 }
 0x4ad   : > { %v7229_v47 = vsel %vm17051_vm15, %v7217_v62, %v7228_v24  ;;  %v12601_v62 = vld [vmem:[%s16338_s5 + $0x158] sm:$0xff]   ;;  %vm17067_vm15 = vmmov %vm17064_vm11 }
 0x4af   : > { %11429 = vmatmul.mubr.bf16.gmra.mrb[120].mxu0 %v17040_v7 }
 0x4b0   : > { %11432 = vmatprep.mubr.bf16.mxu0 %v17043_v12 }
 0x4b2   : > { %11597 = vmatmul.mubr.bf16.vlgmr.msra.gmra.mrb[128].mxu1 %v15553_v56  ;;  %v12600_v56 = vld [vmem:[%s16338_s5 + $0x150] sm:$0xff]  }
 0x4b3   : > { %11600 = vmatprep.mubr.bf16.mxu1 %v17046_v11  ;;  %v17055_v11 = vld [vmem:[#allocation11_spill] sm:$0xff] }
 0x4b7   : > { %11433 = vmatmul.mubr.bf16.gmra.mrb[124].mxu0 %v15695_v5 }
 0x4b8   : > { %11452 = vmatprep.mubr.bf16.mxu0 %v7213_v46  ;;  %v17054_v46 = vshll.u32 %v17052_v54, 16 }
 0x4ba   : > { %11601 = vmatmul.mubr.bf16.gmra.mrb[132].mxu1 %v15295_v55  ;;  %v7244_v59 = vor.u32 %v17054_v46, %v7241_v6  ;;  %v17057_v55 = vld [vmem:[#allocation47_spill] sm:$0xff]  ;;  %v8905_v46 = vld [vmem:[#allocation2 + $0x50] sm:$0xff] }
 0x4bb   : > { %11604 = vmatprep.mubr.bf16.mxu1 %v17052_v54  ;;  %v8901_v54 = vld [vmem:[#allocation2 + $0x30] sm:$0xff]  ;;  %v8904_v6 = vld [vmem:[#allocation2 + $0x48] sm:$0xff] }
 0x4bc   : > { %v7245_v32 = vsel %vm17058_vm2, %v17057_v55, %v7244_v59  ;;  %v8955_v40 = vshll.u32 %v8901_v54, 16  ;;  %v8979_v59 = vshll.u32 %v8904_v6, 16  ;;  %vm17069_vm2 = vmmov %vm17064_vm11  ;;  %v8983_v55 = vshrl.u32 %v8904_v6, 16 }
 0x4bd   : > { %vm17070_vm3 = vmmov %vm17069_vm2 }
 0x4bf   : > { %11453 = vmatmul.mubr.bf16.vlgmr.msra.gmra.mrb[96].mxu0 %v7221_v52  ;;  %v17066_v52 = vld [vmem:[#allocation7_spill] sm:$0xff] }
 0x4c0   : > { %11456 = vmatprep.mubr.bf16.mxu0 %v7229_v47  ;;  %11629 = vmatpush3.bf16.msra.mxu0 %v12598_v15  ;;  %v7237_v15 = vsel %vm17056_vm13, %v7225_v29, %v17055_v11  ;;  %v12603_v29 = vld [vmem:[%s16338_s5 + $0x168] sm:$0xff]   ;;  %vm17068_vm13 = vmmov %vm17064_vm11  ;;  %v8981_v11 = vrot.slane %v8979_v59, 1  ;;  %v8911_v59 = vld [vmem:[#allocation2 + $0x80] sm:$0xff] }
 0x4c1   : > { %11630 = vmatprep.subr.bf16.mxu0 %v12599_v50  ;;  %v12615_v47 = vld [vmem:[%s16338_s5 + $0x208] sm:$0xff]  }
 0x4c2   : > { %11605 = vmatmul.mubr.bf16.gmra.mrb[136].mxu1 %v15367_v3  ;;  %v12604_v3 = vld [vmem:[%s16338_s5 + $0x170] sm:$0xff]  }
 0x4c3   : > { %11608 = vmatprep.mubr.bf16.mxu1 %v17028_v44  ;;  %v12605_v44 = vld [vmem:[%s16338_s5 + $0x178] sm:$0xff]  }
 0x4c4   : > { %11631 = vmatpush3.bf16.msra.mxu0 %v12599_v50 }
 0x4c5   : > { %11632 = vmatprep.subr.bf16.mxu0 %v12600_v56 }
 0x4c7   : > { %11457 = vmatmul.mubr.bf16.gmra.mrb[100].mxu0 %v7237_v15  ;;  %v8906_v15 = vld [vmem:[#allocation2 + $0x58] sm:$0xff] }
 0x4c8   : > { %11460 = vmatprep.mubr.bf16.mxu0 %v7245_v32  ;;  %11633 = vmatpush3.bf16.msra.mxu0 %v12600_v56 }
 0x4c9   : > { %11634 = vmatprep.subr.bf16.mxu0 %v12601_v62 }
 0x4ca   : > { %11609 = vmatmul.mubr.bf16.gmra.mrb[140].mxu1 %v17031_v21  ;;  %v8316_v21 = vld [vmem:[#allocation2 + $0x10] sm:$0xff] }
 0x4cb   : > { %11612 = vmatprep.mubr.bf16.mxu1 %v17032_v19  ;;  %v17061_v19 = vld [vmem:[#allocation57_spill] sm:$0xff] }
 0x4cc   : > { %11635 = vmatpush3.bf16.msra.mxu0 %v12601_v62  ;;  %v8987_v62 = vshll.u32 %v8905_v46, 16 }
 0x4cd   : > { %11636 = vmatprep.subr.bf16.mxu0 %v12602_v35 }
 0x4ce   : > { %v8989_v32 = vrot.slane %v8987_v62, 1 }
 0x4cf   : > { %11461 = vmatmul.mubr.bf16.gmra.mrb[104].mxu0 %v7253_v51  ;;  %v8985_v51 = vor.u32 %v8983_v55, %v8981_v11 }
 0x4d0   : > { %11464 = vmatprep.mubr.bf16.mxu0 %v17030_v18  ;;  %11637 = vmatpush3.bf16.msra.mxu0 %v12602_v35  ;;  %v12606_v18 = vld [vmem:[%s16338_s5 + $0x80] sm:$0xff]  }
 0x4d1   : > { %11638 = vmatprep.subr.bf16.mxu0 %v12603_v29 }
 0x4d2   : > { %11613 = vmatmul.mubr.bf16.gmra.mrb[144].mxu1 %v17035_v57  ;;  %v15940_v57 = vld [vmem:[#allocation2 + $0x8] sm:$0xff] }
 0x4d3   : > { %11616 = vmatprep.mubr.bf16.mxu1 %v17036_v49 }
 0x4d4   : > { %11639 = vmatpush3.bf16.msra.mxu0 %v12603_v29  ;;  %v8907_v29 = vld [vmem:[#allocation2 + $0x60] sm:$0xff] }
 0x4d5   : > { %11640 = vmatprep.subr.bf16.mxu0 %v12604_v3 }
 0x4d7   : > { %11465 = vmatmul.mubr.bf16.gmra.mrb[108].mxu0 %v17033_v48  ;;  %v8337_v48 = vshll.u32 %v8316_v21, 16 }
 0x4d8   : > { %11468 = vmatprep.mubr.bf16.mxu0 %v17034_v33  ;;  %11641 = vmatpush3.bf16.msra.mxu0 %v12604_v3  ;;  %v8995_v3 = vshll.u32 %v8906_v15, 16 }
 0x4d9   : > { %11642 = vmatprep.subr.bf16.mxu0 %v12605_v44  ;;  %v8339_v33 = vrot.slane %v8337_v48, 1 }
 0x4da   : > { %11617 = vmatmul.mubr.bf16.gmra.mrb[148].mxu1 %v17039_v38  ;;  %v8997_v48 = vrot.slane %v8995_v3, 1  ;;  %v8912_v3 = vld [vmem:[#allocation2 + $0x88] sm:$0xff] }
 0x4db   : > { %11620 = vmatprep.mubr.bf16.mxu1 %v15567_v10  ;;  %v8335_v10 = vshrl.u32 %v8316_v21, 16  ;;  %v9003_v21 = vshll.u32 %v8907_v29, 16 }
 0x4dc   : > { %11643 = vmatpush3.bf16.msra.mxu0 %v12605_v44 }
 0x4dd   : > { %11676 = vmatprep.subr.bf16.mxu0 %v12606_v18  ;;  %v8340_v49 = vor.u32 %v8339_v33, %v8335_v10 }
 0x4df   : > { %11469 = vmatmul.mubr.bf16.gmra.mrb[112].mxu0 %v17037_v27  ;;  %v7333_v27 = vsel %vm17062_vm12, %v15661_v45, %v15674_v28  ;;  %v12609_v28 = vld [vmem:[%s16338_s5 + $0x98] sm:$0xff]   ;;  %v12610_v45 = vld [vmem:[%s16338_s5 + $0xa0] sm:$0xff]   ;;  %vm17071_vm12 = vmmov %vm17069_vm2 }
 0x4e0   : > { %11472 = vmatprep.mubr.bf16.mxu0 %v17038_v43  ;;  %v17063_v43 = vld [vmem:[#allocation8_spill] sm:$0xff] }
 0x4e1   : > { %v8342_v38 = vsel %vm17064_vm11, %v8340_v49, %v17063_v43  ;;  %vm17072_vm11 = vmmov %vm17069_vm2  ;;  %v8908_v49 = vld [vmem:[#allocation2 + $0x68] sm:$0xff] }
 0x4e2   : > { %11621 = vmatmul.mubr.bf16.gmra.mrb[152].mxu1 %v17044_v25 }
 0x4e3   : > { %11624 = vmatprep.mubr.bf16.mxu1 %v17061_v19  ;;  %v8991_v19 = vshrl.u32 %v8905_v46, 16 }
 0x4e5   : > { %v8993_v10 = vor.u32 %v8991_v19, %v8989_v32 }
 0x4e7   : > { %11473 = vmatmul.mubr.bf16.gmra.mrb[116].mxu0 %v17040_v7  ;;  %v12611_v7 = vld [vmem:[%s16338_s5 + $0xa8] sm:$0xff]  }
 0x4e8   : > { %11476 = vmatprep.mubr.bf16.mxu0 %v17043_v12  ;;  %v8317_v12 = vld [vmem:[#allocation2 + $0x90] sm:$0x1] }
 0x4e9   : > { %v8387_v25 = vshll.u32 %v8317_v12, 16 }
 0x4ea   : > { %11625 = vmatmul.mubr.bf16.gmra.mrb[156].mxu1 %v15940_v57 }
 0x4eb   : > { %v8389_v24 = vrot.slane %v8387_v25, 1 }
 0x4ed   : > { %v8390_v50 = vsel %vm17065_vm14, %v15681_v0, %v8389_v24  ;;  %v12617_v0 = vld [vmem:[%s16338_s5 + $0x218] sm:$0xff]   ;;  %vm17076_vm14 = vmmov %vm17069_vm2 }
 0x4ef   : > { %11477 = vmatmul.mubr.bf16.gmra.mrb[120].mxu0 %v15695_v5  ;;  %v12607_v5 = vld [vmem:[%s16338_s5 + $0x88] sm:$0xff]  }
 0x4f0   : > { %11480 = vmatprep.mubr.bf16.mxu0 %v15714_v20  ;;  %v12608_v20 = vld [vmem:[%s16338_s5 + $0x90] sm:$0xff]  }
 0x4f7   : > { %11481 = vmatmul.mubr.bf16.gmra.mrb[124].mxu0 %v7333_v27 }
 0x4f8   : > { %11644 = vmatprep.mubr.bf16.mxu0 %v8342_v38 }
 0x4ff   : > { %11645 = vmatmul.mubr.bf16.vlgmr.msra.gmra.mrb[128].mxu0 %v15688_v39 }
 0x500   : > { %11648 = vmatprep.mubr.bf16.mxu0 %v15721_v1  ;;  %11677 = vmatpush3.bf16.msra.mxu0 %v12606_v18 }
 0x501   : > { %11678 = vmatprep.subr.bf16.mxu0 %v12607_v5 }
 0x504   : > { %11679 = vmatpush3.bf16.msra.mxu0 %v12607_v5  ;;  %v8999_v5 = vshrl.u32 %v8906_v15, 16 }
 0x505   : > { %11680 = vmatprep.subr.bf16.mxu0 %v12608_v20 }
 0x507   : > { %11649 = vmatmul.mubr.bf16.gmra.mrb[132].mxu0 %v15700_v31  ;;  %v12612_v31 = vld [vmem:[%s16338_s5 + $0xb0] sm:$0xff]  }
 0x508   : > { %11652 = vmatprep.mubr.bf16.mxu0 %v15705_v26  ;;  %11681 = vmatpush3.bf16.msra.mxu0 %v12608_v20  ;;  %v12613_v26 = vld [vmem:[%s16338_s5 + $0xb8] sm:$0xff]   ;;  %v9005_v20 = vrot.slane %v9003_v21, 1 }
 0x509   : > { %11682 = vmatprep.subr.bf16.mxu0 %v12609_v28 }
 0x50c   : > { %11683 = vmatpush3.bf16.msra.mxu0 %v12609_v28 }
 0x50d   : > { %11684 = vmatprep.subr.bf16.mxu0 %v12610_v45 }
 0x50f   : > { %11653 = vmatmul.mubr.bf16.gmra.mrb[136].mxu0 %v15710_v36  ;;  %v12614_v36 = vld [vmem:[%s16338_s5 + $0x200] sm:$0xff]  }
 0x510   : > { %11656 = vmatprep.mubr.bf16.mxu0 %v15724_v37  ;;  %11685 = vmatpush3.bf16.msra.mxu0 %v12610_v45 }
 0x511   : > { %11686 = vmatprep.subr.bf16.mxu0 %v12611_v7 }
 0x514   : > { %11687 = vmatpush3.bf16.msra.mxu0 %v12611_v7 }
 0x515   : > { %11688 = vmatprep.subr.bf16.mxu0 %v12612_v31 }
 0x517   : > { %11657 = vmatmul.mubr.bf16.gmra.mrb[140].mxu0 %v15727_v34 }
 0x518   : > { %11660 = vmatprep.mubr.bf16.mxu0 %v15731_v2  ;;  %11689 = vmatpush3.bf16.msra.mxu0 %v12612_v31 }
 0x519   : > { %11690 = vmatprep.subr.bf16.mxu0 %v12613_v26 }
 0x51c   : > { %11691 = vmatpush3.bf16.msra.mxu0 %v12613_v26 }
 0x51d   : > { %11724 = vmatprep.subr.bf16.mxu0 %v12614_v36 }
 0x51f   : > { %11661 = vmatmul.mubr.bf16.gmra.mrb[144].mxu0 %v15734_v8 }
 0x520   : > { %11664 = vmatprep.mubr.bf16.mxu0 %v15737_v17 }
 0x527   : > { %11665 = vmatmul.mubr.bf16.gmra.mrb[148].mxu0 %v15740_v42 }
 0x528   : > { %11668 = vmatprep.mubr.bf16.mxu0 %v15744_v9 }
 0x52f   : > { %11669 = vmatmul.mubr.bf16.gmra.mrb[152].mxu0 %v15747_v4 }
 0x530   : > { %11672 = vmatprep.mubr.bf16.mxu0 %v15755_v23  ;;  %v12616_v23 = vld [vmem:[%s16338_s5 + $0x210] sm:$0xff]  }
 0x537   : > { %11673 = vmatmul.mubr.bf16.gmra.mrb[156].mxu0 %v8390_v50 }
 0x538   : > { %11692 = vmatprep.mubr.bf16.mxu0 %v17066_v52  ;;  %v9001_v52 = vor.u32 %v8999_v5, %v8997_v48 }
 0x53f   : > { %11693 = vmatmul.mubr.bf16.vlgmr.msra.gmra.mrb[128].mxu0 %v15774_v61  ;;  %v12618_v61 = vld [vmem:[%s16338_s5 + $0x220] sm:$0xff]  }
 0x540   : > { %11696 = vmatprep.mubr.bf16.mxu0 %v15781_v16  ;;  %11725 = vmatpush3.bf16.msra.mxu0 %v12614_v36  ;;  %v12619_v16 = vld [vmem:[%s16338_s5 + $0x228] sm:$0xff]   ;;  %v8909_v36 = vld [vmem:[#allocation2 + $0x70] sm:$0xff] }
 0x541   : > { %11726 = vmatprep.subr.bf16.mxu0 %v12615_v47 }
 0x544   : > { %11727 = vmatpush3.bf16.msra.mxu0 %v12615_v47  ;;  %v9011_v47 = vshll.u32 %v8908_v49, 16 }
 0x545   : > { %11728 = vmatprep.subr.bf16.mxu0 %v12616_v23 }
 0x547   : > { %11697 = vmatmul.mubr.bf16.gmra.mrb[132].mxu0 %v15784_v22  ;;  %v12620_v22 = vld [vmem:[%s16338_s5 + $0x230] sm:$0xff]  }
 0x548   : > { %11700 = vmatprep.mubr.bf16.mxu0 %v15791_v63  ;;  %11729 = vmatpush3.bf16.msra.mxu0 %v12616_v23  ;;  %v12621_v63 = vld [vmem:[%s16338_s5 + $0x238] sm:$0xff]  }
 0x549   : > { %11730 = vmatprep.subr.bf16.mxu0 %v12617_v0 }
 0x54c   : > { %11731 = vmatpush3.bf16.msra.mxu0 %v12617_v0 }
 0x54d   : > { %11732 = vmatprep.subr.bf16.mxu0 %v12618_v61 }
 0x54f   : > { %11701 = vmatmul.mubr.bf16.gmra.mrb[136].mxu0 %v15797_v53  ;;  %v8299_v53 = vld [vmem:[#allocation2 + $0x88] sm:$0x1] }
 0x550   : > { %11704 = vmatprep.mubr.bf16.mxu0 %v15804_v14  ;;  %11733 = vmatpush3.bf16.msra.mxu0 %v12618_v61  ;;  %v8669_v14 = vshll.u32 %v8299_v53, 16  ;;  %v9007_v53 = vshrl.u32 %v8907_v29, 16 }
 0x551   : > { %11734 = vmatprep.subr.bf16.mxu0 %v12619_v16 }
 0x554   : > { %11735 = vmatpush3.bf16.msra.mxu0 %v12619_v16 }
 0x555   : > { %11736 = vmatprep.subr.bf16.mxu0 %v12620_v22 }
 0x557   : > { %11705 = vmatmul.mubr.bf16.gmra.mrb[140].mxu0 %v15724_v37  ;;  %v8671_v37 = vrot.slane %v8669_v14, 1  ;;  %v9013_v14 = vrot.slane %v9011_v47, 1 }
 0x558   : > { %11708 = vmatprep.mubr.bf16.mxu0 %v15727_v34  ;;  %11737 = vmatpush3.bf16.msra.mxu0 %v12620_v22  ;;  %v9006_v22 = vsel %vm17076_vm14, %v9001_v52, %v9005_v20 }
 0x559   : > { %11738 = vmatprep.subr.bf16.mxu0 %v12621_v63  ;;  %v8672_v34 = vsel %vm17067_vm15, %v15679_v41, %v8671_v37 }
 0x55c   : > { %11739 = vmatpush3.bf16.msra.mxu0 %v12621_v63  ;;  %v9019_v63 = vshll.u32 %v8909_v36, 16 }
 0x55f   : > { %11709 = vmatmul.mubr.bf16.gmra.mrb[144].mxu0 %v15731_v2  ;;  %v8957_v2 = vrot.slane %v8955_v40, 1 }
 0x560   : > { %11712 = vmatprep.mubr.bf16.mxu0 %v15734_v8  ;;  %v8903_v8 = vld [vmem:[#allocation2 + $0x40] sm:$0xff] }
 0x567   : > { %11713 = vmatmul.mubr.bf16.gmra.mrb[148].mxu0 %v15737_v17  ;;  %v8958_v17 = vsel %vm17068_vm13, %v15499_v13, %v8957_v2 }
 0x568   : > { %11716 = vmatprep.mubr.bf16.mxu0 %v15740_v42  ;;  %v8971_v42 = vshll.u32 %v8903_v8, 16 }
 0x56a   : > { %v8973_v56 = vrot.slane %v8971_v42, 1  ;;  %v9021_v42 = vrot.slane %v9019_v63, 1  ;;  %v8914_v63 = vld [vmem:[#allocation2 + $0x98] sm:$0x1] }
 0x56f   : > { %11717 = vmatmul.mubr.bf16.gmra.mrb[152].mxu0 %v15744_v9  ;;  %v8959_v9 = vshrl.u32 %v8901_v54, 16  ;;  %v9009_v54 = vor.u32 %v9007_v53, %v9005_v20 }
 0x570   : > { %11720 = vmatprep.mubr.bf16.mxu0 %v15747_v4 }
 0x571   : > { %v8961_v4 = vor.u32 %v8959_v9, %v8957_v2 }
 0x573   : > { %v8966_v41 = vsel %vm17069_vm2, %v8961_v4, %v15573_v60 }
 0x577   : > { %11721 = vmatmul.mubr.bf16.gmra.mrb[156].mxu0 %v8672_v34  ;;  %v8910_v34 = vld [vmem:[#allocation2 + $0x78] sm:$0xff] }
 0x578   : > { %11740 = vmatprep.mubr.bf16.mxu0 %v15688_v39  ;;  %v8974_v39 = vsel %vm17070_vm3, %v15614_v58, %v8973_v56  ;;  %v8990_v58 = vsel %vm17072_vm11, %v8985_v51, %v8989_v32  ;;  %v9023_v51 = vshrl.u32 %v8909_v36, 16 }
 0x57f   : > { %11741 = vmatmul.mubr.bf16.vlgmr.msra.gmra.mrb[128].mxu0 %v15721_v1  ;;  %v8975_v1 = vshrl.u32 %v8903_v8, 16 }
 0x580   : > { %11744 = vmatprep.mubr.bf16.mxu0 %v8958_v17  ;;  %v9015_v17 = vshrl.u32 %v8908_v49, 16 }
 0x581   : > { %v8977_v13 = vor.u32 %v8975_v1, %v8973_v56 }
 0x583   : > { %v8982_v60 = vsel %vm17071_vm12, %v8977_v13, %v8981_v11  ;;  %v9017_v11 = vor.u32 %v9015_v17, %v9013_v14  ;;  %v9027_v13 = vshll.u32 %v8910_v34, 16  ;;  %v17097_v17 = vld [vmem:[#allocation27_spill] sm:$0xff] }
 0x585   : > { %v11598_v35 = vpop.f32.mrb[128].mxu1 }
 0x586   : > { %v8139_v30 = vpop.f32.mrb[129].mxu1 }
 0x587   : > { %11745 = vmatmul.mubr.bf16.gmra.mrb[132].mxu0 %v8966_v41  ;;  %v11599_v44 = vpop.f32.mrb[130].mxu1 }
 0x588   : > { %11748 = vmatprep.mubr.bf16.mxu0 %v8974_v39  ;;  %v8142_v18 = vpop.f32.mrb[131].mxu1 }
 0x58d   : > { %v11602_v31 = vpop.f32.mrb[132].mxu1 }
 0x58e   : > { %v8155_v24 = vpop.f32.mrb[133].mxu1 }
 0x58f   : > { %11749 = vmatmul.mubr.bf16.gmra.mrb[136].mxu0 %v8982_v60  ;;  %v11603_v0 = vpop.f32.mrb[134].mxu1 }
 0x590   : > { %11752 = vmatprep.mubr.bf16.mxu0 %v8990_v58  ;;  %v8158_v16 = vpop.f32.mrb[135].mxu1  ;;  %v17090_v58 = vld [vmem:[#allocation24_spill] sm:$0xff] }
 0x592   : > { %v11454_v33 = vpop.f32.mrb[96].mxu0 }
 0x593   : > { %v9322_v43 = vsel %vm16873_vm7, %v11454_v33, 0.0  ;;  %v7432_v38 = vpop.f32.mrb[97].mxu0  ;;  %vm17075_vm7 = vmmov %vm17069_vm2 }
 0x594   : > { %v16038_v28 = vadd.f32 %v11598_v35, %v9322_v43  ;;  %v9320_v7 = vsel %vm16875_vm1, %v7432_v38, 0.0  ;;  %v11455_v26 = vpop.f32.mrb[98].mxu0  ;;  %v8998_v61 = vsel %vm17075_vm7, %v8993_v10, %v8997_v48  ;;  %vm17080_vm1 = vmmov %vm17069_vm2  ;;  %v9031_v48 = vshrl.u32 %v8910_v34, 16 }
 0x595   : > { %v16042_v12 = vadd.f32 %v9320_v7, %v8139_v30  ;;  %v16044_v25 = vadd.f32 %v11599_v44, %v11455_v26  ;;  %v7435_v50 = vpop.f32.mrb[99].mxu0  ;;  %v11606_v56 = vpop.f32.mrb[136].mxu1  ;;  %v9022_v29 = vsel %vm17080_vm1, %v9017_v11, %v9021_v42  ;;  %v9035_v30 = vshll.u32 %v8911_v59, 16 }
 0x596   : > { %v16046_v23 = vadd.f32 %v8142_v18, %v7435_v50  ;;  %v8171_v62 = vpop.f32.mrb[137].mxu1  ;;  %v9029_v44 = vrot.slane %v9027_v13, 1  ;;  %v9025_v18 = vor.u32 %v9023_v51, %v9021_v42  ;;  %v9043_v10 = vshll.u32 %v8912_v3, 16 }
 0x597   : > { %11753 = vmatmul.mubr.bf16.gmra.mrb[140].mxu0 %v8998_v61  ;;  %v11607_v55 = vpop.f32.mrb[138].mxu1  ;;  %v9037_v33 = vrot.slane %v9035_v30, 1  ;;  %v9051_v61 = vshll.u32 %v15940_v57, 16 }
 0x598   : > { %11756 = vmatprep.mubr.bf16.mxu0 %v9006_v22  ;;  %v8174_v35 = vpop.f32.mrb[139].mxu1  ;;  %v9033_v26 = vor.u32 %v9031_v48, %v9029_v44  ;;  %v9047_v22 = vshrl.u32 %v8912_v3, 16 }
 0x59a   : > { %v11458_v37 = vpop.f32.mrb[100].mxu0 }
 0x59b   : > { %v9326_v2 = vsel %vm13782_vm4, %v11458_v37, 0.0  ;;  %v7448_v8 = vpop.f32.mrb[101].mxu0  ;;  %vm17079_vm4 = vmmov %vm17069_vm2  ;;  %vm17098_vm2 = vnez %v17097_v17 }
 0x59c   : > { %v16052_v9 = vadd.f32 %v11602_v31, %v9326_v2  ;;  %v9324_v6 = vsel %vm13786_vm5, %v7448_v8, 0.0  ;;  %v11459_v46 = vpop.f32.mrb[102].mxu0  ;;  %v9014_v32 = vsel %vm17079_vm4, %v9009_v54, %v9013_v14  ;;  %vm17083_vm5 = vmmov %vm17080_vm1  ;;  %v9053_v2 = vrot.slane %v9051_v61, 1 }
 0x59d   : > { %v16056_v41 = vadd.f32 %v9324_v6, %v8155_v24  ;;  %v16058_v39 = vadd.f32 %v11603_v0, %v11459_v46  ;;  %v7451_v1 = vpop.f32.mrb[103].mxu0  ;;  %v11610_v38 = vpop.f32.mrb[140].mxu1  ;;  %v9030_v50 = vsel %vm17083_vm5, %v9025_v18, %v9029_v44  ;;  %v9045_v0 = vrot.slane %v9043_v10, 1 }
 0x59e   : > { %v16060_v15 = vadd.f32 %v8158_v16, %v7451_v1  ;;  %v8187_v7 = vpop.f32.mrb[141].mxu1  ;;  %v9039_v16 = vshrl.u32 %v8911_v59, 16  ;;  %v9059_v46 = vshll.u32 %v8914_v63, 16 }
 0x59f   : > { %11757 = vmatmul.mubr.bf16.gmra.mrb[144].mxu0 %v9014_v32  ;;  %v11611_v24 = vpop.f32.mrb[142].mxu1  ;;  %v9049_v40 = vor.u32 %v9047_v22, %v9045_v0 }
 0x5a0   : > { %11760 = vmatprep.mubr.bf16.mxu0 %v9022_v29  ;;  %v8190_v52 = vpop.f32.mrb[143].mxu1  ;;  %v9041_v14 = vor.u32 %v9039_v16, %v9037_v33  ;;  %v9061_v51 = vrot.slane %v9059_v46, 1 }
 0x5a2   : > { %v11462_v60 = vpop.f32.mrb[104].mxu0 }
 0x5a3   : > { %v9330_v21 = vsel %vm13791_vm6, %v11462_v60, 0.0  ;;  %v7464_v19 = vpop.f32.mrb[105].mxu0  ;;  %vm17084_vm6 = vmmov %vm17080_vm1 }
 0x5a4   : > { %v16066_v49 = vadd.f32 %v11606_v56, %v9330_v21  ;;  %v9328_v43 = vsel %vm16885_vm0, %v7464_v19, 0.0  ;;  %v11463_v5 = vpop.f32.mrb[106].mxu0  ;;  %v9038_v47 = vsel %vm17084_vm6, %v9033_v26, %v9037_v33  ;;  %v9055_v56 = vshrl.u32 %v15940_v57, 16  ;;  %vm17088_vm0 = vmmov %vm17080_vm1 }
 0x5a5   : > { %v16070_v20 = vadd.f32 %v9328_v43, %v8171_v62  ;;  %v16072_v45 = vadd.f32 %v11607_v55, %v11463_v5  ;;  %v7467_v31 = vpop.f32.mrb[107].mxu0  ;;  %v11614_v4 = vpop.f32.mrb[144].mxu1  ;;  %v9054_v29 = vsel %vm17088_vm0, %v9049_v40, %v9053_v2  ;;  %vm17092_vm15 = vmmov %vm17088_vm0 }
 0x5a6   : > { %v16074_v36 = vadd.f32 %v8174_v35, %v7467_v31  ;;  %v8203_v1 = vpop.f32.mrb[145].mxu1  ;;  %v9057_v30 = vor.u32 %v9055_v56, %v9053_v2  ;;  %v17099_v56 = vld [vmem:[#allocation28_spill] sm:$0xff] }
 0x5a7   : > { %11761 = vmatmul.mubr.bf16.gmra.mrb[148].mxu0 %v9030_v50  ;;  %v11615_v55 = vpop.f32.mrb[146].mxu1  ;;  %vm17100_vm3 = vnez %v17099_v56 }
 0x5a8   : > { %11764 = vmatprep.mubr.bf16.mxu0 %v9038_v47  ;;  %v8206_v35 = vpop.f32.mrb[147].mxu1  ;;  %v9062_v33 = vsel %vm17092_vm15, %v9057_v30, %v9061_v51 }
 0x5aa   : > { %v11466_v53 = vpop.f32.mrb[108].mxu0 }
 0x5ab   : > { %v9334_v54 = vsel %vm13799_vm8, %v11466_v53, 0.0  ;;  %v7480_v34 = vpop.f32.mrb[109].mxu0  ;;  %vm17087_vm8 = vmmov %vm17080_vm1 }
 0x5ac   : > { %v16081_v8 = vadd.f32 %v11610_v38, %v9334_v54  ;;  %v9332_v42 = vsel %vm13804_vm9, %v7480_v34, 0.0  ;;  %v11467_v6 = vpop.f32.mrb[110].mxu0  ;;  %v9046_v32 = vsel %vm17087_vm8, %v9041_v14, %v9045_v0  ;;  %vm17091_vm9 = vnez %v17090_v58  ;;  %v17095_v0 = vld [vmem:[#allocation26_spill] sm:$0xff] }
 0x5ad   : > { %v16086_v59 = vadd.f32 %v9332_v42, %v8187_v7  ;;  %v16088_v62 = vadd.f32 %v11611_v24, %v11467_v6  ;;  %v7483_v11 = vpop.f32.mrb[111].mxu0  ;;  %v11618_v19 = vpop.f32.mrb[148].mxu1  ;;  %v17093_v24 = vld [vmem:[#allocation25_spill] sm:$0xff]  ;;  %vm17096_vm13 = vnez %v17095_v0 }
 0x5ae   : > { %v16090_v13 = vadd.f32 %v8190_v52, %v7483_v11  ;;  %v8219_v43 = vpop.f32.mrb[149].mxu1 }
 0x5af   : > { %11765 = vmatmul.mubr.bf16.gmra.mrb[152].mxu0 %v9046_v32  ;;  %v11619_v7 = vpop.f32.mrb[150].mxu1 }
 0x5b0   : > { %11768 = vmatprep.mubr.bf16.mxu0 %v9054_v29  ;;  %v8222_v31 = vpop.f32.mrb[151].mxu1 }
 0x5b2   : > { %v11470_v57 = vpop.f32.mrb[112].mxu0 }
 0x5b3   : > { %v9338_v44 = vsel %vm13808_vm10, %v11470_v57, 0.0  ;;  %v7496_v60 = vpop.f32.mrb[113].mxu0  ;;  %vm17094_vm10 = vnez %v17093_v24  ;;  %v16149_v24 = vld [vmem:[%s16339_s6] ss:$0 sm:$0xff] }
 0x5b4   : > { %v16096_v18 = vadd.f32 %v11614_v4, %v9338_v44  ;;  %v9336_v21 = vsel %vm17091_vm9, %v7496_v60, 0.0  ;;  %v11471_v48 = vpop.f32.mrb[114].mxu0  ;;  %v17101_v44 = vld [vmem:[#allocation29_spill] sm:$0xff] }
 0x5b5   : > { %v16101_v10 = vadd.f32 %v9336_v21, %v8203_v1  ;;  %v16103_v27 = vadd.f32 %v11615_v55, %v11471_v48  ;;  %v7499_v38 = vpop.f32.mrb[115].mxu0  ;;  %v11622_v16 = vpop.f32.mrb[152].mxu1  ;;  %vm17102_vm12 = vnez %v17101_v44 }
 0x5b6   : > { %v16105_v5 = vadd.f32 %v8206_v35, %v7499_v38  ;;  %v8235_v14 = vpop.f32.mrb[153].mxu1 }
 0x5b7   : > { %11769 = vmatmul.mubr.bf16.gmra.mrb[156].mxu0 %v9062_v33  ;;  %v11623_v34 = vpop.f32.mrb[154].mxu1 }
 0x5b8   : > { %v8238_v40 = vpop.f32.mrb[155].mxu1 }
 0x5ba   : > { %v11474_v26 = vpop.f32.mrb[116].mxu0 }
 0x5bb   : > { %v9342_v50 = vsel %vm17094_vm10, %v11474_v26, 0.0  ;;  %v7512_v52 = vpop.f32.mrb[117].mxu0 }
 0x5bc   : > { %v16109_v47 = vadd.f32 %v11618_v19, %v9342_v50  ;;  %v9340_v61 = vsel %vm17096_vm13, %v7512_v52, 0.0  ;;  %v11475_v22 = vpop.f32.mrb[118].mxu0  ;;  %v17103_v19 = vld [vmem:[#allocation30_spill] sm:$0xff] }
 0x5bd   : > { %v16113_v63 = vadd.f32 %v9340_v61, %v8219_v43  ;;  %v16115_v53 = vadd.f32 %v11619_v7, %v11475_v22  ;;  %v7515_v37 = vpop.f32.mrb[119].mxu0  ;;  %v11626_v1 = vpop.f32.mrb[156].mxu1  ;;  %vm17104_vm11 = vnez %v17103_v19  ;;  %v17105_v22 = vld [vmem:[#allocation31_spill] sm:$0xff] }
 0x5be   : > { %v16117_v54 = vadd.f32 %v8222_v31, %v7515_v37  ;;  %v8251_v35 = vpop.f32.mrb[157].mxu1  ;;  %vm17106_vm7 = vnez %v17105_v22 }
 0x5bf   : > { %v11627_v51 = vpop.f32.mrb[158].mxu1 }
 0x5c0   : > { %v8254_v57 = vpop.f32.mrb[159].mxu1 }
 0x5c2   : > { %v11478_v2 = vpop.f32.mrb[120].mxu0 }
 0x5c3   : > { %v9346_v42 = vsel %vm17098_vm2, %v11478_v2, 0.0  ;;  %v7528_v4 = vpop.f32.mrb[121].mxu0  ;;  %v17107_v2 = vld [vmem:[#allocation32_spill] sm:$0xff] }
 0x5c4   : > { %v16121_v6 = vadd.f32 %v11622_v16, %v9346_v42  ;;  %v9344_v46 = vsel %vm17100_vm3, %v7528_v4, 0.0  ;;  %v11479_v11 = vpop.f32.mrb[122].mxu0  ;;  %vm17108_vm14 = vnez %v17107_v2  ;;  %v17117_v2 = vld [vmem:[#allocation39_spill] sm:$0xff] }
 0x5c5   : > { %v16125_v55 = vadd.f32 %v9344_v46, %v8235_v14  ;;  %v16127_v32 = vadd.f32 %v11623_v34, %v11479_v11  ;;  %v7531_v29 = vpop.f32.mrb[123].mxu0  ;;  %v17109_v11 = vld [vmem:[#allocation33_spill] sm:$0xff]  ;;  %vm17118_vm8 = vnez %v17117_v2 }
 0x5c6   : > { %v16129_v30 = vadd.f32 %v8238_v40, %v7531_v29  ;;  %vm17110_vm4 = vnez %v17109_v11 }
 0x5ca   : > { %v11482_v3 = vpop.f32.mrb[124].mxu0 }
 0x5cb   : > { %v9350_v60 = vsel %vm17102_vm12, %v11482_v3, 0.0  ;;  %v7544_v58 = vpop.f32.mrb[125].mxu0  ;;  %v17111_v3 = vld [vmem:[#allocation34_spill] sm:$0xff] }
 0x5cc   : > { %v16133_v21 = vadd.f32 %v11626_v1, %v9350_v60  ;;  %v9348_v48 = vsel %vm17104_vm11, %v7544_v58, 0.0  ;;  %v11483_v33 = vpop.f32.mrb[126].mxu0  ;;  %vm17112_vm1 = vnez %v17111_v3 }
 0x5cd   : > { %v16137_v43 = vadd.f32 %v9348_v48, %v8251_v35  ;;  %v16139_v38 = vadd.f32 %v11627_v51, %v11483_v33  ;;  %v7547_v7 = vpop.f32.mrb[127].mxu0 }
 0x5ce   : > { %v16141_v31 = vadd.f32 %v8254_v57, %v7547_v7  ;;  %v17113_v7 = vld [vmem:[#allocation35_spill] sm:$0xff] }
 0x5cf   : > { %vm17114_vm5 = vnez %v17113_v7 }
 0x652   : > { %v11742_v26 = vpop.f32.mrb[128].mxu0 }
 0x653   : > { %v9418_v50 = vadd.f32 %v11742_v26, %v16038_v28  ;;  %v9161_v52 = vpop.f32.mrb[129].mxu0 }
 0x654   : > { %v9416_v0 = vadd.f32 %v16042_v12, %v9161_v52  ;;  %v11743_v61 = vpop.f32.mrb[130].mxu0 }
 0x655   : > { %v9457_v16 = vadd.f32 %v16149_v24, %v9418_v50  ;;  %v9387_v14 = vsel %vm17106_vm7, %v11743_v61, 0.0  ;;  %v9164_v37 = vpop.f32.mrb[131].mxu0  ;;  %v17115_v61 = vld [vmem:[#allocation36_spill] sm:$0xff] }
 0x656   : > { %v9455_v34 = vadd.f32 %v16149_v24, %v9416_v0  ;;  %v9419_v40 = vadd.f32 %v9387_v14, %v16044_v25  ;;  %v9385_v17 = vsel %vm17108_vm14, %v9164_v37, 0.0  ;;  %vm17116_vm6 = vnez %v17115_v61 }
 0x657   : > { %9489 = vst [vmem:[%s16160_s21 + $0x10] sm:$0xff] %v9457_v16  ;;  %v9417_v28 = vadd.f32 %v9385_v17, %v16046_v23 }
 0x658   : > { %9487 = vst [vmem:[%s16160_s21] sm:$0xff] %v9455_v34  ;;  %v9458_v12 = vadd.f32 %v16149_v24, %v9419_v40 }
 0x659   : > { %v9456_v42 = vadd.f32 %v16149_v24, %v9417_v28 }
 0x65a   : > { %9490 = vst [vmem:[%s16160_s21 + $0x18] sm:$0xff] %v9458_v12  ;;  %v11746_v25 = vpop.f32.mrb[132].mxu0 }
 0x65b   : > { %9488 = vst [vmem:[%s16160_s21 + $0x8] sm:$0xff] %v9456_v42  ;;  %v9422_v4 = vadd.f32 %v11746_v25, %v16052_v9  ;;  %v9177_v56 = vpop.f32.mrb[133].mxu0  ;;  %v17119_v25 = vld [vmem:[#allocation40_spill] sm:$0xff] }
 0x65c   : > { %v9420_v46 = vadd.f32 %v16056_v41, %v9177_v56  ;;  %v11747_v1 = vpop.f32.mrb[134].mxu0  ;;  %vm17120_vm0 = vnez %v17119_v25 }
 0x65d   : > { %v9461_v23 = vadd.f32 %v16149_v24, %v9422_v4  ;;  %v9391_v35 = vsel %vm17110_vm4, %v11747_v1, 0.0  ;;  %v9180_v29 = vpop.f32.mrb[135].mxu0 }
 0x65e   : > { %v9459_v51 = vadd.f32 %v16149_v24, %v9420_v46  ;;  %v9423_v57 = vadd.f32 %v9391_v35, %v16058_v39  ;;  %v9389_v44 = vsel %vm17112_vm1, %v9180_v29, 0.0  ;;  %v17121_v35 = vld [vmem:[#allocation41_spill] sm:$0xff] }
 0x65f   : > { %9493 = vst [vmem:[%s16160_s21 + $0x30] sm:$0xff] %v9461_v23  ;;  %v9421_v9 = vadd.f32 %v9389_v44, %v16060_v15  ;;  %vm17122_vm9 = vnez %v17121_v35  ;;  %v17123_v44 = vld [vmem:[#allocation42_spill] sm:$0xff] }
 0x660   : > { %9491 = vst [vmem:[%s16160_s21 + $0x20] sm:$0xff] %v9459_v51  ;;  %v9462_v41 = vadd.f32 %v16149_v24, %v9423_v57  ;;  %vm17124_vm15 = vnez %v17123_v44 }
 0x661   : > { %v9460_v60 = vadd.f32 %v16149_v24, %v9421_v9 }
 0x662   : > { %9494 = vst [vmem:[%s16160_s21 + $0x38] sm:$0xff] %v9462_v41  ;;  %v11750_v58 = vpop.f32.mrb[136].mxu0 }
 0x663   : > { %9492 = vst [vmem:[%s16160_s21 + $0x28] sm:$0xff] %v9460_v60  ;;  %v9426_v19 = vadd.f32 %v11750_v58, %v16066_v49  ;;  %v9193_v39 = vpop.f32.mrb[137].mxu0 }
 0x664   : > { %v9424_v48 = vadd.f32 %v16070_v20, %v9193_v39  ;;  %v11751_v33 = vpop.f32.mrb[138].mxu0 }
 0x665   : > { %v9465_v15 = vadd.f32 %v16149_v24, %v9426_v19  ;;  %v9395_v26 = vsel %vm17114_vm5, %v11751_v33, 0.0  ;;  %v9196_v50 = vpop.f32.mrb[139].mxu0 }
 0x666   : > { %v9463_v52 = vadd.f32 %v16149_v24, %v9424_v48  ;;  %v9427_v0 = vadd.f32 %v9395_v26, %v16072_v45  ;;  %v9393_v16 = vsel %vm17116_vm6, %v9196_v50, 0.0  ;;  %v17125_v48 = vld [vmem:[#allocation43_spill] sm:$0xff]  ;;  %v17127_v50 = vld [vmem:[#allocation44_spill] sm:$0xff] }
 0x667   : > { %9497 = vst [vmem:[%s16160_s21 + $0x50] sm:$0xff] %v9465_v15  ;;  %v9425_v49 = vadd.f32 %v9393_v16, %v16074_v36  ;;  %vm17126_vm10 = vnez %v17125_v48  ;;  %vm17128_vm13 = vnez %v17127_v50 }
 0x668   : > { %9495 = vst [vmem:[%s16160_s21 + $0x40] sm:$0xff] %v9463_v52  ;;  %v9466_v20 = vadd.f32 %v16149_v24, %v9427_v0 }
 0x669   : > { %v9464_v22 = vadd.f32 %v16149_v24, %v9425_v49 }
 0x66a   : > { %9498 = vst [vmem:[%s16160_s21 + $0x58] sm:$0xff] %v9466_v20  ;;  %v11754_v14 = vpop.f32.mrb[140].mxu0 }
 0x66b   : > { %9496 = vst [vmem:[%s16160_s21 + $0x48] sm:$0xff] %v9464_v22  ;;  %v9430_v37 = vadd.f32 %v11754_v14, %v16081_v8  ;;  %v9209_v45 = vpop.f32.mrb[141].mxu0  ;;  %v17129_v22 = vld [vmem:[#allocation45_spill] sm:$0xff] }
 0x66c   : > { %v9428_v34 = vadd.f32 %v16086_v59, %v9209_v45  ;;  %v11755_v40 = vpop.f32.mrb[142].mxu0  ;;  %vm17130_vm2 = vnez %v17129_v22 }
 0x66d   : > { %v9469_v36 = vadd.f32 %v16149_v24, %v9430_v37  ;;  %v9399_v17 = vsel %vm17118_vm8, %v11755_v40, 0.0  ;;  %v9212_v28 = vpop.f32.mrb[143].mxu0  ;;  %v17131_v40 = vld [vmem:[#allocation46_spill] sm:$0xff] }
 0x66e   : > { %v9467_v12 = vadd.f32 %v16149_v24, %v9428_v34  ;;  %v9431_v42 = vadd.f32 %v9399_v17, %v16088_v62  ;;  %v9397_v4 = vsel %vm17120_vm0, %v9212_v28, 0.0  ;;  %vm17132_vm3 = vnez %v17131_v40 }
 0x66f   : > { %9501 = vst [vmem:[%s16160_s21 + $0x70] sm:$0xff] %v9469_v36  ;;  %v9429_v8 = vadd.f32 %v9397_v4, %v16090_v13 }
 0x670   : > { %9499 = vst [vmem:[%s16160_s21 + $0x60] sm:$0xff] %v9467_v12  ;;  %v9470_v59 = vadd.f32 %v16149_v24, %v9431_v42 }
 0x671   : > { %v9468_v56 = vadd.f32 %v16149_v24, %v9429_v8 }
 0x672   : > { %9502 = vst [vmem:[%s16160_s21 + $0x78] sm:$0xff] %v9470_v59  ;;  %v11758_v46 = vpop.f32.mrb[144].mxu0 }
 0x673   : > { %9500 = vst [vmem:[%s16160_s21 + $0x68] sm:$0xff] %v9468_v56  ;;  %v9434_v1 = vadd.f32 %v11758_v46, %v16096_v18  ;;  %v9225_v62 = vpop.f32.mrb[145].mxu0  ;;  %v17135_v56 = vld [vmem:[#allocation10_spill] sm:$0xff] }
 0x674   : > { %v9432_v23 = vadd.f32 %v16101_v10, %v9225_v62  ;;  %v11759_v11 = vpop.f32.mrb[146].mxu0  ;;  %vm17136_vm11 = vnez %v17135_v56 }
 0x675   : > { %v9473_v13 = vadd.f32 %v16149_v24, %v9434_v1  ;;  %v9403_v29 = vsel %vm17122_vm9, %v11759_v11, 0.0  ;;  %v9228_v51 = vpop.f32.mrb[147].mxu0 }
 0x676   : > { %v9471_v57 = vadd.f32 %v16149_v24, %v9432_v23  ;;  %v9435_v3 = vadd.f32 %v9403_v29, %v16103_v27  ;;  %v9401_v9 = vsel %vm17124_vm15, %v9228_v51, 0.0 }
 0x677   : > { %9505 = vst [vmem:[%s16160_s21 + $0x90] sm:$0xff] %v9473_v13  ;;  %v9433_v18 = vadd.f32 %v9401_v9, %v16105_v5 }
 0x678   : > { %9503 = vst [vmem:[%s16160_s21 + $0x80] sm:$0xff] %v9471_v57  ;;  %v9474_v10 = vadd.f32 %v16149_v24, %v9435_v3 }
 0x679   : > { %v9472_v41 = vadd.f32 %v16149_v24, %v9433_v18 }
 0x67a   : > { %9506 = vst [vmem:[%s16160_s21 + $0x98] sm:$0xff] %v9474_v10  ;;  %v11762_v60 = vpop.f32.mrb[148].mxu0 }
 0x67b   : > { %9504 = vst [vmem:[%s16160_s21 + $0x88] sm:$0xff] %v9472_v41  ;;  %v9438_v58 = vadd.f32 %v11762_v60, %v16109_v47  ;;  %v9241_v27 = vpop.f32.mrb[149].mxu0 }
 0x67c   : > { %v9436_v19 = vadd.f32 %v16113_v63, %v9241_v27  ;;  %v11763_v39 = vpop.f32.mrb[150].mxu0 }
 0x67d   : > { %v9477_v5 = vadd.f32 %v16149_v24, %v9438_v58  ;;  %v9407_v33 = vsel %vm17126_vm10, %v11763_v39, 0.0  ;;  %v9244_v15 = vpop.f32.mrb[151].mxu0 }
 0x67e   : > { %v9475_v7 = vadd.f32 %v16149_v24, %v9436_v19  ;;  %v9439_v26 = vadd.f32 %v9407_v33, %v16115_v53  ;;  %v9405_v52 = vsel %vm17128_vm13, %v9244_v15, 0.0 }
 0x67f   : > { %9509 = vst [vmem:[%s16160_s21 + $0xb0] sm:$0xff] %v9477_v5  ;;  %v9437_v47 = vadd.f32 %v9405_v52, %v16117_v54 }
 0x680   : > { %9507 = vst [vmem:[%s16160_s21 + $0xa0] sm:$0xff] %v9475_v7  ;;  %v9478_v63 = vadd.f32 %v16149_v24, %v9439_v26 }
 0x681   : > { %v9476_v0 = vadd.f32 %v16149_v24, %v9437_v47 }
 0x682   : > { %9510 = vst [vmem:[%s16160_s21 + $0xb8] sm:$0xff] %v9478_v63  ;;  %v11766_v61 = vpop.f32.mrb[152].mxu0 }
 0x683   : > { %9508 = vst [vmem:[%s16160_s21 + $0xa8] sm:$0xff] %v9476_v0  ;;  %v9442_v16 = vadd.f32 %v11766_v61, %v16121_v6  ;;  %v9257_v53 = vpop.f32.mrb[153].mxu0 }
 0x684   : > { %v9440_v49 = vadd.f32 %v16125_v55, %v9257_v53  ;;  %v11767_v20 = vpop.f32.mrb[154].mxu0 }
 0x685   : > { %v9481_v54 = vadd.f32 %v16149_v24, %v9442_v16  ;;  %v9411_v14 = vsel %vm17130_vm2, %v11767_v20, 0.0  ;;  %v9260_v37 = vpop.f32.mrb[155].mxu0 }
 0x686   : > { %v9479_v45 = vadd.f32 %v16149_v24, %v9440_v49  ;;  %v9443_v34 = vadd.f32 %v9411_v14, %v16127_v32  ;;  %v9409_v36 = vsel %vm17132_vm3, %v9260_v37, 0.0 }
 0x687   : > { %9513 = vst [vmem:[%s16160_s21 + $0xd0] sm:$0xff] %v9481_v54  ;;  %v9441_v6 = vadd.f32 %v9409_v36, %v16129_v30  ;;  %v17133_v30 = vld [vmem:[#allocation9_spill] sm:$0xff] }
 0x688   : > { %9511 = vst [vmem:[%s16160_s21 + $0xc0] sm:$0xff] %v9479_v45  ;;  %v9482_v55 = vadd.f32 %v16149_v24, %v9443_v34  ;;  %vm17134_vm12 = vnez %v17133_v30 }
 0x689   : > { %v9480_v2 = vadd.f32 %v16149_v24, %v9441_v6 }
 0x68a   : > { %9514 = vst [vmem:[%s16160_s21 + $0xd8] sm:$0xff] %v9482_v55  ;;  %v11770_v17 = vpop.f32.mrb[156].mxu0 }
 0x68b   : > { %9512 = vst [vmem:[%s16160_s21 + $0xc8] sm:$0xff] %v9480_v2  ;;  %v9446_v32 = vadd.f32 %v11770_v17, %v16133_v21  ;;  %v9273_v28 = vpop.f32.mrb[157].mxu0 }
 0x68c   : > { %v9444_v12 = vadd.f32 %v16137_v43, %v9273_v28  ;;  %v11771_v42 = vpop.f32.mrb[158].mxu0 }
 0x68d   : > { %v9485_v25 = vadd.f32 %v16149_v24, %v9446_v32  ;;  %v9415_v4 = vsel %vm17134_vm12, %v11771_v42, 0.0  ;;  %v9276_v8 = vpop.f32.mrb[159].mxu0 }
 0x68e   : > { %v9483_v59 = vadd.f32 %v16149_v24, %v9444_v12  ;;  %v9447_v21 = vadd.f32 %v9415_v4, %v16139_v38  ;;  %v9413_v43 = vsel %vm17136_vm11, %v9276_v8, 0.0 }
 0x68f   : > { %9517 = vst [vmem:[%s16160_s21 + $0xf0] sm:$0xff] %v9485_v25  ;;  %v9445_v46 = vadd.f32 %v9413_v43, %v16141_v31 }
 0x690   : > { %9515 = vst [vmem:[%s16160_s21 + $0xe0] sm:$0xff] %v9483_v59  ;;  %v9486_v1 = vadd.f32 %v16149_v24, %v9447_v21 }
 0x691   : > { %v9484_v38 = vadd.f32 %v16149_v24, %v9445_v46 }
 0x692   : > { %9518 = vst [vmem:[%s16160_s21 + $0xf8] sm:$0xff] %v9486_v1 }
 0x693   : > { %9516 = vst [vmem:[%s16160_s21 + $0xe8] sm:$0xff] %v9484_v38 }
 0x694   : > { %12655 = shalt.err (!%p12652_p3)
}
 0x695   : > { %s12656_s17 = scalar_lea.hbm %s16283_s9, 4096  ;;  %s12660_s20 = scalar_lea.hbm %s16340_s7, 8192 }
 0x696   : > { %p12657_p4 = scmp.ne.s32.totalorder %s16283_s9, %s12656_s17  ;;  %p12661_p9 = scmp.lt.u32.totalorder %s16283_s9, %s16340_s7 }
 0x697   : > { %p12662_p10 = scmp.lt.u32.totalorder %s12660_s20, %s12656_s17  ;;  %p12664_p12 = scmp.lt.u32.totalorder %s12656_s17, %s16283_s9 }
 0x698   : > { %p12658_p7 = pnand %p12657_p4, %p12788_p5 }
 0x699   : > { %p12663_p11 = por %p12662_p10, %p12661_p9 }
 0x69a   : > { %p12659_p8 = pneg %p12658_p7 }
 0x69b   : > { %p12665_p13 = por %p12664_p12, %p12663_p11 }
 0x69d   : > { %p12666_p0 = pnand %p12665_p13, %p12659_p8 }
 0x69f   : > { %12669 = shalt.err (!%p12666_p0)
}
 0x6a0   : > { %s12708_s8 = smov 128   ;;  %s12709_s23 = smov 8  }
 0x6a1   : > { %12364 = dma.vmem_to_hbm [thread:$0]  (%p12788_p5), %s16285_s29, 4096, %s16283_s9, %s16292_s28, %s12708_s8, %s12708_s8, %s12709_s23  }
 0x6a2 PF: > { %p12370_p1 = scmp.ge.s32.totalorder %s12704_s27, 2  ;;  %s9548_s13 = sand.u32 1, %s12692_s24  }
 0x6a3   : > { %s9549_s14 = scalar_lea.sflag [#allocation4], %s9548_s13 }
 0x6a4   : > { %p12367_p2 = pnand %p12370_p1, %p12792_p6 }
 0x6a6   : > { %12687 = dma.done.wait (!%p12367_p2), %s9549_s14, 4096  }
 0x6a7   : > { %12689 = vsyncadd (!%p12367_p2), %s9549_s14, 4294963200  ;;  %p17_p3 = scmp.ge.s32.totalorder %s12775_s30, 4   ;;  %s17137_s24 = smov %s12696_s25 }
 0x6a8   : > { %s17138_s25 = smov %s12700_s26  ;;  %s17139_s26 = smov %s12786_s10 }
 0x6a9   : > { %s17140_s27 = smov %s12775_s30  ;;  %19 = sbr.rel (!%p17_p3) target bundleno = 3 (0x3), region = 83 }
 0x6b0   :  { %9554 = vsyncpa [#allocation4], 1 }
 0x6b1   :  { %9556 = vsyncpa [#allocation4 + $0x1], 1 }

</bundles_post_ra>
